<compile_context>
chip_gen: v7x
topology: tpu7x:2x2x1
jax: 0.10.0
libtpu: 0.0.40
codegen_flags: <defaults>
</compile_context>

<pallas_src>
import functools

import numpy as np
import jax
import jax.numpy as jnp
from jax.experimental import pallas as pl
from jax.experimental.pallas import tpu as pltpu

# ----------------------------- config (args.small = True) -------------------
HIDDEN_DIM = 96        # hdim
CONTEXT_DIM = 64       # cdim
CORR_LEVELS = 4
CORR_RADIUS = 3
COR_PLANES = CORR_LEVELS * (2 * CORR_RADIUS + 1) ** 2   # 196
FNET_DIM = 128


def _round_up(x, m):
    return ((x + m - 1) // m) * m


def _m_tiling(M):
    """Row tiling: one full-extent block for small M, 512-row slabs otherwise."""
    if M <= 512:
        return M, M
    Mp = _round_up(M, 512)
    return Mp, 512


def _prep_rows(M):
    Mp, bm = _m_tiling(M)
    pad = Mp - M

    def pad_rows(x):
        return x if pad == 0 else jnp.pad(x, ((0, pad), (0, 0)))

    return Mp, bm, pad_rows


def _row_spec(bm, k):
    return pl.BlockSpec((bm, k), lambda i: (i, 0))


def _const_spec(shape):
    return pl.BlockSpec(shape, lambda i: (0, 0))


# ----------------------------- Pallas kernels --------------------------------
def _linear_act_kernel(a_ref, w_ref, b_ref, o_ref, *, activation):
    """y = act(a @ w + b); bf16 inputs, f32 accumulate, fused activation."""
    y = jnp.dot(a_ref[...], w_ref[...],
                preferred_element_type=jnp.float32) + b_ref[...]
    if activation == "relu":
        y = jnp.maximum(y, 0.0)
    elif activation == "tanh":
        y = jnp.tanh(y)
    o_ref[...] = y.astype(o_ref.dtype)


def _cnet_kernel(patch_ref, wc_ref, bc_ref, wzr_i_ref, wq_i_ref, bzr_ref, bq_ref,
                 net_ref, zrf_ref, qf_ref):
    """Context net + hoisted iteration-invariant GRU contributions.

    patch(192) -> [net 0:96 (tanh) | pad | inp 128:192 (relu) | pad] in one
    matmul; then zrf = relu(inp) @ W_inp(z|r) + b(z|r) and qf = relu(inp) @
    W_inp(q) + bq are precomputed so `inp` never leaves this kernel.
    """
    y = jnp.dot(patch_ref[...], wc_ref[...],
                preferred_element_type=jnp.float32) + bc_ref[...]
    net = jnp.tanh(y[:, :128])            # cols 96:128 are zero -> tanh(0)=0
    inp = jnp.maximum(y[:, 128:], 0.0)    # cols 64:128 of this tile are zero
    net_ref[...] = net
    inp_bf = inp.astype(jnp.bfloat16)
    zrf_ref[...] = jnp.dot(inp_bf, wzr_i_ref[...],
                           preferred_element_type=jnp.float32) + bzr_ref[...]
    qf_ref[...] = jnp.dot(inp_bf, wq_i_ref[...],
                          preferred_element_type=jnp.float32) + bq_ref[...]


def _corr_kernel(f1_ref, f2_ref, o_ref, *, scale):
    """Batched all-pairs correlation: one batch item per grid step."""
    o_ref[0] = jnp.dot(f1_ref[0], f2_ref[0],
                       preferred_element_type=jnp.float32) * scale


def _update_kernel(corr_ref, fx_ref, fy_ref, net_ref, zrf_ref, qf_ref,
                   wc1_ref, bc1_ref, wf1x_ref, wf1y_ref, bf1_ref,
                   wf2_ref, bf2_ref, wmoc_ref, wmof_ref, bmo_ref,
                   wzr_h_ref, wzr_m_ref, wzr_fx_ref, wzr_fy_ref,
                   wq_h_ref, wq_m_ref, wq_fx_ref, wq_fy_ref,
                   wh1_ref, bh1_ref, wh2_ref, bh2_ref,
                   net_out_ref, delta_ref):
    """One full SmallUpdateBlock iteration, fully fused.

    Motion encoder (corr proj, K=2 flow proj on the VPU, feature merge),
    ConvGRU (packed z|r 256-wide projection -> sigmoid -> rh; q projection ->
    tanh -> state update) and FlowHead (96->128->2), all in one kernel.
    The `inp` contributions (+ biases) arrive precomputed in zrf / qf.
    """
    fx = fx_ref[...]
    fy = fy_ref[...]
    net = net_ref[...]

    # ---- SmallMotionEncoder (1x1 convs as matmuls) --------------------------
    cor = jnp.dot(corr_ref[...], wc1_ref[...],
                  preferred_element_type=jnp.float32)
    cor = jnp.maximum(cor + bc1_ref[...], 0.0)                       # (bm,128)

    flo = jnp.maximum(fx * wf1x_ref[...] + fy * wf1y_ref[...] + bf1_ref[...],
                      0.0)                                           # (bm,128)
    flo = jnp.dot(flo.astype(jnp.bfloat16), wf2_ref[...],
                  preferred_element_type=jnp.float32)
    flo = jnp.maximum(flo + bf2_ref[...], 0.0)                       # (bm,128)

    mot = (jnp.dot(cor.astype(jnp.bfloat16), wmoc_ref[...],
                   preferred_element_type=jnp.float32)
           + jnp.dot(flo.astype(jnp.bfloat16), wmof_ref[...],
                     preferred_element_type=jnp.float32)
           + bmo_ref[...])
    mot = jnp.maximum(mot, 0.0)                                      # (bm,128)

    mot_bf = mot.astype(jnp.bfloat16)
    net_bf = net.astype(jnp.bfloat16)

    # ---- ConvGRU: packed z|r projection -------------------------------------
    zr = (jnp.dot(net_bf, wzr_h_ref[...], preferred_element_type=jnp.float32)
          + jnp.dot(mot_bf, wzr_m_ref[...], preferred_element_type=jnp.float32)
          + fx * wzr_fx_ref[...] + fy * wzr_fy_ref[...]
          + zrf_ref[...])
    zr = 1.0 / (1.0 + jnp.exp(-zr))                                  # sigmoid
    z = zr[:, :128]
    rh = zr[:, 128:] * net

    # ---- ConvGRU: q projection + state update --------------------------------
    q = (jnp.dot(rh.astype(jnp.bfloat16), wq_h_ref[...],
                 preferred_element_type=jnp.float32)
         + jnp.dot(mot_bf, wq_m_ref[...], preferred_element_type=jnp.float32)
         + fx * wq_fx_ref[...] + fy * wq_fy_ref[...]
         + qf_ref[...])
    q = jnp.tanh(q)
    net_new = (1.0 - z) * net + z * q
    net_out_ref[...] = net_new

    # ---- FlowHead 96 -> 128 (relu) -> 2 --------------------------------------
    d = jnp.dot(net_new.astype(jnp.bfloat16), wh1_ref[...],
                preferred_element_type=jnp.float32)
    d = jnp.maximum(d + bh1_ref[...], 0.0)
    delta_ref[...] = (jnp.dot(d.astype(jnp.bfloat16), wh2_ref[...],
                              preferred_element_type=jnp.float32)
                      + bh2_ref[...])


# ----------------------------- Pallas call wrappers ---------------------------
def pallas_linear(a, lin, activation=None):
    """a: (M, K) -> (M, Np) with pre-padded bf16 weight lin['w'] (K, Np)."""
    w, b = lin["w"], lin["b"]
    M, K = a.shape
    Np = w.shape[1]
    Mp, bm, pad_rows = _prep_rows(M)
    out = pl.pallas_call(
        functools.partial(_linear_act_kernel, activation=activation),
        out_shape=jax.ShapeDtypeStruct((Mp, Np), jnp.float32),
        grid_spec=pltpu.PrefetchScalarGridSpec(
            num_scalar_prefetch=0,
            grid=(Mp // bm,),
            in_specs=(_row_spec(bm, K), _const_spec(w.shape),
                      _const_spec(b.shape)),
            out_specs=_row_spec(bm, Np),
        ),
        compiler_params=pltpu.CompilerParams(
            dimension_semantics=("parallel",)),
    )(pad_rows(a.astype(jnp.bfloat16)), w, b)
    return out[:M] if Mp != M else out


def pallas_cnet(params, patches):
    """Context network: returns (net, zrf, qf)."""
    pc = params["cnet"]
    M, K = patches.shape
    Mp, bm, pad_rows = _prep_rows(M)
    net, zrf, qf = pl.pallas_call(
        _cnet_kernel,
        out_shape=(jax.ShapeDtypeStruct((Mp, 128), jnp.float32),
                   jax.ShapeDtypeStruct((Mp, 256), jnp.float32),
                   jax.ShapeDtypeStruct((Mp, 128), jnp.float32)),
        grid_spec=pltpu.PrefetchScalarGridSpec(
            num_scalar_prefetch=0,
            grid=(Mp // bm,),
            in_specs=(_row_spec(bm, K),
                      _const_spec(pc["wc"].shape), _const_spec(pc["bc"].shape),
                      _const_spec(pc["wzr_i"].shape),
                      _const_spec(pc["wq_i"].shape),
                      _const_spec(pc["bzr"].shape),
                      _const_spec(pc["bq"].shape)),
            out_specs=(_row_spec(bm, 128), _row_spec(bm, 256),
                       _row_spec(bm, 128)),
        ),
        compiler_params=pltpu.CompilerParams(
            dimension_semantics=("parallel",)),
    )(pad_rows(patches.astype(jnp.bfloat16)), pc["wc"], pc["bc"],
      pc["wzr_i"], pc["wq_i"], pc["bzr"], pc["bq"])
    if Mp != M:
        net, zrf, qf = net[:M], zrf[:M], qf[:M]
    return net, zrf, qf


_UPDATE_WEIGHT_NAMES = ("wc1", "bc1", "wf1x", "wf1y", "bf1", "wf2", "bf2",
                        "wmoc", "wmof", "bmo",
                        "wzr_h", "wzr_m", "wzr_fx", "wzr_fy",
                        "wq_h", "wq_m", "wq_fx", "wq_fy",
                        "wh1", "bh1", "wh2", "bh2")


def pallas_update(params, corr, flow, net, zrf, qf):
    """One fused update-block iteration: returns (net_new, delta_flow)."""
    pu = params["update"]
    M = corr.shape[0]
    Mp, bm, pad_rows = _prep_rows(M)
    data = (pad_rows(corr.astype(jnp.bfloat16)),
            pad_rows(flow[:, 0:1]), pad_rows(flow[:, 1:2]),
            pad_rows(net), pad_rows(zrf), pad_rows(qf))
    weights = tuple(pu[n] for n in _UPDATE_WEIGHT_NAMES)
    in_specs = ((_row_spec(bm, corr.shape[1]),
                 _row_spec(bm, 1), _row_spec(bm, 1),
                 _row_spec(bm, 128), _row_spec(bm, 256), _row_spec(bm, 128))
                + tuple(_const_spec(w.shape) for w in weights))
    net_new, delta = pl.pallas_call(
        _update_kernel,
        out_shape=(jax.ShapeDtypeStruct((Mp, 128), jnp.float32),
                   jax.ShapeDtypeStruct((Mp, 2), jnp.float32)),
        grid_spec=pltpu.PrefetchScalarGridSpec(
            num_scalar_prefetch=0,
            grid=(Mp // bm,),
            in_specs=in_specs,
            out_specs=(_row_spec(bm, 128), _row_spec(bm, 2)),
        ),
        compiler_params=pltpu.CompilerParams(
            dimension_semantics=("parallel",)),
    )(*data, *weights)
    if Mp != M:
        net_new, delta = net_new[:M], delta[:M]
    return net_new, delta


# ----------------------------- layout helpers (glue) -------------------------
def mc_to_nchw(x, N, H, W):
    C = x.shape[-1]
    return jnp.transpose(x.reshape(N, H, W, C), (0, 3, 1, 2))


def patchify8(img):
    """8x8 space-to-depth: (N,C,H,W) -> (N*(H/8)*(W/8), C*64)."""
    N, C, H, W = img.shape
    x = img.reshape(N, C, H // 8, 8, W // 8, 8)
    x = jnp.transpose(x, (0, 2, 4, 1, 3, 5)).reshape(N, H // 8, W // 8, C * 64)
    return x.reshape(N * (H // 8) * (W // 8), C * 64)


def coords_grid_flat(N, H, W):
    """(N*H*W, 2) coordinate grid, channels = (x, y)."""
    y, x = jnp.meshgrid(jnp.arange(H), jnp.arange(W), indexing="ij")
    xy = jnp.stack([x, y], axis=-1).astype(jnp.float32).reshape(H * W, 2)
    return jnp.tile(xy, (N, 1))


def resize_bilinear_align_corners(x, out_h, out_w):
    """Bilinear resize, align_corners=True (matches F.interpolate in RAFT)."""
    N, C, H, W = x.shape

    def lerp_idx(out_n, in_n):
        if in_n == 1:
            z = jnp.zeros((out_n,), jnp.int32)
            return z, z, jnp.zeros((out_n,), jnp.float32)
        src = jnp.arange(out_n, dtype=jnp.float32) * (in_n - 1) / (out_n - 1)
        i0 = jnp.floor(src).astype(jnp.int32)
        i1 = jnp.minimum(i0 + 1, in_n - 1)
        return i0, i1, src - i0.astype(jnp.float32)

    y0, y1, wy = lerp_idx(out_h, H)
    x0, x1, wx = lerp_idx(out_w, W)
    top = (x[:, :, y0, :] * (1.0 - wy)[None, None, :, None]
           + x[:, :, y1, :] * wy[None, None, :, None])
    out = (top[:, :, :, x0] * (1.0 - wx)[None, None, None, :]
           + top[:, :, :, x1] * wx[None, None, None, :])
    return out


def upflow8(flow):
    N, C, H, W = flow.shape
    return 8.0 * resize_bilinear_align_corners(flow, 8 * H, 8 * W)


def bilinear_sampler(img, coords):
    """img: (B, H, W); coords: (B, P, 2) with last dim (x, y); zero padding."""
    def sample_one(im, xy):
        H, W = im.shape
        x = xy[..., 0]
        y = xy[..., 1]
        x0 = jnp.floor(x)
        y0 = jnp.floor(y)
        wx = x - x0
        wy = y - y0

        def g(ix, iy):
            valid = (ix >= 0) & (ix <= W - 1) & (iy >= 0) & (iy <= H - 1)
            ixc = jnp.clip(ix, 0, W - 1).astype(jnp.int32)
            iyc = jnp.clip(iy, 0, H - 1).astype(jnp.int32)
            return jnp.where(valid, im[iyc, ixc], 0.0)

        return (g(x0, y0) * (1 - wx) * (1 - wy)
                + g(x0 + 1, y0) * wx * (1 - wy)
                + g(x0, y0 + 1) * (1 - wx) * wy
                + g(x0 + 1, y0 + 1) * wx * wy)

    return jax.vmap(sample_one)(img, coords)


# ----------------------------- CorrBlock --------------------------------------
def build_corr_pyramid(fmap1, fmap2, num_levels):
    """fmap*: (N, H8, W8, C) channel-last. One batched Pallas matmul."""
    N, H8, W8, C = fmap1.shape
    HW = H8 * W8
    f1 = fmap1.reshape(N, HW, C).astype(jnp.bfloat16)
    f2t = jnp.transpose(fmap2.reshape(N, HW, C), (0, 2, 1)).astype(jnp.bfloat16)
    scale = 1.0 / float(np.sqrt(C))
    # TODO(synk): at production resolutions HW is large; this kernel would need
    # row/col blocking of the (HW, HW) output instead of full-extent blocks.
    corr = pl.pallas_call(
        functools.partial(_corr_kernel, scale=scale),
        out_shape=jax.ShapeDtypeStruct((N, HW, HW), jnp.float32),
        grid_spec=pltpu.PrefetchScalarGridSpec(
            num_scalar_prefetch=0,
            grid=(N,),
            in_specs=(pl.BlockSpec((1, HW, C), lambda b: (b, 0, 0)),
                      pl.BlockSpec((1, C, HW), lambda b: (b, 0, 0))),
            out_specs=pl.BlockSpec((1, HW, HW), lambda b: (b, 0, 0)),
        ),
        compiler_params=pltpu.CompilerParams(
            dimension_semantics=("parallel",)),
    )(f1, f2t)
    corr = corr.reshape(N * HW, H8, W8)
    pyramid = [corr]
    for _ in range(num_levels - 1):
        c = pyramid[-1]
        B, h, w = c.shape
        c = c.reshape(B, h // 2, 2, w // 2, 2).mean(axis=(2, 4))
        pyramid.append(c)
    return pyramid


def corr_lookup(corr_pyramid, coords, radius):
    """coords: (M, 2). Returns channel-last (M, COR_PLANES)."""
    # TODO(synk): at real RAFT resolutions this data-dependent bilinear gather
    # should become a Pallas kernel (scalar-prefetched cell indices / manual
    # DMA gather); at toy size it is only launch/gather overhead in XLA.
    r = radius
    d = jnp.arange(-r, r + 1, dtype=jnp.float32)
    dy, dx = jnp.meshgrid(d, d, indexing="ij")
    delta = jnp.stack([dx, dy], axis=-1).reshape(1, (2 * r + 1) ** 2, 2)
    outs = []
    for lvl, corr_l in enumerate(corr_pyramid):
        centroid = coords[:, None, :] / (2.0 ** lvl)
        outs.append(bilinear_sampler(corr_l, centroid + delta))   # (M, 49)
    return jnp.concatenate(outs, axis=-1)                         # (M, 196)


# ----------------------------- parameters --------------------------------------
def _init_linear(key, fan_in, fan_out):
    kw, kb = jax.random.split(key)
    w = jax.random.normal(kw, (fan_in, fan_out), jnp.float32) / np.sqrt(fan_in)
    b = 0.01 * jax.random.normal(kb, (fan_out,), jnp.float32)
    return w, b


def init_params(key):
    ks = jax.random.split(key, 12)
    p = {}
    # fnet (SmallEncoder stand-in): 8x8 patch (3*64=192) -> 128
    p["Wf"], p["bf"] = _init_linear(ks[0], 192, FNET_DIM)
    # cnet (SmallEncoder stand-in): 192 -> hdim (tanh) / cdim (relu)
    p["Wc_net"], p["bc_net"] = _init_linear(ks[1], 192, HIDDEN_DIM)
    p["Wc_inp"], p["bc_inp"] = _init_linear(ks[2], 192, CONTEXT_DIM)
    # SmallMotionEncoder stand-in (1x1 convs; RAFT-small channel widths)
    p["Wc1"], p["bc1"] = _init_linear(ks[3], COR_PLANES, 96)
    p["Wf1"], p["bf1"] = _init_linear(ks[4], 2, 64)
    p["Wf2"], p["bf2"] = _init_linear(ks[5], 64, 32)
    p["Wmo"], p["bmo"] = _init_linear(ks[6], 128, 80)
    # ConvGRU stand-in: hidden(96) + input(80+2+64=146) = 242 -> 96
    p["Wz"], p["bz"] = _init_linear(ks[7], 242, HIDDEN_DIM)
    p["Wr"], p["br"] = _init_linear(ks[8], 242, HIDDEN_DIM)
    p["Wq"], p["bq"] = _init_linear(ks[9], 242, HIDDEN_DIM)
    # FlowHead: 96 -> 128 -> 2
    p["Wh1"], p["bh1"] = _init_linear(ks[10], HIDDEN_DIM, 128)
    p["Wh2"], p["bh2"] = _init_linear(ks[11], 128, 2)
    return p


def _place(dst_shape, blocks):
    out = jnp.zeros(dst_shape, jnp.float32)
    for r, c, a in blocks:
        out = out.at[r:r + a.shape[0], c:c + a.shape[1]].set(a)
    return out


def prepare_params(p):
    """Pre-pad / fuse all weights ONCE (bf16 for MXU inputs, f32 biases).

    GRU weights use the original row layout [net 0:96|mot 96:176|flow 176:178|
    inp 178:242] split by source; outputs are packed z at cols 0:96, r at
    cols 128:224 (256 lanes) and q at cols 0:96 (128 lanes).
    """
    def bf16(x):
        return x.astype(jnp.bfloat16)

    P = {}
    P["fnet"] = {"w": bf16(p["Wf"]), "b": p["bf"][None, :]}

    # cnet fused: [net 0:96 | pad | inp 128:192 | pad] + hoisted inp->GRU terms.
    wz, wr, wq = p["Wz"], p["Wr"], p["Wq"]
    wc = _place((192, 256), [(0, 0, p["Wc_net"]), (0, 128, p["Wc_inp"])])
    bc = _place((1, 256), [(0, 0, p["bc_net"][None, :]),
                           (0, 128, p["bc_inp"][None, :])])
    wzr_i = _place((128, 256), [(0, 0, wz[178:242]), (0, 128, wr[178:242])])
    bzr = _place((1, 256), [(0, 0, p["bz"][None, :]), (0, 128, p["br"][None, :])])
    wq_i = _place((128, 128), [(0, 0, wq[178:242])])
    bq = _place((1, 128), [(0, 0, p["bq"][None, :])])
    P["cnet"] = {"wc": bf16(wc), "bc": bc,
                 "wzr_i": bf16(wzr_i), "wq_i": bf16(wq_i),
                 "bzr": bzr, "bq": bq}

    # fused update block (motion encoder + GRU + flow head)
    u = {}
    u["wc1"] = bf16(_place((COR_PLANES, 128), [(0, 0, p["Wc1"])]))
    u["bc1"] = _place((1, 128), [(0, 0, p["bc1"][None, :])])
    u["wf1x"] = _place((1, 128), [(0, 0, p["Wf1"][0:1, :])])
    u["wf1y"] = _place((1, 128), [(0, 0, p["Wf1"][1:2, :])])
    u["bf1"] = _place((1, 128), [(0, 0, p["bf1"][None, :])])
    u["wf2"] = bf16(_place((128, 128), [(0, 0, p["Wf2"])]))
    u["bf2"] = _place((1, 128), [(0, 0, p["bf2"][None, :])])
    u["wmoc"] = bf16(_place((128, 128), [(0, 0, p["Wmo"][:96, :])]))
    u["wmof"] = bf16(_place((128, 128), [(0, 0, p["Wmo"][96:, :])]))
    u["bmo"] = _place((1, 128), [(0, 0, p["bmo"][None, :])])
    u["wzr_h"] = bf16(_place((128, 256), [(0, 0, wz[0:96]), (0, 128, wr[0:96])]))
    u["wzr_m"] = bf16(_place((128, 256),
                             [(0, 0, wz[96:176]), (0, 128, wr[96:176])]))
    u["wzr_fx"] = _place((1, 256), [(0, 0, wz[176:177]), (0, 128, wr[176:177])])
    u["wzr_fy"] = _place((1, 256), [(0, 0, wz[177:178]), (0, 128, wr[177:178])])
    u["wq_h"] = bf16(_place((128, 128), [(0, 0, wq[0:96])]))
    u["wq_m"] = bf16(_place((128, 128), [(0, 0, wq[96:176])]))
    u["wq_fx"] = _place((1, 128), [(0, 0, wq[176:177])])
    u["wq_fy"] = _place((1, 128), [(0, 0, wq[177:178])])
    u["wh1"] = bf16(_place((128, 128), [(0, 0, p["Wh1"])]))
    u["bh1"] = p["bh1"][None, :]
    u["wh2"] = bf16(p["Wh2"])
    u["bh2"] = p["bh2"][None, :]
    P["update"] = u
    return P


# ----------------------------- model pieces ------------------------------------
def encode_fnet(params, image):
    # TODO(synk): SmallEncoder (residual conv stack + instance norm) is not in
    # the provided source; replaced by a stride-8 patch projection in Pallas.
    N, _, H, W = image.shape
    f = pallas_linear(patchify8(image), params["fnet"], activation="relu")
    return f.reshape(N, H // 8, W // 8, FNET_DIM)   # channel-last for corr


def forward_2_frames(params, image1, fmap1, fmap2, iters, upsample):
    N, _, H, W = image1.shape
    H8, W8 = H // 8, W // 8

    corr_pyramid = build_corr_pyramid(fmap1, fmap2, CORR_LEVELS)

    # cnet + hoisted iteration-invariant GRU input contributions (from `inp`).
    net, zrf, qf = pallas_cnet(params, patchify8(image1))
    # TODO(synk): self.update_block.reset_mask(net, inp) has no provided def.

    coords0 = coords_grid_flat(N, H8, W8)   # (M, 2)
    coords1 = coords_grid_flat(N, H8, W8)

    flow_predictions = []
    aux_vars = {}   # admm_solver=False path of the reference module
    for _ in range(iters):
        coords1 = jax.lax.stop_gradient(coords1)                  # .detach()
        corr = corr_lookup(corr_pyramid, coords1, CORR_RADIUS)    # (M, 196)
        flow = coords1 - coords0                                  # (M, 2)

        net, delta_flow = pallas_update(params, corr, flow, net, zrf, qf)

        coords1 = coords1 + delta_flow
        flow_nchw = mc_to_nchw(coords1 - coords0, N, H8, W8)
        flow_predictions.append(upflow8(flow_nchw) if upsample else flow_nchw)
    return flow_predictions, aux_vars


@functools.partial(jax.jit, static_argnames=("iters", "with_bk", "upsample"))
def raft_forward(params, imgs, iters=12, with_bk=False, upsample=True):
    image1 = 2.0 * imgs[:, :3] - 1.0
    image2 = 2.0 * imgs[:, 3:] - 1.0
    fmap1 = encode_fnet(params, image1)
    fmap2 = encode_fnet(params, image2)
    # TODO(synk): ADMMSolverBlock / MaskGenerator branch omitted (admm_solver=False).
    res = {"flows_fw": forward_2_frames(params, image1, fmap1, fmap2,
                                        iters, upsample)}
    if with_bk:
        res["flows_bw"] = forward_2_frames(params, image2, fmap2, fmap1,
                                           iters, upsample)
    return res


# ----------------------------- main ---------------------------------------------
if __name__ == "__main__":
    key = jax.random.PRNGKey(0)
    kp, kx = jax.random.split(key)
    params = prepare_params(init_params(kp))

    N, H, W = 2, 64, 64
    imgs = jax.random.uniform(kx, (N, 6, H, W), jnp.float32)   # 2 stacked frames

    res = raft_forward(params, imgs, iters=3, with_bk=False, upsample=True)
    flows, aux = res["flows_fw"]
    jax.block_until_ready(flows[-1])

    assert len(flows) == 3
    assert flows[-1].shape == (N, 2, H, W)
    assert bool(jnp.all(jnp.isfinite(flows[-1])))
    print("KERNEL_OK")
</pallas_src>

<mosaic_0001>
module attributes {stable_mosaic.version = 11 : i64} {
  func.func private @main(%arg0: i32) attributes {dimension_semantics = [#tpu.dimension_semantics<core_parallel>], iteration_bounds = array<i64: 2>, tpu.core_type = #tpu.core_type<sc_scalar_subcore>, window_params = []} {
    return
  }
}

module attributes {stable_mosaic.version = 11 : i64} {
  func.func private @main(%arg0: i32) attributes {dimension_semantics = [#tpu.dimension_semantics<core_parallel>], iteration_bounds = array<i64: 2>, tpu.core_type = #tpu.core_type<sc_scalar_subcore>, window_params = []} {
    return
  }
}

module attributes {stable_mosaic.version = 11 : i64} {
  func.func @_linear_act_kernel(%arg0: i32, %arg1: memref<128x192xbf16, #tpu.memory_space<vmem>>, %arg2: memref<192x128xbf16, #tpu.memory_space<vmem>>, %arg3: memref<1x128xf32, #tpu.memory_space<vmem>>, %arg4: memref<128x128xf32, #tpu.memory_space<vmem>>) attributes {dimension_semantics = [#tpu.dimension_semantics<parallel>], iteration_bounds = array<i64: 1>, scalar_prefetch = 0 : i64, scratch_operands = 0 : i64, tpu.core_type = #tpu.core_type<tc>, window_params = [{transform_indices = @transform_0, window_bounds = array<i64: 128, 192>}, {pipeline_mode = #tpu.pipeline_mode<synchronous>, transform_indices = @transform_1, window_bounds = array<i64: 192, 128>}, {pipeline_mode = #tpu.pipeline_mode<synchronous>, transform_indices = @transform_2, window_bounds = array<i64: 1, 128>}, {transform_indices = @transform_3, window_bounds = array<i64: 128, 128>}]} {
    %c0 = arith.constant 0 : index
    %c0_0 = arith.constant 0 : index
    %0 = vector.load %arg1[%c0, %c0_0] : memref<128x192xbf16, #tpu.memory_space<vmem>>, vector<128x192xbf16>
    %c0_1 = arith.constant 0 : index
    %c0_2 = arith.constant 0 : index
    %1 = vector.load %arg2[%c0_1, %c0_2] : memref<192x128xbf16, #tpu.memory_space<vmem>>, vector<192x128xbf16>
    %cst = arith.constant dense<0.000000e+00> : vector<128x128xf32>
    %2 = tpu.matmul %0, %1, %cst {dimension_numbers = #tpu.dot_dimension_numbers<[1], [0], [0], [1], [0, 0, 1, 1], [], []>} : vector<128x192xbf16>, vector<192x128xbf16>, vector<128x128xf32> -> vector<128x128xf32>
    %c0_3 = arith.constant 0 : index
    %c0_4 = arith.constant 0 : index
    %3 = vector.load %arg3[%c0_3, %c0_4] : memref<1x128xf32, #tpu.memory_space<vmem>>, vector<1x128xf32>
    %4 = vector.broadcast %3 : vector<1x128xf32> to vector<128x128xf32>
    %5 = arith.addf %2, %4 : vector<128x128xf32>
    %cst_5 = arith.constant 0.000000e+00 : f32
    %6 = vector.broadcast %cst_5 : f32 to vector<128x128xf32>
    %7 = arith.maximumf %5, %6 : vector<128x128xf32>
    %c0_6 = arith.constant 0 : index
    %c0_7 = arith.constant 0 : index
    %8 = vector.load %arg4[%c0_6, %c0_7] : memref<128x128xf32, #tpu.memory_space<vmem>>, vector<128x128xf32>
    tpu.vector_store %arg4[%c0_6, %c0_7], %7 {strides = array<i32>} : memref<128x128xf32, #tpu.memory_space<vmem>>, vector<128x128xf32>,
    return
  }
  func.func @transform_0(%arg0: i32) -> (i32, i32) {
    %c0_i32 = arith.constant 0 : i32
    %c0_i32_0 = arith.constant 0 : i32
    return %arg0, %c0_i32 : i32, i32
  }
  func.func @transform_1(%arg0: i32) -> (i32, i32) {
    %c0_i32 = arith.constant 0 : i32
    %c0_i32_0 = arith.constant 0 : i32
    %c0_i32_1 = arith.constant 0 : i32
    return %c0_i32, %c0_i32_0 : i32, i32
  }
  func.func @transform_2(%arg0: i32) -> (i32, i32) {
    %c0_i32 = arith.constant 0 : i32
    %c0_i32_0 = arith.constant 0 : i32
    %c0_i32_1 = arith.constant 0 : i32
    return %c0_i32, %c0_i32_0 : i32, i32
  }
  func.func @transform_3(%arg0: i32) -> (i32, i32) {
    %c0_i32 = arith.constant 0 : i32
    %c0_i32_0 = arith.constant 0 : i32
    return %arg0, %c0_i32 : i32, i32
  }
}

module attributes {stable_mosaic.version = 11 : i64} {
  func.func @_corr_kernel(%arg0: i32, %arg1: memref<1x64x128xbf16, #tpu.memory_space<vmem>>, %arg2: memref<1x128x64xbf16, #tpu.memory_space<vmem>>, %arg3: memref<1x64x64xf32, #tpu.memory_space<vmem>>) attributes {dimension_semantics = [#tpu.dimension_semantics<parallel>], iteration_bounds = array<i64: 2>, scalar_prefetch = 0 : i64, scratch_operands = 0 : i64, tpu.core_type = #tpu.core_type<tc>, window_params = [{transform_indices = @transform_0, window_bounds = array<i64: 1, 64, 128>}, {transform_indices = @transform_1, window_bounds = array<i64: 1, 128, 64>}, {transform_indices = @transform_2, window_bounds = array<i64: 1, 64, 64>}]} {
    %c0 = arith.constant 0 : index
    %c0_0 = arith.constant 0 : index
    %c0_1 = arith.constant 0 : index
    %0 = vector.load %arg1[%c0, %c0_0, %c0_1] : memref<1x64x128xbf16, #tpu.memory_space<vmem>>, vector<1x64x128xbf16>
    %1 = vector.shape_cast %0 : vector<1x64x128xbf16> to vector<64x128xbf16>
    %c0_2 = arith.constant 0 : index
    %c0_3 = arith.constant 0 : index
    %c0_4 = arith.constant 0 : index
    %2 = vector.load %arg2[%c0_2, %c0_3, %c0_4] : memref<1x128x64xbf16, #tpu.memory_space<vmem>>, vector<1x128x64xbf16>
    %3 = vector.shape_cast %2 : vector<1x128x64xbf16> to vector<128x64xbf16>
    %cst = arith.constant dense<0.000000e+00> : vector<64x64xf32>
    %4 = tpu.matmul %1, %3, %cst {dimension_numbers = #tpu.dot_dimension_numbers<[1], [0], [0], [1], [0, 0, 1, 1], [], []>} : vector<64x128xbf16>, vector<128x64xbf16>, vector<64x64xf32> -> vector<64x64xf32>
    %cst_5 = arith.constant 0.0883883461 : f32
    %5 = vector.broadcast %cst_5 : f32 to vector<64x64xf32>
    %6 = arith.mulf %4, %5 : vector<64x64xf32>
    %c0_6 = arith.constant 0 : index
    %c0_7 = arith.constant 0 : index
    %c0_8 = arith.constant 0 : index
    %7 = vector.load %arg3[%c0_6, %c0_7, %c0_8] : memref<1x64x64xf32, #tpu.memory_space<vmem>>, vector<1x64x64xf32>
    %8 = vector.shape_cast %7 : vector<1x64x64xf32> to vector<64x64xf32>
    %9 = vector.shape_cast %6 : vector<64x64xf32> to vector<1x64x64xf32>
    tpu.vector_store %arg3[%c0_6, %c0_7, %c0_8], %9 {strides = array<i32>} : memref<1x64x64xf32, #tpu.memory_space<vmem>>, vector<1x64x64xf32>,
    return
  }
  func.func @transform_0(%arg0: i32) -> (i32, i32, i32) {
    %c0_i32 = arith.constant 0 : i32
    %c0_i32_0 = arith.constant 0 : i32
    %c0_i32_1 = arith.constant 0 : i32
    return %arg0, %c0_i32, %c0_i32_0 : i32, i32, i32
  }
  func.func @transform_1(%arg0: i32) -> (i32, i32, i32) {
    %c0_i32 = arith.constant 0 : i32
    %c0_i32_0 = arith.constant 0 : i32
    %c0_i32_1 = arith.constant 0 : i32
    return %arg0, %c0_i32, %c0_i32_0 : i32, i32, i32
  }
  func.func @transform_2(%arg0: i32) -> (i32, i32, i32) {
    %c0_i32 = arith.constant 0 : i32
    %c0_i32_0 = arith.constant 0 : i32
    %c0_i32_1 = arith.constant 0 : i32
    return %arg0, %c0_i32, %c0_i32_0 : i32, i32, i32
  }
}

module attributes {stable_mosaic.version = 11 : i64} {
  func.func @_cnet_kernel(%arg0: i32, %arg1: memref<128x192xbf16, #tpu.memory_space<vmem>>, %arg2: memref<192x256xbf16, #tpu.memory_space<vmem>>, %arg3: memref<1x256xf32, #tpu.memory_space<vmem>>, %arg4: memref<128x256xbf16, #tpu.memory_space<vmem>>, %arg5: memref<128x128xbf16, #tpu.memory_space<vmem>>, %arg6: memref<1x256xf32, #tpu.memory_space<vmem>>, %arg7: memref<1x128xf32, #tpu.memory_space<vmem>>, %arg8: memref<128x128xf32, #tpu.memory_space<vmem>>, %arg9: memref<128x256xf32, #tpu.memory_space<vmem>>, %arg10: memref<128x128xf32, #tpu.memory_space<vmem>>) attributes {dimension_semantics = [#tpu.dimension_semantics<parallel>], iteration_bounds = array<i64: 1>, scalar_prefetch = 0 : i64, scratch_operands = 0 : i64, tpu.core_type = #tpu.core_type<tc>, window_params = [{transform_indices = @transform_0, window_bounds = array<i64: 128, 192>}, {pipeline_mode = #tpu.pipeline_mode<synchronous>, transform_indices = @transform_1, window_bounds = array<i64: 192, 256>}, {pipeline_mode = #tpu.pipeline_mode<synchronous>, transform_indices = @transform_2, window_bounds = array<i64: 1, 256>}, {pipeline_mode = #tpu.pipeline_mode<synchronous>, transform_indices = @transform_3, window_bounds = array<i64: 128, 256>}, {pipeline_mode = #tpu.pipeline_mode<synchronous>, transform_indices = @transform_4, window_bounds = array<i64: 128, 128>}, {pipeline_mode = #tpu.pipeline_mode<synchronous>, transform_indices = @transform_5, window_bounds = array<i64: 1, 256>}, {pipeline_mode = #tpu.pipeline_mode<synchronous>, transform_indices = @transform_6, window_bounds = array<i64: 1, 128>}, {transform_indices = @transform_7, window_bounds = array<i64: 128, 128>}, {transform_indices = @transform_8, window_bounds = array<i64: 128, 256>}, {transform_indices = @transform_9, window_bounds = array<i64: 128, 128>}]} {
    %c0 = arith.constant 0 : index
    %c0_0 = arith.constant 0 : index
    %0 = vector.load %arg1[%c0, %c0_0] : memref<128x192xbf16, #tpu.memory_space<vmem>>, vector<128x192xbf16>
    %c0_1 = arith.constant 0 : index
    %c0_2 = arith.constant 0 : index
    %1 = vector.load %arg2[%c0_1, %c0_2] : memref<192x256xbf16, #tpu.memory_space<vmem>>, vector<192x256xbf16>
    %cst = arith.constant dense<0.000000e+00> : vector<128x256xf32>
    %2 = tpu.matmul %0, %1, %cst {dimension_numbers = #tpu.dot_dimension_numbers<[1], [0], [0], [1], [0, 0, 1, 1], [], []>} : vector<128x192xbf16>, vector<192x256xbf16>, vector<128x256xf32> -> vector<128x256xf32>
    %c0_3 = arith.constant 0 : index
    %c0_4 = arith.constant 0 : index
    %3 = vector.load %arg3[%c0_3, %c0_4] : memref<1x256xf32, #tpu.memory_space<vmem>>, vector<1x256xf32>
    %4 = vector.broadcast %3 : vector<1x256xf32> to vector<128x256xf32>
    %5 = arith.addf %2, %4 : vector<128x256xf32>
    %6 = vector.extract_strided_slice %5 {offsets = [0, 0], sizes = [128, 128], strides = [1, 1]} : vector<128x256xf32> to vector<128x128xf32>
    %7 = math.tanh %6 : vector<128x128xf32>
    %8 = vector.extract_strided_slice %5 {offsets = [0, 128], sizes = [128, 128], strides = [1, 1]} : vector<128x256xf32> to vector<128x128xf32>
    %cst_5 = arith.constant 0.000000e+00 : f32
    %9 = vector.broadcast %cst_5 : f32 to vector<128x128xf32>
    %10 = arith.maximumf %8, %9 : vector<128x128xf32>
    %c0_6 = arith.constant 0 : index
    %c0_7 = arith.constant 0 : index
    %11 = vector.load %arg8[%c0_6, %c0_7] : memref<128x128xf32, #tpu.memory_space<vmem>>, vector<128x128xf32>
    tpu.vector_store %arg8[%c0_6, %c0_7], %7 {strides = array<i32>} : memref<128x128xf32, #tpu.memory_space<vmem>>, vector<128x128xf32>,
    %12 = arith.truncf %10 : vector<128x128xf32> to vector<128x128xbf16>
    %c0_8 = arith.constant 0 : index
    %c0_9 = arith.constant 0 : index
    %13 = vector.load %arg4[%c0_8, %c0_9] : memref<128x256xbf16, #tpu.memory_space<vmem>>, vector<128x256xbf16>
    %cst_10 = arith.constant dense<0.000000e+00> : vector<128x256xf32>
    %14 = tpu.matmul %12, %13, %cst_10 {dimension_numbers = #tpu.dot_dimension_numbers<[1], [0], [0], [1], [0, 0, 1, 1], [], []>} : vector<128x128xbf16>, vector<128x256xbf16>, vector<128x256xf32> -> vector<128x256xf32>
    %c0_11 = arith.constant 0 : index
    %c0_12 = arith.constant 0 : index
    %15 = vector.load %arg6[%c0_11, %c0_12] : memref<1x256xf32, #tpu.memory_space<vmem>>, vector<1x256xf32>
    %16 = vector.broadcast %15 : vector<1x256xf32> to vector<128x256xf32>
    %17 = arith.addf %14, %16 : vector<128x256xf32>
    %c0_13 = arith.constant 0 : index
    %c0_14 = arith.constant 0 : index
    %18 = vector.load %arg9[%c0_13, %c0_14] : memref<128x256xf32, #tpu.memory_space<vmem>>, vector<128x256xf32>
    tpu.vector_store %arg9[%c0_13, %c0_14], %17 {strides = array<i32>} : memref<128x256xf32, #tpu.memory_space<vmem>>, vector<128x256xf32>,
    %c0_15 = arith.constant 0 : index
    %c0_16 = arith.constant 0 : index
    %19 = vector.load %arg5[%c0_15, %c0_16] : memref<128x128xbf16, #tpu.memory_space<vmem>>, vector<128x128xbf16>
    %cst_17 = arith.constant dense<0.000000e+00> : vector<128x128xf32>
    %20 = tpu.matmul %12, %19, %cst_17 {dimension_numbers = #tpu.dot_dimension_numbers<[1], [0], [0], [1], [0, 0, 1, 1], [], []>} : vector<128x128xbf16>, vector<128x128xbf16>, vector<128x128xf32> -> vector<128x128xf32>
    %c0_18 = arith.constant 0 : index
    %c0_19 = arith.constant 0 : index
    %21 = vector.load %arg7[%c0_18, %c0_19] : memref<1x128xf32, #tpu.memory_space<vmem>>, vector<1x128xf32>
    %22 = vector.broadcast %21 : vector<1x128xf32> to vector<128x128xf32>
    %23 = arith.addf %20, %22 : vector<128x128xf32>
    %c0_20 = arith.constant 0 : index
    %c0_21 = arith.constant 0 : index
    %24 = vector.load %arg10[%c0_20, %c0_21] : memref<128x128xf32, #tpu.memory_space<vmem>>, vector<128x128xf32>
    tpu.vector_store %arg10[%c0_20, %c0_21], %23 {strides = array<i32>} : memref<128x128xf32, #tpu.memory_space<vmem>>, vector<128x128xf32>,
    return
  }
  func.func @transform_0(%arg0: i32) -> (i32, i32) {
    %c0_i32 = arith.constant 0 : i32
    %c0_i32_0 = arith.constant 0 : i32
    return %arg0, %c0_i32 : i32, i32
  }
  func.func @transform_1(%arg0: i32) -> (i32, i32) {
    %c0_i32 = arith.constant 0 : i32
    %c0_i32_0 = arith.constant 0 : i32
    %c0_i32_1 = arith.constant 0 : i32
    return %c0_i32, %c0_i32_0 : i32, i32
  }
  func.func @transform_2(%arg0: i32) -> (i32, i32) {
    %c0_i32 = arith.constant 0 : i32
    %c0_i32_0 = arith.constant 0 : i32
    %c0_i32_1 = arith.constant 0 : i32
    return %c0_i32, %c0_i32_0 : i32, i32
  }
  func.func @transform_3(%arg0: i32) -> (i32, i32) {
    %c0_i32 = arith.constant 0 : i32
    %c0_i32_0 = arith.constant 0 : i32
    %c0_i32_1 = arith.constant 0 : i32
    return %c0_i32, %c0_i32_0 : i32, i32
  }
  func.func @transform_4(%arg0: i32) -> (i32, i32) {
    %c0_i32 = arith.constant 0 : i32
    %c0_i32_0 = arith.constant 0 : i32
    %c0_i32_1 = arith.constant 0 : i32
    return %c0_i32, %c0_i32_0 : i32, i32
  }
  func.func @transform_5(%arg0: i32) -> (i32, i32) {
    %c0_i32 = arith.constant 0 : i32
    %c0_i32_0 = arith.constant 0 : i32
    %c0_i32_1 = arith.constant 0 : i32
    return %c0_i32, %c0_i32_0 : i32, i32
  }
  func.func @transform_6(%arg0: i32) -> (i32, i32) {
    %c0_i32 = arith.constant 0 : i32
    %c0_i32_0 = arith.constant 0 : i32
    %c0_i32_1 = arith.constant 0 : i32
    return %c0_i32, %c0_i32_0 : i32, i32
  }
  func.func @transform_7(%arg0: i32) -> (i32, i32) {
    %c0_i32 = arith.constant 0 : i32
    %c0_i32_0 = arith.constant 0 : i32
    return %arg0, %c0_i32 : i32, i32
  }
  func.func @transform_8(%arg0: i32) -> (i32, i32) {
    %c0_i32 = arith.constant 0 : i32
    %c0_i32_0 = arith.constant 0 : i32
    return %arg0, %c0_i32 : i32, i32
  }
  func.func @transform_9(%arg0: i32) -> (i32, i32) {
    %c0_i32 = arith.constant 0 : i32
    %c0_i32_0 = arith.constant 0 : i32
    return %arg0, %c0_i32 : i32, i32
  }
}

module attributes {stable_mosaic.version = 11 : i64} {
  func.func @_update_kernel(%arg0: i32, %arg1: memref<128x196xbf16, #tpu.memory_space<vmem>>, %arg2: memref<128x1xf32, #tpu.memory_space<vmem>>, %arg3: memref<128x1xf32, #tpu.memory_space<vmem>>, %arg4: memref<128x128xf32, #tpu.memory_space<vmem>>, %arg5: memref<128x256xf32, #tpu.memory_space<vmem>>, %arg6: memref<128x128xf32, #tpu.memory_space<vmem>>, %arg7: memref<196x128xbf16, #tpu.memory_space<vmem>>, %arg8: memref<1x128xf32, #tpu.memory_space<vmem>>, %arg9: memref<1x128xf32, #tpu.memory_space<vmem>>, %arg10: memref<1x128xf32, #tpu.memory_space<vmem>>, %arg11: memref<1x128xf32, #tpu.memory_space<vmem>>, %arg12: memref<128x128xbf16, #tpu.memory_space<vmem>>, %arg13: memref<1x128xf32, #tpu.memory_space<vmem>>, %arg14: memref<128x128xbf16, #tpu.memory_space<vmem>>, %arg15: memref<128x128xbf16, #tpu.memory_space<vmem>>, %arg16: memref<1x128xf32, #tpu.memory_space<vmem>>, %arg17: memref<128x256xbf16, #tpu.memory_space<vmem>>, %arg18: memref<128x256xbf16, #tpu.memory_space<vmem>>, %arg19: memref<1x256xf32, #tpu.memory_space<vmem>>, %arg20: memref<1x256xf32, #tpu.memory_space<vmem>>, %arg21: memref<128x128xbf16, #tpu.memory_space<vmem>>, %arg22: memref<128x128xbf16, #tpu.memory_space<vmem>>, %arg23: memref<1x128xf32, #tpu.memory_space<vmem>>, %arg24: memref<1x128xf32, #tpu.memory_space<vmem>>, %arg25: memref<128x128xbf16, #tpu.memory_space<vmem>>, %arg26: memref<1x128xf32, #tpu.memory_space<vmem>>, %arg27: memref<128x2xbf16, #tpu.memory_space<vmem>>, %arg28: memref<1x2xf32, #tpu.memory_space<vmem>>, %arg29: memref<128x128xf32, #tpu.memory_space<vmem>>, %arg30: memref<128x2xf32, #tpu.memory_space<vmem>>) attributes {dimension_semantics = [#tpu.dimension_semantics<parallel>], iteration_bounds = array<i64: 1>, scalar_prefetch = 0 : i64, scratch_operands = 0 : i64, tpu.core_type = #tpu.core_type<tc>, window_params = [{transform_indices = @transform_0, window_bounds = array<i64: 128, 196>}, {transform_indices = @transform_1, window_bounds = array<i64: 128, 1>}, {transform_indices = @transform_2, window_bounds = array<i64: 128, 1>}, {transform_indices = @transform_3, window_bounds = array<i64: 128, 128>}, {transform_indices = @transform_4, window_bounds = array<i64: 128, 256>}, {transform_indices = @transform_5, window_bounds = array<i64: 128, 128>}, {pipeline_mode = #tpu.pipeline_mode<synchronous>, transform_indices = @transform_6, window_bounds = array<i64: 196, 128>}, {pipeline_mode = #tpu.pipeline_mode<synchronous>, transform_indices = @transform_7, window_bounds = array<i64: 1, 128>}, {pipeline_mode = #tpu.pipeline_mode<synchronous>, transform_indices = @transform_8, window_bounds = array<i64: 1, 128>}, {pipeline_mode = #tpu.pipeline_mode<synchronous>, transform_indices = @transform_9, window_bounds = array<i64: 1, 128>}, {pipeline_mode = #tpu.pipeline_mode<synchronous>, transform_indices = @transform_10, window_bounds = array<i64: 1, 128>}, {pipeline_mode = #tpu.pipeline_mode<synchronous>, transform_indices = @transform_11, window_bounds = array<i64: 128, 128>}, {pipeline_mode = #tpu.pipeline_mode<synchronous>, transform_indices = @transform_12, window_bounds = array<i64: 1, 128>}, {pipeline_mode = #tpu.pipeline_mode<synchronous>, transform_indices = @transform_13, window_bounds = array<i64: 128, 128>}, {pipeline_mode = #tpu.pipeline_mode<synchronous>, transform_indices = @transform_14, window_bounds = array<i64: 128, 128>}, {pipeline_mode = #tpu.pipeline_mode<synchronous>, transform_indices = @transform_15, window_bounds = array<i64: 1, 128>}, {pipeline_mode = #tpu.pipeline_mode<synchronous>, transform_indices = @transform_16, window_bounds = array<i64: 128, 256>}, {pipeline_mode = #tpu.pipeline_mode<synchronous>, transform_indices = @transform_17, window_bounds = array<i64: 128, 256>}, {pipeline_mode = #tpu.pipeline_mode<synchronous>, transform_indices = @transform_18, window_bounds = array<i64: 1, 256>}, {pipeline_mode = #tpu.pipeline_mode<synchronous>, transform_indices = @transform_19, window_bounds = array<i64: 1, 256>}, {pipeline_mode = #tpu.pipeline_mode<synchronous>, transform_indices = @transform_20, window_bounds = array<i64: 128, 128>}, {pipeline_mode = #tpu.pipeline_mode<synchronous>, transform_indices = @transform_21, window_bounds = array<i64: 128, 128>}, {pipeline_mode = #tpu.pipeline_mode<synchronous>, transform_indices = @transform_22, window_bounds = array<i64: 1, 128>}, {pipeline_mode = #tpu.pipeline_mode<synchronous>, transform_indices = @transform_23, window_bounds = array<i64: 1, 128>}, {pipeline_mode = #tpu.pipeline_mode<synchronous>, transform_indices = @transform_24, window_bounds = array<i64: 128, 128>}, {pipeline_mode = #tpu.pipeline_mode<synchronous>, transform_indices = @transform_25, window_bounds = array<i64: 1, 128>}, {pipeline_mode = #tpu.pipeline_mode<synchronous>, transform_indices = @transform_26, window_bounds = array<i64: 128, 2>}, {pipeline_mode = #tpu.pipeline_mode<synchronous>, transform_indices = @transform_27, window_bounds = array<i64: 1, 2>}, {transform_indices = @transform_28, window_bounds = array<i64: 128, 128>}, {transform_indices = @transform_29, window_bounds = array<i64: 128, 2>}]} {
    %c0 = arith.constant 0 : index
    %c0_0 = arith.constant 0 : index
    %0 = vector.load %arg2[%c0, %c0_0] : memref<128x1xf32, #tpu.memory_space<vmem>>, vector<128x1xf32>
    %c0_1 = arith.constant 0 : index
    %c0_2 = arith.constant 0 : index
    %1 = vector.load %arg3[%c0_1, %c0_2] : memref<128x1xf32, #tpu.memory_space<vmem>>, vector<128x1xf32>
    %c0_3 = arith.constant 0 : index
    %c0_4 = arith.constant 0 : index
    %2 = vector.load %arg4[%c0_3, %c0_4] : memref<128x128xf32, #tpu.memory_space<vmem>>, vector<128x128xf32>
    %c0_5 = arith.constant 0 : index
    %c0_6 = arith.constant 0 : index
    %3 = vector.load %arg1[%c0_5, %c0_6] : memref<128x196xbf16, #tpu.memory_space<vmem>>, vector<128x196xbf16>
    %c0_7 = arith.constant 0 : index
    %c0_8 = arith.constant 0 : index
    %4 = vector.load %arg7[%c0_7, %c0_8] : memref<196x128xbf16, #tpu.memory_space<vmem>>, vector<196x128xbf16>
    %cst = arith.constant dense<0.000000e+00> : vector<128x128xf32>
    %5 = tpu.matmul %3, %4, %cst {dimension_numbers = #tpu.dot_dimension_numbers<[1], [0], [0], [1], [0, 0, 1, 1], [], []>} : vector<128x196xbf16>, vector<196x128xbf16>, vector<128x128xf32> -> vector<128x128xf32>
    %c0_9 = arith.constant 0 : index
    %c0_10 = arith.constant 0 : index
    %6 = vector.load %arg8[%c0_9, %c0_10] : memref<1x128xf32, #tpu.memory_space<vmem>>, vector<1x128xf32>
    %7 = vector.broadcast %6 : vector<1x128xf32> to vector<128x128xf32>
    %8 = arith.addf %5, %7 : vector<128x128xf32>
    %cst_11 = arith.constant 0.000000e+00 : f32
    %9 = vector.broadcast %cst_11 : f32 to vector<128x128xf32>
    %10 = arith.maximumf %8, %9 : vector<128x128xf32>
    %c0_12 = arith.constant 0 : index
    %c0_13 = arith.constant 0 : index
    %11 = vector.load %arg9[%c0_12, %c0_13] : memref<1x128xf32, #tpu.memory_space<vmem>>, vector<1x128xf32>
    %12 = vector.broadcast %0 : vector<128x1xf32> to vector<128x128xf32>
    %13 = vector.broadcast %11 : vector<1x128xf32> to vector<128x128xf32>
    %14 = arith.mulf %12, %13 : vector<128x128xf32>
    %c0_14 = arith.constant 0 : index
    %c0_15 = arith.constant 0 : index
    %15 = vector.load %arg10[%c0_14, %c0_15] : memref<1x128xf32, #tpu.memory_space<vmem>>, vector<1x128xf32>
    %16 = vector.broadcast %1 : vector<128x1xf32> to vector<128x128xf32>
    %17 = vector.broadcast %15 : vector<1x128xf32> to vector<128x128xf32>
    %18 = arith.mulf %16, %17 : vector<128x128xf32>
    %19 = arith.addf %14, %18 : vector<128x128xf32>
    %c0_16 = arith.constant 0 : index
    %c0_17 = arith.constant 0 : index
    %20 = vector.load %arg11[%c0_16, %c0_17] : memref<1x128xf32, #tpu.memory_space<vmem>>, vector<1x128xf32>
    %21 = vector.broadcast %20 : vector<1x128xf32> to vector<128x128xf32>
    %22 = arith.addf %19, %21 : vector<128x128xf32>
    %cst_18 = arith.constant 0.000000e+00 : f32
    %23 = vector.broadcast %cst_18 : f32 to vector<128x128xf32>
    %24 = arith.maximumf %22, %23 : vector<128x128xf32>
    %25 = arith.truncf %24 : vector<128x128xf32> to vector<128x128xbf16>
    %c0_19 = arith.constant 0 : index
    %c0_20 = arith.constant 0 : index
    %26 = vector.load %arg12[%c0_19, %c0_20] : memref<128x128xbf16, #tpu.memory_space<vmem>>, vector<128x128xbf16>
    %cst_21 = arith.constant dense<0.000000e+00> : vector<128x128xf32>
    %27 = tpu.matmul %25, %26, %cst_21 {dimension_numbers = #tpu.dot_dimension_numbers<[1], [0], [0], [1], [0, 0, 1, 1], [], []>} : vector<128x128xbf16>, vector<128x128xbf16>, vector<128x128xf32> -> vector<128x128xf32>
    %c0_22 = arith.constant 0 : index
    %c0_23 = arith.constant 0 : index
    %28 = vector.load %arg13[%c0_22, %c0_23] : memref<1x128xf32, #tpu.memory_space<vmem>>, vector<1x128xf32>
    %29 = vector.broadcast %28 : vector<1x128xf32> to vector<128x128xf32>
    %30 = arith.addf %27, %29 : vector<128x128xf32>
    %cst_24 = arith.constant 0.000000e+00 : f32
    %31 = vector.broadcast %cst_24 : f32 to vector<128x128xf32>
    %32 = arith.maximumf %30, %31 : vector<128x128xf32>
    %33 = arith.truncf %10 : vector<128x128xf32> to vector<128x128xbf16>
    %c0_25 = arith.constant 0 : index
    %c0_26 = arith.constant 0 : index
    %34 = vector.load %arg14[%c0_25, %c0_26] : memref<128x128xbf16, #tpu.memory_space<vmem>>, vector<128x128xbf16>
    %cst_27 = arith.constant dense<0.000000e+00> : vector<128x128xf32>
    %35 = tpu.matmul %33, %34, %cst_27 {dimension_numbers = #tpu.dot_dimension_numbers<[1], [0], [0], [1], [0, 0, 1, 1], [], []>} : vector<128x128xbf16>, vector<128x128xbf16>, vector<128x128xf32> -> vector<128x128xf32>
    %36 = arith.truncf %32 : vector<128x128xf32> to vector<128x128xbf16>
    %c0_28 = arith.constant 0 : index
    %c0_29 = arith.constant 0 : index
    %37 = vector.load %arg15[%c0_28, %c0_29] : memref<128x128xbf16, #tpu.memory_space<vmem>>, vector<128x128xbf16>
    %cst_30 = arith.constant dense<0.000000e+00> : vector<128x128xf32>
    %38 = tpu.matmul %36, %37, %cst_30 {dimension_numbers = #tpu.dot_dimension_numbers<[1], [0], [0], [1], [0, 0, 1, 1], [], []>} : vector<128x128xbf16>, vector<128x128xbf16>, vector<128x128xf32> -> vector<128x128xf32>
    %39 = arith.addf %35, %38 : vector<128x128xf32>
    %c0_31 = arith.constant 0 : index
    %c0_32 = arith.constant 0 : index
    %40 = vector.load %arg16[%c0_31, %c0_32] : memref<1x128xf32, #tpu.memory_space<vmem>>, vector<1x128xf32>
    %41 = vector.broadcast %40 : vector<1x128xf32> to vector<128x128xf32>
    %42 = arith.addf %39, %41 : vector<128x128xf32>
    %cst_33 = arith.constant 0.000000e+00 : f32
    %43 = vector.broadcast %cst_33 : f32 to vector<128x128xf32>
    %44 = arith.maximumf %42, %43 : vector<128x128xf32>
    %45 = arith.truncf %44 : vector<128x128xf32> to vector<128x128xbf16>
    %46 = arith.truncf %2 : vector<128x128xf32> to vector<128x128xbf16>
    %c0_34 = arith.constant 0 : index
    %c0_35 = arith.constant 0 : index
    %47 = vector.load %arg17[%c0_34, %c0_35] : memref<128x256xbf16, #tpu.memory_space<vmem>>, vector<128x256xbf16>
    %cst_36 = arith.constant dense<0.000000e+00> : vector<128x256xf32>
    %48 = tpu.matmul %46, %47, %cst_36 {dimension_numbers = #tpu.dot_dimension_numbers<[1], [0], [0], [1], [0, 0, 1, 1], [], []>} : vector<128x128xbf16>, vector<128x256xbf16>, vector<128x256xf32> -> vector<128x256xf32>
    %c0_37 = arith.constant 0 : index
    %c0_38 = arith.constant 0 : index
    %49 = vector.load %arg18[%c0_37, %c0_38] : memref<128x256xbf16, #tpu.memory_space<vmem>>, vector<128x256xbf16>
    %cst_39 = arith.constant dense<0.000000e+00> : vector<128x256xf32>
    %50 = tpu.matmul %45, %49, %cst_39 {dimension_numbers = #tpu.dot_dimension_numbers<[1], [0], [0], [1], [0, 0, 1, 1], [], []>} : vector<128x128xbf16>, vector<128x256xbf16>, vector<128x256xf32> -> vector<128x256xf32>
    %51 = arith.addf %48, %50 : vector<128x256xf32>
    %c0_40 = arith.constant 0 : index
    %c0_41 = arith.constant 0 : index
    %52 = vector.load %arg19[%c0_40, %c0_41] : memref<1x256xf32, #tpu.memory_space<vmem>>, vector<1x256xf32>
    %53 = vector.broadcast %0 : vector<128x1xf32> to vector<128x256xf32>
    %54 = vector.broadcast %52 : vector<1x256xf32> to vector<128x256xf32>
    %55 = arith.mulf %53, %54 : vector<128x256xf32>
    %56 = arith.addf %51, %55 : vector<128x256xf32>
    %c0_42 = arith.constant 0 : index
    %c0_43 = arith.constant 0 : index
    %57 = vector.load %arg20[%c0_42, %c0_43] : memref<1x256xf32, #tpu.memory_space<vmem>>, vector<1x256xf32>
    %58 = vector.broadcast %1 : vector<128x1xf32> to vector<128x256xf32>
    %59 = vector.broadcast %57 : vector<1x256xf32> to vector<128x256xf32>
    %60 = arith.mulf %58, %59 : vector<128x256xf32>
    %61 = arith.addf %56, %60 : vector<128x256xf32>
    %c0_44 = arith.constant 0 : index
    %c0_45 = arith.constant 0 : index
    %62 = vector.load %arg5[%c0_44, %c0_45] : memref<128x256xf32, #tpu.memory_space<vmem>>, vector<128x256xf32>
    %63 = arith.addf %61, %62 : vector<128x256xf32>
    %cst_46 = arith.constant 0.000000e+00 : f32
    %64 = vector.broadcast %cst_46 : f32 to vector<128x256xf32>
    %65 = arith.subf %64, %63 : vector<128x256xf32>
    %66 = math.exp %65 : vector<128x256xf32>
    %cst_47 = arith.constant 1.000000e+00 : f32
    %67 = vector.broadcast %cst_47 : f32 to vector<128x256xf32>
    %68 = arith.addf %67, %66 : vector<128x256xf32>
    %cst_48 = arith.constant 1.000000e+00 : f32
    %69 = vector.broadcast %cst_48 : f32 to vector<128x256xf32>
    %70 = arith.divf %69, %68 : vector<128x256xf32>
    %71 = vector.extract_strided_slice %70 {offsets = [0, 0], sizes = [128, 128], strides = [1, 1]} : vector<128x256xf32> to vector<128x128xf32>
    %72 = vector.extract_strided_slice %70 {offsets = [0, 128], sizes = [128, 128], strides = [1, 1]} : vector<128x256xf32> to vector<128x128xf32>
    %73 = arith.mulf %72, %2 : vector<128x128xf32>
    %74 = arith.truncf %73 : vector<128x128xf32> to vector<128x128xbf16>
    %c0_49 = arith.constant 0 : index
    %c0_50 = arith.constant 0 : index
    %75 = vector.load %arg21[%c0_49, %c0_50] : memref<128x128xbf16, #tpu.memory_space<vmem>>, vector<128x128xbf16>
    %cst_51 = arith.constant dense<0.000000e+00> : vector<128x128xf32>
    %76 = tpu.matmul %74, %75, %cst_51 {dimension_numbers = #tpu.dot_dimension_numbers<[1], [0], [0], [1], [0, 0, 1, 1], [], []>} : vector<128x128xbf16>, vector<128x128xbf16>, vector<128x128xf32> -> vector<128x128xf32>
    %c0_52 = arith.constant 0 : index
    %c0_53 = arith.constant 0 : index
    %77 = vector.load %arg22[%c0_52, %c0_53] : memref<128x128xbf16, #tpu.memory_space<vmem>>, vector<128x128xbf16>
    %cst_54 = arith.constant dense<0.000000e+00> : vector<128x128xf32>
    %78 = tpu.matmul %45, %77, %cst_54 {dimension_numbers = #tpu.dot_dimension_numbers<[1], [0], [0], [1], [0, 0, 1, 1], [], []>} : vector<128x128xbf16>, vector<128x128xbf16>, vector<128x128xf32> -> vector<128x128xf32>
    %79 = arith.addf %76, %78 : vector<128x128xf32>
    %c0_55 = arith.constant 0 : index
    %c0_56 = arith.constant 0 : index
    %80 = vector.load %arg23[%c0_55, %c0_56] : memref<1x128xf32, #tpu.memory_space<vmem>>, vector<1x128xf32>
    %81 = vector.broadcast %0 : vector<128x1xf32> to vector<128x128xf32>
    %82 = vector.broadcast %80 : vector<1x128xf32> to vector<128x128xf32>
    %83 = arith.mulf %81, %82 : vector<128x128xf32>
    %84 = arith.addf %79, %83 : vector<128x128xf32>
    %c0_57 = arith.constant 0 : index
    %c0_58 = arith.constant 0 : index
    %85 = vector.load %arg24[%c0_57, %c0_58] : memref<1x128xf32, #tpu.memory_space<vmem>>, vector<1x128xf32>
    %86 = vector.broadcast %1 : vector<128x1xf32> to vector<128x128xf32>
    %87 = vector.broadcast %85 : vector<1x128xf32> to vector<128x128xf32>
    %88 = arith.mulf %86, %87 : vector<128x128xf32>
    %89 = arith.addf %84, %88 : vector<128x128xf32>
    %c0_59 = arith.constant 0 : index
    %c0_60 = arith.constant 0 : index
    %90 = vector.load %arg6[%c0_59, %c0_60] : memref<128x128xf32, #tpu.memory_space<vmem>>, vector<128x128xf32>
    %91 = arith.addf %89, %90 : vector<128x128xf32>
    %92 = math.tanh %91 : vector<128x128xf32>
    %cst_61 = arith.constant 1.000000e+00 : f32
    %93 = vector.broadcast %cst_61 : f32 to vector<128x128xf32>
    %94 = arith.subf %93, %71 : vector<128x128xf32>
    %95 = arith.mulf %94, %2 : vector<128x128xf32>
    %96 = arith.mulf %71, %92 : vector<128x128xf32>
    %97 = arith.addf %95, %96 : vector<128x128xf32>
    %c0_62 = arith.constant 0 : index
    %c0_63 = arith.constant 0 : index
    %98 = vector.load %arg29[%c0_62, %c0_63] : memref<128x128xf32, #tpu.memory_space<vmem>>, vector<128x128xf32>
    tpu.vector_store %arg29[%c0_62, %c0_63], %97 {strides = array<i32>} : memref<128x128xf32, #tpu.memory_space<vmem>>, vector<128x128xf32>,
    %99 = arith.truncf %97 : vector<128x128xf32> to vector<128x128xbf16>
    %c0_64 = arith.constant 0 : index
    %c0_65 = arith.constant 0 : index
    %100 = vector.load %arg25[%c0_64, %c0_65] : memref<128x128xbf16, #tpu.memory_space<vmem>>, vector<128x128xbf16>
    %cst_66 = arith.constant dense<0.000000e+00> : vector<128x128xf32>
    %101 = tpu.matmul %99, %100, %cst_66 {dimension_numbers = #tpu.dot_dimension_numbers<[1], [0], [0], [1], [0, 0, 1, 1], [], []>} : vector<128x128xbf16>, vector<128x128xbf16>, vector<128x128xf32> -> vector<128x128xf32>
    %c0_67 = arith.constant 0 : index
    %c0_68 = arith.constant 0 : index
    %102 = vector.load %arg26[%c0_67, %c0_68] : memref<1x128xf32, #tpu.memory_space<vmem>>, vector<1x128xf32>
    %103 = vector.broadcast %102 : vector<1x128xf32> to vector<128x128xf32>
    %104 = arith.addf %101, %103 : vector<128x128xf32>
    %cst_69 = arith.constant 0.000000e+00 : f32
    %105 = vector.broadcast %cst_69 : f32 to vector<128x128xf32>
    %106 = arith.maximumf %104, %105 : vector<128x128xf32>
    %107 = arith.truncf %106 : vector<128x128xf32> to vector<128x128xbf16>
    %c0_70 = arith.constant 0 : index
    %c0_71 = arith.constant 0 : index
    %108 = vector.load %arg27[%c0_70, %c0_71] : memref<128x2xbf16, #tpu.memory_space<vmem>>, vector<128x2xbf16>
    %cst_72 = arith.constant dense<0.000000e+00> : vector<128x2xf32>
    %109 = tpu.matmul %107, %108, %cst_72 {dimension_numbers = #tpu.dot_dimension_numbers<[1], [0], [0], [1], [0, 0, 1, 1], [], []>} : vector<128x128xbf16>, vector<128x2xbf16>, vector<128x2xf32> -> vector<128x2xf32>
    %c0_73 = arith.constant 0 : index
    %c0_74 = arith.constant 0 : index
    %110 = vector.load %arg28[%c0_73, %c0_74] : memref<1x2xf32, #tpu.memory_space<vmem>>, vector<1x2xf32>
    %111 = vector.broadcast %110 : vector<1x2xf32> to vector<128x2xf32>
    %112 = arith.addf %109, %111 : vector<128x2xf32>
    %c0_75 = arith.constant 0 : index
    %c0_76 = arith.constant 0 : index
    %113 = vector.load %arg30[%c0_75, %c0_76] : memref<128x2xf32, #tpu.memory_space<vmem>>, vector<128x2xf32>
    tpu.vector_store %arg30[%c0_75, %c0_76], %112 {strides = array<i32>} : memref<128x2xf32, #tpu.memory_space<vmem>>, vector<128x2xf32>,
    return
  }
  func.func @transform_0(%arg0: i32) -> (i32, i32) {
    %c0_i32 = arith.constant 0 : i32
    %c0_i32_0 = arith.constant 0 : i32
    return %arg0, %c0_i32 : i32, i32
  }
  func.func @transform_1(%arg0: i32) -> (i32, i32) {
    %c0_i32 = arith.constant 0 : i32
    %c0_i32_0 = arith.constant 0 : i32
    return %arg0, %c0_i32 : i32, i32
  }
  func.func @transform_2(%arg0: i32) -> (i32, i32) {
    %c0_i32 = arith.constant 0 : i32
    %c0_i32_0 = arith.constant 0 : i32
    return %arg0, %c0_i32 : i32, i32
  }
  func.func @transform_3(%arg0: i32) -> (i32, i32) {
    %c0_i32 = arith.constant 0 : i32
    %c0_i32_0 = arith.constant 0 : i32
    return %arg0, %c0_i32 : i32, i32
  }
  func.func @transform_4(%arg0: i32) -> (i32, i32) {
    %c0_i32 = arith.constant 0 : i32
    %c0_i32_0 = arith.constant 0 : i32
    return %arg0, %c0_i32 : i32, i32
  }
  func.func @transform_5(%arg0: i32) -> (i32, i32) {
    %c0_i32 = arith.constant 0 : i32
    %c0_i32_0 = arith.constant 0 : i32
    return %arg0, %c0_i32 : i32, i32
  }
  func.func @transform_6(%arg0: i32) -> (i32, i32) {
    %c0_i32 = arith.constant 0 : i32
    %c0_i32_0 = arith.constant 0 : i32
    %c0_i32_1 = arith.constant 0 : i32
    return %c0_i32, %c0_i32_0 : i32, i32
  }
  func.func @transform_7(%arg0: i32) -> (i32, i32) {
    %c0_i32 = arith.constant 0 : i32
    %c0_i32_0 = arith.constant 0 : i32
    %c0_i32_1 = arith.constant 0 : i32
    return %c0_i32, %c0_i32_0 : i32, i32
  }
  func.func @transform_8(%arg0: i32) -> (i32, i32) {
    %c0_i32 = arith.constant 0 : i32
    %c0_i32_0 = arith.constant 0 : i32
    %c0_i32_1 = arith.constant 0 : i32
    return %c0_i32, %c0_i32_0 : i32, i32
  }
  func.func @transform_9(%arg0: i32) -> (i32, i32) {
    %c0_i32 = arith.constant 0 : i32
    %c0_i32_0 = arith.constant 0 : i32
    %c0_i32_1 = arith.constant 0 : i32
    return %c0_i32, %c0_i32_0 : i32, i32
  }
  func.func @transform_10(%arg0: i32) -> (i32, i32) {
    %c0_i32 = arith.constant 0 : i32
    %c0_i32_0 = arith.constant 0 : i32
    %c0_i32_1 = arith.constant 0 : i32
    return %c0_i32, %c0_i32_0 : i32, i32
  }
  func.func @transform_11(%arg0: i32) -> (i32, i32) {
    %c0_i32 = arith.constant 0 : i32
    %c0_i32_0 = arith.constant 0 : i32
    %c0_i32_1 = arith.constant 0 : i32
    return %c0_i32, %c0_i32_0 : i32, i32
  }
  func.func @transform_12(%arg0: i32) -> (i32, i32) {
    %c0_i32 = arith.constant 0 : i32
    %c0_i32_0 = arith.constant 0 : i32
    %c0_i32_1 = arith.constant 0 : i32
    return %c0_i32, %c0_i32_0 : i32, i32
  }
  func.func @transform_13(%arg0: i32) -> (i32, i32) {
    %c0_i32 = arith.constant 0 : i32
    %c0_i32_0 = arith.constant 0 : i32
    %c0_i32_1 = arith.constant 0 : i32
    return %c0_i32, %c0_i32_0 : i32, i32
  }
  func.func @transform_14(%arg0: i32) -> (i32, i32) {
    %c0_i32 = arith.constant 0 : i32
    %c0_i32_0 = arith.constant 0 : i32
    %c0_i32_1 = arith.constant 0 : i32
    return %c0_i32, %c0_i32_0 : i32, i32
  }
  func.func @transform_15(%arg0: i32) -> (i32, i32) {
    %c0_i32 = arith.constant 0 : i32
    %c0_i32_0 = arith.constant 0 : i32
    %c0_i32_1 = arith.constant 0 : i32
    return %c0_i32, %c0_i32_0 : i32, i32
  }
  func.func @transform_16(%arg0: i32) -> (i32, i32) {
    %c0_i32 = arith.constant 0 : i32
    %c0_i32_0 = arith.constant 0 : i32
    %c0_i32_1 = arith.constant 0 : i32
    return %c0_i32, %c0_i32_0 : i32, i32
  }
  func.func @transform_17(%arg0: i32) -> (i32, i32) {
    %c0_i32 = arith.constant 0 : i32
    %c0_i32_0 = arith.constant 0 : i32
    %c0_i32_1 = arith.constant 0 : i32
    return %c0_i32, %c0_i32_0 : i32, i32
  }
  func.func @transform_18(%arg0: i32) -> (i32, i32) {
    %c0_i32 = arith.constant 0 : i32
    %c0_i32_0 = arith.constant 0 : i32
    %c0_i32_1 = arith.constant 0 : i32
    return %c0_i32, %c0_i32_0 : i32, i32
  }
  func.func @transform_19(%arg0: i32) -> (i32, i32) {
    %c0_i32 = arith.constant 0 : i32
    %c0_i32_0 = arith.constant 0 : i32
    %c0_i32_1 = arith.constant 0 : i32
    return %c0_i32, %c0_i32_0 : i32, i32
  }
  func.func @transform_20(%arg0: i32) -> (i32, i32) {
    %c0_i32 = arith.constant 0 : i32
    %c0_i32_0 = arith.constant 0 : i32
    %c0_i32_1 = arith.constant 0 : i32
    return %c0_i32, %c0_i32_0 : i32, i32
  }
  func.func @transform_21(%arg0: i32) -> (i32, i32) {
    %c0_i32 = arith.constant 0 : i32
    %c0_i32_0 = arith.constant 0 : i32
    %c0_i32_1 = arith.constant 0 : i32
    return %c0_i32, %c0_i32_0 : i32, i32
  }
  func.func @transform_22(%arg0: i32) -> (i32, i32) {
    %c0_i32 = arith.constant 0 : i32
    %c0_i32_0 = arith.constant 0 : i32
    %c0_i32_1 = arith.constant 0 : i32
    return %c0_i32, %c0_i32_0 : i32, i32
  }
  func.func @transform_23(%arg0: i32) -> (i32, i32) {
    %c0_i32 = arith.constant 0 : i32
    %c0_i32_0 = arith.constant 0 : i32
    %c0_i32_1 = arith.constant 0 : i32
    return %c0_i32, %c0_i32_0 : i32, i32
  }
  func.func @transform_24(%arg0: i32) -> (i32, i32) {
    %c0_i32 = arith.constant 0 : i32
    %c0_i32_0 = arith.constant 0 : i32
    %c0_i32_1 = arith.constant 0 : i32
    return %c0_i32, %c0_i32_0 : i32, i32
  }
  func.func @transform_25(%arg0: i32) -> (i32, i32) {
    %c0_i32 = arith.constant 0 : i32
    %c0_i32_0 = arith.constant 0 : i32
    %c0_i32_1 = arith.constant 0 : i32
    return %c0_i32, %c0_i32_0 : i32, i32
  }
  func.func @transform_26(%arg0: i32) -> (i32, i32) {
    %c0_i32 = arith.constant 0 : i32
    %c0_i32_0 = arith.constant 0 : i32
    %c0_i32_1 = arith.constant 0 : i32
    return %c0_i32, %c0_i32_0 : i32, i32
  }
  func.func @transform_27(%arg0: i32) -> (i32, i32) {
    %c0_i32 = arith.constant 0 : i32
    %c0_i32_0 = arith.constant 0 : i32
    %c0_i32_1 = arith.constant 0 : i32
    return %c0_i32, %c0_i32_0 : i32, i32
  }
  func.func @transform_28(%arg0: i32) -> (i32, i32) {
    %c0_i32 = arith.constant 0 : i32
    %c0_i32_0 = arith.constant 0 : i32
    return %arg0, %c0_i32 : i32, i32
  }
  func.func @transform_29(%arg0: i32) -> (i32, i32) {
    %c0_i32 = arith.constant 0 : i32
    %c0_i32_0 = arith.constant 0 : i32
    return %arg0, %c0_i32 : i32, i32
  }
}

</mosaic_0001>

<bundles_post_ra>
// kernel: raft_forward.7
= control target key start
LH: loop header
LB: loop body
LE: loop exit
PB: predicated region body
PF: predicated region fallthrough
CT: control target
= control target key end

     0   :  { %v462_v0 = vmov 0   ;;  %vm206_vm0 = vcmask 523264   ;;  %s668_s1 = inlined_call_operand.vmem [shape: bf16[192,128], index: 1, kind: input, shape index: {}]   ;;  %s669_s0 = inlined_call_operand.vmem [shape: bf16[128,192], index: 0, kind: input, shape index: {}]   ;;  %s670_s2 = inlined_call_operand.vmem [shape: f32[1,128], index: 2, kind: input, shape index: {}]   ;;  %s671_s3 = inlined_call_operand.vmem [shape: f32[128,128], index: 3, kind: output, shape index: {}]  }
   0x1   :  { %231 = vmatprep.subr.bf16.mxu0 %v462_v0  ;;  %401 = vmatprep.subr.bf16.mxu1 %v462_v0  ;;  %v426_v1 = vld [vmem:[%s668_s1] sm:$0xff]   ;;  %v427_v2 = vld [vmem:[%s668_s1 + $0x8] sm:$0xff]   ;;  %v428_v3 = vld [vmem:[%s668_s1 + $0x10] sm:$0xff]  }
   0x2   :  { %232 = vmatpush1.bf16.msra.mxu0 %v426_v1  ;;  %413 = vmatpush1.bf16.msra.mxu1 %v426_v1  ;;  %v429_v4 = vld [vmem:[%s668_s1 + $0x18] sm:$0xff]   ;;  %v440_v5 = vld [vmem:[%s669_s0 + $0x4] ss:$8 sps:$4 sm:$0xff]   ;;  %v432_v9 = vld [vmem:[%s668_s1 + $0x30] sm:$0xff]  }
   0x3   :  { %233 = vmatprep.subr.bf16.mxu0 %v462_v0  ;;  %402 = vmatprep.subr.bf16.mxu1 %v462_v0  ;;  %v430_v6 = vld [vmem:[%s668_s1 + $0x20] sm:$0xff]   ;;  %v431_v8 = vld [vmem:[%s668_s1 + $0x28] sm:$0xff]   ;;  %v433_v10 = vld [vmem:[%s668_s1 + $0x38] sm:$0xff]  }
   0x4   :  { %v443_v7 = vld [vmem:[%s669_s0 + $0x44] ss:$8 sps:$4 sm:$0xff]   ;;  %393 = vmatprep.mubr.msk.bf16.mxu0 %vm206_vm0, %v440_v5  ;;  %v436_v13 = vld [vmem:[%s668_s1 + $0x50] sm:$0xff]   ;;  %v437_v14 = vld [vmem:[%s668_s1 + $0x58] sm:$0xff]  }
   0x5   :  { %397 = vmatprep.mubr.msk.bf16.mxu1 %vm206_vm0, %v443_v7  ;;  %v434_v11 = vld [vmem:[%s668_s1 + $0x40] sm:$0xff]   ;;  %v435_v12 = vld [vmem:[%s668_s1 + $0x48] sm:$0xff]   ;;  %v444_v17 = vld [vmem:[%s669_s0 + $0x14] ss:$8 sps:$4 sm:$0xff]  }
   0x6   :  { %234 = vmatpush1.bf16.msra.mxu0 %v427_v2  ;;  %414 = vmatpush1.bf16.msra.mxu1 %v427_v2  ;;  %v438_v15 = vld [vmem:[%s669_s0] ss:$8 sps:$4 sm:$0xff]   ;;  %v446_v18 = vld [vmem:[%s669_s0 + $0x54] ss:$8 sps:$4 sm:$0xff]   ;;  %v448_v19 = vld [vmem:[%s669_s0 + $0x10] ss:$8 sps:$4 sm:$0xff]  }
   0x7   :  { %235 = vmatprep.subr.bf16.mxu0 %v462_v0  ;;  %403 = vmatprep.subr.bf16.mxu1 %v462_v0  ;;  %v441_v16 = vld [vmem:[%s669_s0 + $0x40] ss:$8 sps:$4 sm:$0xff]   ;;  %v449_v20 = vld [vmem:[%s669_s0 + $0x50] ss:$8 sps:$4 sm:$0xff]   ;;  %v450_v21 = vld [vmem:[%s669_s0 + $0x24] ss:$8 sps:$4 sm:$0xff]  }
   0x8   :  { %v452_v22 = vld [vmem:[%s669_s0 + $0x64] ss:$8 sps:$4 sm:$0xff]   ;;  %v454_v23 = vld [vmem:[%s669_s0 + $0x20] ss:$8 sps:$4 sm:$0xff]   ;;  %v456_v25 = vld [vmem:[%s669_s0 + $0x34] ss:$8 sps:$4 sm:$0xff]  }
   0x9   :  { %v455_v24 = vld [vmem:[%s669_s0 + $0x60] ss:$8 sps:$4 sm:$0xff]   ;;  %v458_v26 = vld [vmem:[%s669_s0 + $0x74] ss:$8 sps:$4 sm:$0xff]   ;;  %v460_v27 = vld [vmem:[%s669_s0 + $0x30] ss:$8 sps:$4 sm:$0xff]  }
   0xa   :  { %236 = vmatpush1.bf16.msra.mxu0 %v428_v3  ;;  %415 = vmatpush1.bf16.msra.mxu1 %v428_v3  ;;  %v461_v28 = vld [vmem:[%s669_s0 + $0x70] ss:$8 sps:$4 sm:$0xff]   ;;  %v602_v29 = vld [vmem:[%s670_s2] ss:$0 sm:$0xff] }
   0xb   :  { %237 = vmatprep.subr.bf16.mxu0 %v462_v0  ;;  %404 = vmatprep.subr.bf16.mxu1 %v462_v0 }
   0xe   :  { %238 = vmatpush1.bf16.msra.mxu0 %v429_v4  ;;  %416 = vmatpush1.bf16.msra.mxu1 %v429_v4 }
   0xf   :  { %239 = vmatprep.subr.bf16.mxu0 %v462_v0  ;;  %405 = vmatprep.subr.bf16.mxu1 %v462_v0 }
  0x12   :  { %240 = vmatpush1.bf16.msra.mxu0 %v430_v6  ;;  %417 = vmatpush1.bf16.msra.mxu1 %v430_v6 }
  0x13   :  { %241 = vmatprep.subr.bf16.mxu0 %v462_v0  ;;  %406 = vmatprep.subr.bf16.mxu1 %v462_v0 }
  0x16   :  { %242 = vmatpush1.bf16.msra.mxu0 %v431_v8  ;;  %418 = vmatpush1.bf16.msra.mxu1 %v431_v8 }
  0x17   :  { %243 = vmatprep.subr.bf16.mxu0 %v462_v0  ;;  %407 = vmatprep.subr.bf16.mxu1 %v462_v0 }
  0x1a   :  { %244 = vmatpush1.bf16.msra.mxu0 %v432_v9  ;;  %419 = vmatpush1.bf16.msra.mxu1 %v432_v9 }
  0x1b   :  { %245 = vmatprep.subr.bf16.mxu0 %v462_v0  ;;  %408 = vmatprep.subr.bf16.mxu1 %v462_v0 }
  0x1e   :  { %246 = vmatpush1.bf16.msra.mxu0 %v433_v10  ;;  %420 = vmatpush1.bf16.msra.mxu1 %v433_v10 }
  0x1f   :  { %247 = vmatprep.subr.bf16.mxu0 %v462_v0  ;;  %409 = vmatprep.subr.bf16.mxu1 %v462_v0 }
  0x22   :  { %248 = vmatpush1.bf16.msra.mxu0 %v434_v11  ;;  %421 = vmatpush1.bf16.msra.mxu1 %v434_v11 }
  0x23   :  { %249 = vmatprep.subr.bf16.mxu0 %v462_v0  ;;  %410 = vmatprep.subr.bf16.mxu1 %v462_v0 }
  0x26   :  { %250 = vmatpush1.bf16.msra.mxu0 %v435_v12  ;;  %422 = vmatpush1.bf16.msra.mxu1 %v435_v12 }
  0x27   :  { %251 = vmatprep.subr.bf16.mxu0 %v462_v0  ;;  %411 = vmatprep.subr.bf16.mxu1 %v462_v0 }
  0x2a   :  { %252 = vmatpush1.bf16.msra.mxu0 %v436_v13  ;;  %423 = vmatpush1.bf16.msra.mxu1 %v436_v13 }
  0x2b   :  { %253 = vmatprep.subr.bf16.mxu0 %v462_v0  ;;  %412 = vmatprep.subr.bf16.mxu1 %v462_v0 }
  0x2e   :  { %254 = vmatpush1.bf16.msra.mxu0 %v437_v14  ;;  %424 = vmatpush1.bf16.msra.mxu1 %v437_v14 }
  0x31   :  { %264 = vmatmul.mubr.bf16.vlgmr.msra.gmra.mrb[0].mxu0 %v438_v15  ;;  %296 = vmatmul.mubr.bf16.vlgmr.msra.gmra.mrb[0].mxu1 %v441_v16 }
  0x32   :  { %394 = vmatprep.mubr.msk.bf16.mxu0 %vm206_vm0, %v444_v17  ;;  %398 = vmatprep.mubr.msk.bf16.mxu1 %vm206_vm0, %v446_v18 }
  0x39   :  { %272 = vmatmul.mubr.bf16.gmra.mrb[4].mxu0 %v448_v19  ;;  %304 = vmatmul.mubr.bf16.gmra.mrb[4].mxu1 %v449_v20 }
  0x3a   :  { %395 = vmatprep.mubr.msk.bf16.mxu0 %vm206_vm0, %v450_v21  ;;  %399 = vmatprep.mubr.msk.bf16.mxu1 %vm206_vm0, %v452_v22 }
  0x41   :  { %280 = vmatmul.mubr.bf16.gmra.mrb[8].mxu0 %v454_v23  ;;  %312 = vmatmul.mubr.bf16.gmra.mrb[8].mxu1 %v455_v24 }
  0x42   :  { %396 = vmatprep.mubr.msk.bf16.mxu0 %vm206_vm0, %v456_v25  ;;  %400 = vmatprep.mubr.msk.bf16.mxu1 %vm206_vm0, %v458_v26 }
  0x49   :  { %288 = vmatmul.mubr.bf16.gmra.mrb[12].mxu0 %v460_v27  ;;  %320 = vmatmul.mubr.bf16.gmra.mrb[12].mxu1 %v461_v28 }
 0x104   :  { %v265_v30 = vpop.f32.mrb[0].mxu0  ;;  %v297_v31 = vpop.f32.mrb[0].mxu1 }
 0x105   :  { %v266_v32 = vadd.f32 %v602_v29, %v265_v30  ;;  %v298_v33 = vadd.f32 %v602_v29, %v297_v31  ;;  %v267_v34 = vpop.f32.mrb[1].mxu0  ;;  %v299_v35 = vpop.f32.mrb[1].mxu1 }
 0x106   :  { %v268_v36 = vpop.f32.mrb[2].mxu0  ;;  %v300_v37 = vpop.f32.mrb[2].mxu1 }
 0x107   :  { %v328_v38 = vmax.f32 %v266_v32, 0.0  ;;  %v336_v39 = vmax.f32 %v298_v33, 0.0  ;;  %v269_v40 = vadd.f32 %v602_v29, %v268_v36  ;;  %v301_v41 = vadd.f32 %v602_v29, %v300_v37  ;;  %v270_v42 = vpop.f32.mrb[3].mxu0  ;;  %v302_v43 = vpop.f32.mrb[3].mxu1 }
 0x109   :  { %344 = vst [vmem:[%s671_s3] sm:$0xff] %v328_v38  ;;  %352 = vst [vmem:[%s671_s3 + $0x40] sm:$0xff] %v336_v39  ;;  %v329_v44 = vmax.f32 %v269_v40, 0.0  ;;  %v337_v45 = vmax.f32 %v301_v41, 0.0 }
 0x10b   :  { %345 = vst [vmem:[%s671_s3 + $0x8] sm:$0xff] %v329_v44  ;;  %353 = vst [vmem:[%s671_s3 + $0x48] sm:$0xff] %v337_v45 }
 0x10c   :  { %v273_v46 = vpop.f32.mrb[4].mxu0  ;;  %v305_v47 = vpop.f32.mrb[4].mxu1 }
 0x10d   :  { %v274_v48 = vadd.f32 %v602_v29, %v273_v46  ;;  %v306_v49 = vadd.f32 %v602_v29, %v305_v47  ;;  %v275_v50 = vpop.f32.mrb[5].mxu0  ;;  %v307_v51 = vpop.f32.mrb[5].mxu1 }
 0x10e   :  { %v276_v52 = vpop.f32.mrb[6].mxu0  ;;  %v308_v53 = vpop.f32.mrb[6].mxu1 }
 0x10f   :  { %v330_v54 = vmax.f32 %v274_v48, 0.0  ;;  %v338_v55 = vmax.f32 %v306_v49, 0.0  ;;  %v277_v56 = vadd.f32 %v602_v29, %v276_v52  ;;  %v309_v57 = vadd.f32 %v602_v29, %v308_v53  ;;  %v278_v58 = vpop.f32.mrb[7].mxu0  ;;  %v310_v59 = vpop.f32.mrb[7].mxu1 }
 0x111   :  { %346 = vst [vmem:[%s671_s3 + $0x10] sm:$0xff] %v330_v54  ;;  %354 = vst [vmem:[%s671_s3 + $0x50] sm:$0xff] %v338_v55  ;;  %v331_v60 = vmax.f32 %v277_v56, 0.0  ;;  %v339_v61 = vmax.f32 %v309_v57, 0.0 }
 0x113   :  { %347 = vst [vmem:[%s671_s3 + $0x18] sm:$0xff] %v331_v60  ;;  %355 = vst [vmem:[%s671_s3 + $0x58] sm:$0xff] %v339_v61 }
 0x114   :  { %v281_v62 = vpop.f32.mrb[8].mxu0  ;;  %v313_v63 = vpop.f32.mrb[8].mxu1 }
 0x115   :  { %v282_v0 = vadd.f32 %v602_v29, %v281_v62  ;;  %v314_v1 = vadd.f32 %v602_v29, %v313_v63  ;;  %v283_v2 = vpop.f32.mrb[9].mxu0  ;;  %v315_v3 = vpop.f32.mrb[9].mxu1 }
 0x116   :  { %v284_v4 = vpop.f32.mrb[10].mxu0  ;;  %v316_v5 = vpop.f32.mrb[10].mxu1 }
 0x117   :  { %v332_v6 = vmax.f32 %v282_v0, 0.0  ;;  %v340_v7 = vmax.f32 %v314_v1, 0.0  ;;  %v285_v8 = vadd.f32 %v602_v29, %v284_v4  ;;  %v317_v9 = vadd.f32 %v602_v29, %v316_v5  ;;  %v286_v10 = vpop.f32.mrb[11].mxu0  ;;  %v318_v11 = vpop.f32.mrb[11].mxu1 }
 0x119   :  { %348 = vst [vmem:[%s671_s3 + $0x20] sm:$0xff] %v332_v6  ;;  %356 = vst [vmem:[%s671_s3 + $0x60] sm:$0xff] %v340_v7  ;;  %v333_v12 = vmax.f32 %v285_v8, 0.0  ;;  %v341_v13 = vmax.f32 %v317_v9, 0.0 }
 0x11b   :  { %349 = vst [vmem:[%s671_s3 + $0x28] sm:$0xff] %v333_v12  ;;  %357 = vst [vmem:[%s671_s3 + $0x68] sm:$0xff] %v341_v13 }
 0x11c   :  { %v289_v14 = vpop.f32.mrb[12].mxu0  ;;  %v321_v15 = vpop.f32.mrb[12].mxu1 }
 0x11d   :  { %v290_v16 = vadd.f32 %v602_v29, %v289_v14  ;;  %v322_v17 = vadd.f32 %v602_v29, %v321_v15  ;;  %v291_v18 = vpop.f32.mrb[13].mxu0  ;;  %v323_v19 = vpop.f32.mrb[13].mxu1 }
 0x11e   :  { %v292_v20 = vpop.f32.mrb[14].mxu0  ;;  %v324_v21 = vpop.f32.mrb[14].mxu1 }
 0x11f   :  { %v334_v22 = vmax.f32 %v290_v16, 0.0  ;;  %v342_v23 = vmax.f32 %v322_v17, 0.0  ;;  %v293_v24 = vadd.f32 %v602_v29, %v292_v20  ;;  %v325_v25 = vadd.f32 %v602_v29, %v324_v21  ;;  %v294_v26 = vpop.f32.mrb[15].mxu0  ;;  %v326_v27 = vpop.f32.mrb[15].mxu1 }
 0x121   :  { %350 = vst [vmem:[%s671_s3 + $0x30] sm:$0xff] %v334_v22  ;;  %358 = vst [vmem:[%s671_s3 + $0x70] sm:$0xff] %v342_v23  ;;  %v335_v28 = vmax.f32 %v293_v24, 0.0  ;;  %v343_v30 = vmax.f32 %v325_v25, 0.0 }
 0x123   :  { %351 = vst [vmem:[%s671_s3 + $0x38] sm:$0xff] %v335_v28  ;;  %359 = vst [vmem:[%s671_s3 + $0x78] sm:$0xff] %v343_v30 }

// kernel: raft_forward.9
= control target key start
LH: loop header
LB: loop body
LE: loop exit
PB: predicated region body
PF: predicated region fallthrough
CT: control target
= control target key end

     0   :  { %s533_s9 = smov 0   ;;  %s585_s0 = inlined_call_operand.vmem [shape: bf16[2,64,128], index: 0, kind: input, shape index: {}]   ;;  %s586_s1 = inlined_call_operand.vmem [shape: bf16[2,128,64], index: 1, kind: input, shape index: {}]   ;;  %s587_s2 = inlined_call_operand.vmem [shape: f32[2,64,64], index: 2, kind: output, shape index: {}]  }
   0x1 LB: > { %s410_s10 = sadd.s32 4294967295, %s516_s9   ;;  %p414_p0 = scmp.ge.s32.totalorder %s516_s9, 1  ;;  %s516_s9 = sphi %s533_s9, %s12_s9  }
   0x2   : > { %p122_p1 = scmp.lt.s32.totalorder %s516_s9, 3 }
   0x4   : > { %p123_p2 = pnand %p414_p0, %p122_p1 }
   0x5   : > { %p149_p3 = scmp.lt.s32.totalorder (!%p123_p2), %s410_s10, 1  ;;  %vm334_vm0 = vcmask (!%p123_p2), 523264  }
   0x6   : > { %126 = sbr.rel (%p123_p2) target bundleno = 268 (0x10c), region = 28 }
   0xd   : > { %s589_s10 = smov (!%p149_p3, %s410_s10), 1 }
   0xe   : > { %s436_s11 = sshll.u32 %s589_s10, 6  ;;  %s435_s15 = sshll.u32 %s589_s10, 5 }
   0xf   : > { %s549_s14 = scalar_lea.vmem %s586_s1, %s436_s11  ;;  %s558_s18 = scalar_lea.vmem %s585_s0, %s435_s15 }
  0x10   : > { %v498_v0 = vld [vmem:[%s549_s14] sm:$0xff]   ;;  %v499_v1 = vld [vmem:[%s549_s14 + $0x8] sm:$0xff]   ;;  %v500_v2 = vld [vmem:[%s549_s14 + $0x10] sm:$0xff]   ;;  %s163_s21 = scalar_lea.vmem %s587_s2, %s436_s11 }
  0x11   : > { %450 = vmatprep.subr.bf16.mxu0 %v498_v0  ;;  %474 = vmatprep.subr.bf16.mxu1 %v498_v0  ;;  %v501_v3 = vld [vmem:[%s549_s14 + $0x18] sm:$0xff]   ;;  %v506_v4 = vld [vmem:[%s558_s18] sm:$0xff]   ;;  %v507_v5 = vld [vmem:[%s558_s18 + $0x10] sm:$0xff]  }
  0x12   : > { %451 = vmatpush3.bf16.msra.mxu0 %v498_v0  ;;  %482 = vmatpush3.bf16.msra.mxu1 %v498_v0  ;;  %v502_v6 = vld [vmem:[%s549_s14 + $0x20] sm:$0xff]   ;;  %v503_v7 = vld [vmem:[%s549_s14 + $0x28] sm:$0xff]   ;;  %v504_v8 = vld [vmem:[%s549_s14 + $0x30] sm:$0xff]  }
  0x13   : > { %452 = vmatprep.subr.bf16.mxu0 %v499_v1  ;;  %475 = vmatprep.subr.bf16.mxu1 %v499_v1  ;;  %v505_v9 = vld [vmem:[%s549_s14 + $0x38] sm:$0xff]   ;;  %v508_v10 = vld [vmem:[%s558_s18 + $0x8] sm:$0xff]  }
  0x14   : > { %466 = vmatprep.mubr.bf16.mxu0 %v506_v4  ;;  %470 = vmatprep.mubr.bf16.mxu1 %v507_v5  ;;  %v509_v11 = vld [vmem:[%s558_s18 + $0x18] sm:$0xff]  }
  0x16   : > { %453 = vmatpush3.bf16.msra.mxu0 %v499_v1  ;;  %483 = vmatpush3.bf16.msra.mxu1 %v499_v1 }
  0x17   : > { %454 = vmatprep.subr.bf16.mxu0 %v500_v2  ;;  %476 = vmatprep.subr.bf16.mxu1 %v500_v2 }
  0x1a   : > { %455 = vmatpush3.bf16.msra.mxu0 %v500_v2  ;;  %484 = vmatpush3.bf16.msra.mxu1 %v500_v2 }
  0x1b   : > { %456 = vmatprep.subr.bf16.mxu0 %v501_v3  ;;  %477 = vmatprep.subr.bf16.mxu1 %v501_v3 }
  0x1e   : > { %457 = vmatpush3.bf16.msra.mxu0 %v501_v3  ;;  %485 = vmatpush3.bf16.msra.mxu1 %v501_v3 }
  0x1f   : > { %458 = vmatprep.subr.bf16.mxu0 %v502_v6  ;;  %478 = vmatprep.subr.bf16.mxu1 %v502_v6 }
  0x22   : > { %459 = vmatpush3.bf16.msra.mxu0 %v502_v6  ;;  %486 = vmatpush3.bf16.msra.mxu1 %v502_v6 }
  0x23   : > { %460 = vmatprep.subr.bf16.mxu0 %v503_v7  ;;  %479 = vmatprep.subr.bf16.mxu1 %v503_v7 }
  0x26   : > { %461 = vmatpush3.bf16.msra.mxu0 %v503_v7  ;;  %487 = vmatpush3.bf16.msra.mxu1 %v503_v7 }
  0x27   : > { %462 = vmatprep.subr.bf16.mxu0 %v504_v8  ;;  %480 = vmatprep.subr.bf16.mxu1 %v504_v8 }
  0x2a   : > { %463 = vmatpush3.bf16.msra.mxu0 %v504_v8  ;;  %488 = vmatpush3.bf16.msra.mxu1 %v504_v8 }
  0x2b   : > { %464 = vmatprep.subr.bf16.mxu0 %v505_v9  ;;  %481 = vmatprep.subr.bf16.mxu1 %v505_v9 }
  0x2e   : > { %465 = vmatpush3.bf16.msra.mxu0 %v505_v9  ;;  %489 = vmatpush3.bf16.msra.mxu1 %v505_v9 }
  0x31   : > { %467 = vmatmul.mubr.bf16.vlgmr.msra.gmra.mrb[0].mxu0 %v508_v10  ;;  %471 = vmatmul.mubr.bf16.vlgmr.msra.gmra.mrb[0].mxu1 %v509_v11 }
 0x104   : > { %v468_v12 = vpop.f32.mrb[0].mxu0  ;;  %v472_v13 = vpop.f32.mrb[0].mxu1 }
 0x105   : > { %v328_v14 = vmul.f32 0.088388346, %v468_v12  ;;  %v332_v15 = vmul.f32 0.088388346, %v472_v13  ;;  %v295_v16 = vpop.f32.mrb[1].mxu0  ;;  %v311_v17 = vpop.f32.mrb[1].mxu1 }
 0x106   : > { %v326_v18 = vmul.f32 0.088388346, %v295_v16  ;;  %v330_v19 = vmul.f32 0.088388346, %v311_v17  ;;  %v469_v20 = vpop.f32.mrb[2].mxu0  ;;  %v473_v21 = vpop.f32.mrb[2].mxu1 }
 0x107   : > { %337 = vst.msk [vmem:[%s163_s21 + $0x10] sm:$0xff] %vm334_vm0, %v328_v14  ;;  %341 = vst.msk [vmem:[%s163_s21 + $0x30] sm:$0xff] %vm334_vm0, %v332_v15  ;;  %v329_v22 = vmul.f32 0.088388346, %v469_v20  ;;  %v333_v23 = vmul.f32 0.088388346, %v473_v21 }
 0x108   : > { %v298_v24 = vpop.f32.mrb[3].mxu0  ;;  %v314_v25 = vpop.f32.mrb[3].mxu1  ;;  %335 = vst.msk [vmem:[%s163_s21] sm:$0xff] %vm334_vm0, %v326_v18  ;;  %339 = vst.msk [vmem:[%s163_s21 + $0x20] sm:$0xff] %vm334_vm0, %v330_v19 }
 0x109   : > { %v327_v26 = vmul.f32 0.088388346, %v298_v24  ;;  %v331_v27 = vmul.f32 0.088388346, %v314_v25  ;;  %338 = vst.msk [vmem:[%s163_s21 + $0x18] sm:$0xff] %vm334_vm0, %v329_v22  ;;  %342 = vst.msk [vmem:[%s163_s21 + $0x38] sm:$0xff] %vm334_vm0, %v333_v23 }
 0x10b   : > { %336 = vst.msk [vmem:[%s163_s21 + $0x8] sm:$0xff] %vm334_vm0, %v327_v26  ;;  %340 = vst.msk [vmem:[%s163_s21 + $0x28] sm:$0xff] %vm334_vm0, %v331_v27 }
 0x10c PF: > { %s12_s9 = sadd.s32 1, %s516_s9  }
 0x10d   : > { %p9_p4 = scmp.ge.s32.totalorder %s12_s9, 4  }
 0x10f   :  { %11 = sbr.rel (!%p9_p4) target bundleno = 1 (0x1), region = 61 }

// kernel: raft_forward.10
= control target key start
LH: loop header
LB: loop body
LE: loop exit
PB: predicated region body
PF: predicated region fallthrough
CT: control target
= control target key end

     0   :  { %vm274_vm0 = vcmask 523264   ;;  %v1179_v56 = vmov 0   ;;  %v72_v58 = vlaneseq  ;;  %s1743_s1 = inlined_call_operand.vmem [shape: bf16[192,256], index: 1, kind: input, shape index: {}]   ;;  %s1744_s0 = inlined_call_operand.vmem [shape: bf16[128,192], index: 0, kind: input, shape index: {}]   ;;  %s1745_s3 = inlined_call_operand.vmem [shape: bf16[128,256], index: 3, kind: input, shape index: {}]   ;;  %s1746_s4 = inlined_call_operand.vmem [shape: bf16[128,128], index: 4, kind: input, shape index: {}]   ;;  %s1747_s2 = inlined_call_operand.vmem [shape: f32[1,256], index: 2, kind: input, shape index: {}]   ;;  %s1748_s7 = inlined_call_operand.vmem [shape: f32[128,128], index: 7, kind: output, shape index: {0}]   ;;  %s1749_s5 = inlined_call_operand.vmem [shape: f32[1,256], index: 5, kind: input, shape index: {}]   ;;  %s1750_s8 = inlined_call_operand.vmem [shape: f32[128,256], index: 8, kind: output, shape index: {1}]   ;;  %s1751_s6 = inlined_call_operand.vmem [shape: f32[1,128], index: 6, kind: input, shape index: {}]   ;;  %s1752_s9 = inlined_call_operand.vmem [shape: f32[128,128], index: 9, kind: output, shape index: {2}]  }
   0x1   :  { %v1055_v0 = vld [vmem:[%s1743_s1 + $0x4] ss:$8 sps:$4 sm:$0xff]   ;;  %v1057_v1 = vld [vmem:[%s1743_s1] ss:$8 sps:$4 sm:$0xff]   ;;  %v1058_v2 = vld [vmem:[%s1743_s1 + $0x14] ss:$8 sps:$4 sm:$0xff]   ;;  %618 = vmatprep.mubr.bf16.mxu1 %v1179_v56 }
   0x2   :  { %299 = vmatprep.subr.bf16.mxu0 %v1055_v0  ;;  %v1060_v3 = vld [vmem:[%s1743_s1 + $0x10] ss:$8 sps:$4 sm:$0xff]   ;;  %v1061_v4 = vld [vmem:[%s1743_s1 + $0x24] ss:$8 sps:$4 sm:$0xff]   ;;  %v1063_v5 = vld [vmem:[%s1743_s1 + $0x20] ss:$8 sps:$4 sm:$0xff]  }
   0x3   :  { %300 = vmatpush1.bf16.msra.mxu0 %v1057_v1  ;;  %v1064_v6 = vld [vmem:[%s1743_s1 + $0x34] ss:$8 sps:$4 sm:$0xff]   ;;  %v1066_v7 = vld [vmem:[%s1743_s1 + $0x30] ss:$8 sps:$4 sm:$0xff]   ;;  %v1067_v8 = vld [vmem:[%s1743_s1 + $0x44] ss:$8 sps:$4 sm:$0xff]  }
   0x4   :  { %301 = vmatprep.subr.bf16.mxu0 %v1058_v2  ;;  %v1069_v9 = vld [vmem:[%s1743_s1 + $0x40] ss:$8 sps:$4 sm:$0xff]   ;;  %v1070_v10 = vld [vmem:[%s1743_s1 + $0x54] ss:$8 sps:$4 sm:$0xff]   ;;  %v1093_v11 = vld [vmem:[%s1744_s0 + $0x4] ss:$8 sps:$4 sm:$0xff]  }
   0x5   :  { %v1072_v12 = vld [vmem:[%s1743_s1 + $0x50] ss:$8 sps:$4 sm:$0xff]   ;;  %957 = vmatprep.mubr.msk.bf16.mxu0 %vm274_vm0, %v1093_v11  ;;  %v1073_v13 = vld [vmem:[%s1743_s1 + $0x64] ss:$8 sps:$4 sm:$0xff]   ;;  %v1075_v14 = vld [vmem:[%s1743_s1 + $0x60] ss:$8 sps:$4 sm:$0xff]  }
   0x6   :  { %v1076_v15 = vld [vmem:[%s1743_s1 + $0x74] ss:$8 sps:$4 sm:$0xff]   ;;  %v1078_v16 = vld [vmem:[%s1743_s1 + $0x70] ss:$8 sps:$4 sm:$0xff]   ;;  %v1079_v17 = vld [vmem:[%s1743_s1 + $0x84] ss:$8 sps:$4 sm:$0xff]  }
   0x7   :  { %302 = vmatpush1.bf16.msra.mxu0 %v1060_v3  ;;  %v1117_v18 = vld [vmem:[%s1745_s3 + $0x4] ss:$8 sps:$4 sm:$0xff]   ;;  %v1115_v19 = vld [vmem:[%s1745_s3] ss:$8 sps:$4 sm:$0xff]   ;;  %v1120_v20 = vld [vmem:[%s1745_s3 + $0x14] ss:$8 sps:$4 sm:$0xff]  }
   0x8   :  { %303 = vmatprep.subr.bf16.mxu0 %v1061_v4  ;;  %1038 = vmatprep.subr.bf16.mxu1 %v1117_v18  ;;  %v1081_v21 = vld [vmem:[%s1743_s1 + $0x80] ss:$8 sps:$4 sm:$0xff]   ;;  %v1082_v22 = vld [vmem:[%s1743_s1 + $0x94] ss:$8 sps:$4 sm:$0xff]   ;;  %v1118_v23 = vld [vmem:[%s1745_s3 + $0x10] ss:$8 sps:$4 sm:$0xff]  }
   0x9   :  { %1046 = vmatpush1.bf16.msra.mxu1 %v1115_v19  ;;  %v1123_v24 = vld [vmem:[%s1745_s3 + $0x24] ss:$8 sps:$4 sm:$0xff]   ;;  %v1084_v25 = vld [vmem:[%s1743_s1 + $0x90] ss:$8 sps:$4 sm:$0xff]   ;;  %v1121_v27 = vld [vmem:[%s1745_s3 + $0x20] ss:$8 sps:$4 sm:$0xff]  }
   0xa   :  { %1039 = vmatprep.subr.bf16.mxu1 %v1120_v20  ;;  %v1085_v26 = vld [vmem:[%s1743_s1 + $0xa4] ss:$8 sps:$4 sm:$0xff]   ;;  %v1126_v28 = vld [vmem:[%s1745_s3 + $0x34] ss:$8 sps:$4 sm:$0xff]   ;;  %v1087_v29 = vld [vmem:[%s1743_s1 + $0xa0] ss:$8 sps:$4 sm:$0xff]  }
   0xb   :  { %304 = vmatpush1.bf16.msra.mxu0 %v1063_v5  ;;  %v1088_v30 = vld [vmem:[%s1743_s1 + $0xb4] ss:$8 sps:$4 sm:$0xff]   ;;  %v1124_v31 = vld [vmem:[%s1745_s3 + $0x30] ss:$8 sps:$4 sm:$0xff]   ;;  %v1129_v32 = vld [vmem:[%s1745_s3 + $0x44] ss:$8 sps:$4 sm:$0xff]  }
   0xc   :  { %305 = vmatprep.subr.bf16.mxu0 %v1064_v6  ;;  %v1090_v33 = vld [vmem:[%s1743_s1 + $0xb0] ss:$8 sps:$4 sm:$0xff]   ;;  %v1127_v34 = vld [vmem:[%s1745_s3 + $0x40] ss:$8 sps:$4 sm:$0xff]   ;;  %v1132_v35 = vld [vmem:[%s1745_s3 + $0x54] ss:$8 sps:$4 sm:$0xff]  }
   0xd   :  { %1047 = vmatpush1.bf16.msra.mxu1 %v1118_v23  ;;  %v1091_v36 = vld [vmem:[%s1744_s0] ss:$8 sps:$4 sm:$0xff]   ;;  %v1094_v37 = vld [vmem:[%s1744_s0 + $0x14] ss:$8 sps:$4 sm:$0xff]   ;;  %v1130_v38 = vld [vmem:[%s1745_s3 + $0x50] ss:$8 sps:$4 sm:$0xff]  }
   0xe   :  { %1040 = vmatprep.subr.bf16.mxu1 %v1123_v24  ;;  %v1096_v39 = vld [vmem:[%s1744_s0 + $0x10] ss:$8 sps:$4 sm:$0xff]   ;;  %v1097_v40 = vld [vmem:[%s1744_s0 + $0x24] ss:$8 sps:$4 sm:$0xff]   ;;  %v1099_v41 = vld [vmem:[%s1744_s0 + $0x20] ss:$8 sps:$4 sm:$0xff]  }
   0xf   :  { %306 = vmatpush1.bf16.msra.mxu0 %v1066_v7  ;;  %v1100_v42 = vld [vmem:[%s1744_s0 + $0x34] ss:$8 sps:$4 sm:$0xff]   ;;  %v1102_v43 = vld [vmem:[%s1744_s0 + $0x30] ss:$8 sps:$4 sm:$0xff]   ;;  %v1103_v44 = vld [vmem:[%s1744_s0 + $0x44] ss:$8 sps:$4 sm:$0xff]  }
  0x10   :  { %307 = vmatprep.subr.bf16.mxu0 %v1067_v8  ;;  %v1105_v45 = vld [vmem:[%s1744_s0 + $0x40] ss:$8 sps:$4 sm:$0xff]   ;;  %v1106_v46 = vld [vmem:[%s1744_s0 + $0x54] ss:$8 sps:$4 sm:$0xff]   ;;  %v1108_v47 = vld [vmem:[%s1744_s0 + $0x50] ss:$8 sps:$4 sm:$0xff]  }
  0x11   :  { %1048 = vmatpush1.bf16.msra.mxu1 %v1121_v27  ;;  %v1109_v48 = vld [vmem:[%s1744_s0 + $0x64] ss:$8 sps:$4 sm:$0xff]   ;;  %v1111_v49 = vld [vmem:[%s1744_s0 + $0x60] ss:$8 sps:$4 sm:$0xff]   ;;  %v1112_v50 = vld [vmem:[%s1744_s0 + $0x74] ss:$8 sps:$4 sm:$0xff]  }
  0x12   :  { %1041 = vmatprep.subr.bf16.mxu1 %v1126_v28  ;;  %v1114_v51 = vld [vmem:[%s1744_s0 + $0x70] ss:$8 sps:$4 sm:$0xff]   ;;  %v1135_v52 = vld [vmem:[%s1745_s3 + $0x64] ss:$8 sps:$4 sm:$0xff]   ;;  %v1133_v53 = vld [vmem:[%s1745_s3 + $0x60] ss:$8 sps:$4 sm:$0xff]  }
  0x13   :  { %308 = vmatpush1.bf16.msra.mxu0 %v1069_v9  ;;  %v1138_v54 = vld [vmem:[%s1745_s3 + $0x74] ss:$8 sps:$4 sm:$0xff]   ;;  %v1136_v55 = vld [vmem:[%s1745_s3 + $0x70] ss:$8 sps:$4 sm:$0xff]   ;;  %v1139_v57 = vld [vmem:[%s1746_s4] sm:$0xff]   ;;  %v1411_v59 = vshrl.u32 %v72_v58, 7 }
  0x14   :  { %309 = vmatprep.subr.bf16.mxu0 %v1070_v10  ;;  %v70_v61 = vld [vmem:[%s1747_s2] sm:$0x3] }
  0x15   :  { %1049 = vmatpush1.bf16.msra.mxu1 %v1124_v31  ;;  %v74_v60 = vsub.s32 0, %v1411_v59  ;;  %v78_v62 = vsub.s32 1, %v1411_v59 }
  0x16   :  { %1042 = vmatprep.subr.bf16.mxu1 %v1129_v32 }
  0x17   :  { %310 = vmatpush1.bf16.msra.mxu0 %v1072_v12  ;;  %v1420_v63 = vrot.slane %v70_v61, %v74_v60  ;;  %v1424_v0 = vrot.slane %v70_v61, %v78_v62 }
  0x18   :  { %311 = vmatprep.subr.bf16.mxu0 %v1073_v13 }
  0x19   :  { %1050 = vmatpush1.bf16.msra.mxu1 %v1127_v34 }
  0x1a   :  { %1043 = vmatprep.subr.bf16.mxu1 %v1132_v35 }
  0x1b   :  { %312 = vmatpush1.bf16.msra.mxu0 %v1075_v14 }
  0x1c   :  { %313 = vmatprep.subr.bf16.mxu0 %v1076_v15 }
  0x1d   :  { %1051 = vmatpush1.bf16.msra.mxu1 %v1130_v38 }
  0x1e   :  { %1044 = vmatprep.subr.bf16.mxu1 %v1135_v52 }
  0x1f   :  { %314 = vmatpush1.bf16.msra.mxu0 %v1078_v16 }
  0x20   :  { %315 = vmatprep.subr.bf16.mxu0 %v1079_v17 }
  0x21   :  { %1052 = vmatpush1.bf16.msra.mxu1 %v1133_v53 }
  0x22   :  { %1045 = vmatprep.subr.bf16.mxu1 %v1138_v54 }
  0x23   :  { %316 = vmatpush1.bf16.msra.mxu0 %v1081_v21 }
  0x24   :  { %317 = vmatprep.subr.bf16.mxu0 %v1082_v22 }
  0x25   :  { %1053 = vmatpush1.bf16.msra.mxu1 %v1136_v55 }
  0x26   :  { %1006 = vmatprep.subr.bf16.mxu1 %v1139_v57 }
  0x27   :  { %318 = vmatpush1.bf16.msra.mxu0 %v1084_v25 }
  0x28   :  { %319 = vmatprep.subr.bf16.mxu0 %v1085_v26  ;;  %v1140_v26 = vld [vmem:[%s1746_s4 + $0x8] sm:$0xff]  }
  0x2b   :  { %320 = vmatpush1.bf16.msra.mxu0 %v1087_v29 }
  0x2c   :  { %321 = vmatprep.subr.bf16.mxu0 %v1088_v30 }
  0x2f   :  { %322 = vmatpush1.bf16.msra.mxu0 %v1090_v33 }
  0x30   :  { %576 = vmatprep.subr.bf16.mxu0 %v1117_v18 }
  0x32   :  { %332 = vmatmul.mubr.bf16.vlgmr.msra.gmra.mrb[0].mxu0 %v1091_v36 }
  0x33   :  { %958 = vmatprep.mubr.msk.bf16.mxu0 %vm274_vm0, %v1094_v37  ;;  %577 = vmatpush1.bf16.msra.mxu0 %v1115_v19 }
  0x34   :  { %578 = vmatprep.subr.bf16.mxu0 %v1120_v20 }
  0x37   :  { %579 = vmatpush1.bf16.msra.mxu0 %v1118_v23 }
  0x38   :  { %580 = vmatprep.subr.bf16.mxu0 %v1123_v24 }
  0x3a   :  { %342 = vmatmul.mubr.bf16.gmra.mrb[4].mxu0 %v1096_v39 }
  0x3b   :  { %959 = vmatprep.mubr.msk.bf16.mxu0 %vm274_vm0, %v1097_v40  ;;  %581 = vmatpush1.bf16.msra.mxu0 %v1121_v27 }
  0x3c   :  { %582 = vmatprep.subr.bf16.mxu0 %v1126_v28 }
  0x3f   :  { %583 = vmatpush1.bf16.msra.mxu0 %v1124_v31 }
  0x40   :  { %584 = vmatprep.subr.bf16.mxu0 %v1129_v32 }
  0x42   :  { %352 = vmatmul.mubr.bf16.gmra.mrb[8].mxu0 %v1099_v41  ;;  %v1142_v41 = vld [vmem:[%s1746_s4 + $0x18] sm:$0xff]  }
  0x43   :  { %960 = vmatprep.mubr.msk.bf16.mxu0 %vm274_vm0, %v1100_v42  ;;  %585 = vmatpush1.bf16.msra.mxu0 %v1127_v34  ;;  %v1141_v34 = vld [vmem:[%s1746_s4 + $0x10] sm:$0xff]  }
  0x44   :  { %586 = vmatprep.subr.bf16.mxu0 %v1132_v35 }
  0x47   :  { %587 = vmatpush1.bf16.msra.mxu0 %v1130_v38 }
  0x48   :  { %588 = vmatprep.subr.bf16.mxu0 %v1135_v52 }
  0x4a   :  { %362 = vmatmul.mubr.bf16.gmra.mrb[12].mxu0 %v1102_v43 }
  0x4b   :  { %961 = vmatprep.mubr.msk.bf16.mxu0 %vm274_vm0, %v1103_v44  ;;  %589 = vmatpush1.bf16.msra.mxu0 %v1133_v53 }
  0x4c   :  { %590 = vmatprep.subr.bf16.mxu0 %v1138_v54 }
  0x4f   :  { %591 = vmatpush1.bf16.msra.mxu0 %v1136_v55 }
  0x52   :  { %372 = vmatmul.mubr.bf16.gmra.mrb[16].mxu0 %v1105_v45 }
  0x53   :  { %962 = vmatprep.mubr.msk.bf16.mxu0 %vm274_vm0, %v1106_v46 }
  0x5a   :  { %382 = vmatmul.mubr.bf16.gmra.mrb[20].mxu0 %v1108_v47 }
  0x5b   :  { %963 = vmatprep.mubr.msk.bf16.mxu0 %vm274_vm0, %v1109_v48 }
  0x62   :  { %392 = vmatmul.mubr.bf16.gmra.mrb[24].mxu0 %v1111_v49  ;;  %v1143_v49 = vld [vmem:[%s1746_s4 + $0x20] sm:$0xff]  }
  0x63   :  { %964 = vmatprep.mubr.msk.bf16.mxu0 %vm274_vm0, %v1112_v50 }
  0x6a   :  { %402 = vmatmul.mubr.bf16.gmra.mrb[28].mxu0 %v1114_v51 }
  0x6b   :  { %608 = vmatprep.mubr.bf16.mxu0 %v1179_v56 }
 0x105   :  { %v333_v1 = vpop.f32.mrb[0].mxu0 }
 0x106   :  { %v334_v2 = vadd.f32 %v333_v1, %v1420_v63  ;;  %v335_v3 = vpop.f32.mrb[1].mxu0 }
 0x107   :  { %v336_v4 = vadd.f32 %v335_v3, %v1424_v0  ;;  %v337_v5 = vpop.f32.mrb[2].mxu0 }
 0x108   :  { %1147 = vtanh.f32 %v334_v2  ;;  %v338_v6 = vadd.f32 %v337_v5, %v1420_v63  ;;  %v339_v7 = vpop.f32.mrb[3].mxu0 }
 0x109   :  { %v340_v8 = vadd.f32 %v339_v7, %v1424_v0  ;;  %v428_v9 = vmax.f32 %v336_v4, 0.0 }
 0x10a   :  { %1149 = vtanh.f32 %v338_v6  ;;  %v1145_v6 = vld [vmem:[%s1746_s4 + $0x30] sm:$0xff]  }
 0x10b   :  { %v429_v10 = vmax.f32 %v340_v8, 0.0 }
 0x10d   :  { %v1430_v11 = vpack.c.bf16 %v429_v10, %v428_v9  ;;  %v343_v12 = vpop.f32.mrb[4].mxu0 }
 0x10e   :  { %v344_v13 = vadd.f32 %v343_v12, %v1420_v63  ;;  %v345_v14 = vpop.f32.mrb[5].mxu0 }
 0x10f   :  { %v346_v15 = vadd.f32 %v345_v14, %v1424_v0  ;;  %v347_v16 = vpop.f32.mrb[6].mxu0  ;;  %609 = vmatmul.mubr.bf16.vlgmr.msra.gmra.mrb[32].mxu0 %v1430_v11  ;;  %v1146_v14 = vld [vmem:[%s1746_s4 + $0x38] sm:$0xff]  }
 0x110   :  { %1151 = vtanh.f32 %v344_v13  ;;  %v348_v17 = vadd.f32 %v347_v16, %v1420_v63  ;;  %v349_v18 = vpop.f32.mrb[7].mxu0 }
 0x111   :  { %v350_v19 = vadd.f32 %v349_v18, %v1424_v0  ;;  %v430_v21 = vmax.f32 %v346_v15, 0.0 }
 0x112   :  { %v1148_v20 = vpop.eup %1147  ;;  %1153 = vtanh.f32 %v348_v17 }
 0x113   :  { %444 = vst [vmem:[%s1748_s7] sm:$0xff] %v1148_v20  ;;  %v431_v22 = vmax.f32 %v350_v19, 0.0 }
 0x114   :  { %v1150_v23 = vpop.eup %1149 }
 0x115   :  { %445 = vst [vmem:[%s1748_s7 + $0x8] sm:$0xff] %v1150_v23  ;;  %v1443_v24 = vpack.c.bf16 %v431_v22, %v430_v21  ;;  %v353_v25 = vpop.f32.mrb[8].mxu0 }
 0x116   :  { %v354_v27 = vadd.f32 %v353_v25, %v1420_v63  ;;  %v355_v28 = vpop.f32.mrb[9].mxu0 }
 0x117   :  { %v356_v29 = vadd.f32 %v355_v28, %v1424_v0  ;;  %v357_v30 = vpop.f32.mrb[10].mxu0  ;;  %619 = vmatmul.mubr.bf16.vlgmr.msra.gmra.mrb[0].mxu1 %v1443_v24 }
 0x118   :  { %1155 = vtanh.f32 %v354_v27  ;;  %v358_v31 = vadd.f32 %v357_v30, %v1420_v63  ;;  %1007 = vmatpush3.bf16.msra.mxu1 %v1139_v57  ;;  %v359_v32 = vpop.f32.mrb[11].mxu0  ;;  %628 = vmatprep.mubr.bf16.mxu1 %v1179_v56  ;;  %v1144_v57 = vld [vmem:[%s1746_s4 + $0x28] sm:$0xff]  }
 0x119   :  { %v360_v33 = vadd.f32 %v359_v32, %v1424_v0  ;;  %1008 = vmatprep.subr.bf16.mxu1 %v1140_v26  ;;  %v432_v36 = vmax.f32 %v356_v29, 0.0 }
 0x11a   :  { %v1152_v35 = vpop.eup %1151  ;;  %1157 = vtanh.f32 %v358_v31 }
 0x11b   :  { %446 = vst [vmem:[%s1748_s7 + $0x10] sm:$0xff] %v1152_v35  ;;  %v433_v37 = vmax.f32 %v360_v33, 0.0 }
 0x11c   :  { %v1154_v38 = vpop.eup %1153  ;;  %1009 = vmatpush3.bf16.msra.mxu1 %v1140_v26 }
 0x11d   :  { %447 = vst [vmem:[%s1748_s7 + $0x18] sm:$0xff] %v1154_v38  ;;  %v1463_v39 = vpack.c.bf16 %v433_v37, %v432_v36  ;;  %v363_v40 = vpop.f32.mrb[12].mxu0  ;;  %1010 = vmatprep.subr.bf16.mxu1 %v1141_v34 }
 0x11e   :  { %v364_v42 = vadd.f32 %v363_v40, %v1420_v63  ;;  %v365_v43 = vpop.f32.mrb[13].mxu0 }
 0x11f   :  { %v366_v44 = vadd.f32 %v365_v43, %v1424_v0  ;;  %v367_v45 = vpop.f32.mrb[14].mxu0  ;;  %629 = vmatmul.mubr.bf16.gmra.mrb[4].mxu1 %v1463_v39 }
 0x120   :  { %1159 = vtanh.f32 %v364_v42  ;;  %v368_v46 = vadd.f32 %v367_v45, %v1420_v63  ;;  %v369_v47 = vpop.f32.mrb[15].mxu0  ;;  %1011 = vmatpush3.bf16.msra.mxu1 %v1141_v34  ;;  %638 = vmatprep.mubr.bf16.mxu1 %v1179_v56 }
 0x121   :  { %v370_v48 = vadd.f32 %v369_v47, %v1424_v0  ;;  %1012 = vmatprep.subr.bf16.mxu1 %v1142_v41  ;;  %v434_v51 = vmax.f32 %v366_v44, 0.0 }
 0x122   :  { %v1156_v50 = vpop.eup %1155  ;;  %1161 = vtanh.f32 %v368_v46 }
 0x123   :  { %448 = vst [vmem:[%s1748_s7 + $0x20] sm:$0xff] %v1156_v50  ;;  %v435_v52 = vmax.f32 %v370_v48, 0.0 }
 0x124   :  { %v1158_v53 = vpop.eup %1157  ;;  %1013 = vmatpush3.bf16.msra.mxu1 %v1142_v41 }
 0x125   :  { %449 = vst [vmem:[%s1748_s7 + $0x28] sm:$0xff] %v1158_v53  ;;  %v1483_v54 = vpack.c.bf16 %v435_v52, %v434_v51  ;;  %v373_v55 = vpop.f32.mrb[16].mxu0  ;;  %1014 = vmatprep.subr.bf16.mxu1 %v1143_v49 }
 0x126   :  { %v374_v58 = vadd.f32 %v373_v55, %v1420_v63  ;;  %v375_v61 = vpop.f32.mrb[17].mxu0 }
 0x127   :  { %v376_v1 = vadd.f32 %v375_v61, %v1424_v0  ;;  %v377_v2 = vpop.f32.mrb[18].mxu0  ;;  %639 = vmatmul.mubr.bf16.gmra.mrb[8].mxu1 %v1483_v54 }
 0x128   :  { %1163 = vtanh.f32 %v374_v58  ;;  %v378_v3 = vadd.f32 %v377_v2, %v1420_v63  ;;  %v379_v4 = vpop.f32.mrb[19].mxu0  ;;  %648 = vmatprep.mubr.bf16.mxu1 %v1179_v56  ;;  %1015 = vmatpush3.bf16.msra.mxu1 %v1143_v49 }
 0x129   :  { %v380_v5 = vadd.f32 %v379_v4, %v1424_v0  ;;  %1016 = vmatprep.subr.bf16.mxu1 %v1144_v57  ;;  %v436_v8 = vmax.f32 %v376_v1, 0.0 }
 0x12a   :  { %v1160_v7 = vpop.eup %1159  ;;  %1165 = vtanh.f32 %v378_v3 }
 0x12b   :  { %450 = vst [vmem:[%s1748_s7 + $0x30] sm:$0xff] %v1160_v7  ;;  %v437_v9 = vmax.f32 %v380_v5, 0.0 }
 0x12c   :  { %v1162_v10 = vpop.eup %1161  ;;  %1017 = vmatpush3.bf16.msra.mxu1 %v1144_v57 }
 0x12d   :  { %451 = vst [vmem:[%s1748_s7 + $0x38] sm:$0xff] %v1162_v10  ;;  %v1503_v12 = vpack.c.bf16 %v437_v9, %v436_v8  ;;  %v383_v13 = vpop.f32.mrb[20].mxu0  ;;  %1018 = vmatprep.subr.bf16.mxu1 %v1145_v6 }
 0x12e   :  { %v384_v15 = vadd.f32 %v383_v13, %v1420_v63  ;;  %v385_v16 = vpop.f32.mrb[21].mxu0 }
 0x12f   :  { %v386_v17 = vadd.f32 %v385_v16, %v1424_v0  ;;  %v387_v18 = vpop.f32.mrb[22].mxu0  ;;  %649 = vmatmul.mubr.bf16.gmra.mrb[12].mxu1 %v1503_v12 }
 0x130   :  { %1167 = vtanh.f32 %v384_v15  ;;  %v388_v19 = vadd.f32 %v387_v18, %v1420_v63  ;;  %v389_v20 = vpop.f32.mrb[23].mxu0  ;;  %658 = vmatprep.mubr.bf16.mxu1 %v1179_v56  ;;  %1019 = vmatpush3.bf16.msra.mxu1 %v1145_v6 }
 0x131   :  { %v390_v21 = vadd.f32 %v389_v20, %v1424_v0  ;;  %1020 = vmatprep.subr.bf16.mxu1 %v1146_v14  ;;  %v438_v23 = vmax.f32 %v386_v17, 0.0 }
 0x132   :  { %v1164_v22 = vpop.eup %1163  ;;  %1169 = vtanh.f32 %v388_v19 }
 0x133   :  { %452 = vst [vmem:[%s1748_s7 + $0x40] sm:$0xff] %v1164_v22  ;;  %v439_v25 = vmax.f32 %v390_v21, 0.0 }
 0x134   :  { %v1166_v26 = vpop.eup %1165  ;;  %1021 = vmatpush3.bf16.msra.mxu1 %v1146_v14 }
 0x135   :  { %453 = vst [vmem:[%s1748_s7 + $0x48] sm:$0xff] %v1166_v26  ;;  %v465_v27 = vpack.c.bf16 %v439_v25, %v438_v23  ;;  %v393_v28 = vpop.f32.mrb[24].mxu0 }
 0x136   :  { %v394_v29 = vadd.f32 %v393_v28, %v1420_v63  ;;  %v395_v30 = vpop.f32.mrb[25].mxu0 }
 0x137   :  { %v396_v31 = vadd.f32 %v395_v30, %v1424_v0  ;;  %v397_v32 = vpop.f32.mrb[26].mxu0  ;;  %659 = vmatmul.mubr.bf16.gmra.mrb[16].mxu1 %v465_v27 }
 0x138   :  { %1171 = vtanh.f32 %v394_v29  ;;  %v398_v33 = vadd.f32 %v397_v32, %v1420_v63  ;;  %v399_v34 = vpop.f32.mrb[27].mxu0  ;;  %668 = vmatprep.mubr.bf16.mxu1 %v1179_v56 }
 0x139   :  { %v400_v35 = vadd.f32 %v399_v34, %v1424_v0  ;;  %v440_v37 = vmax.f32 %v396_v31, 0.0 }
 0x13a   :  { %v1168_v36 = vpop.eup %1167  ;;  %1173 = vtanh.f32 %v398_v33 }
 0x13b   :  { %454 = vst [vmem:[%s1748_s7 + $0x50] sm:$0xff] %v1168_v36  ;;  %v441_v38 = vmax.f32 %v400_v35, 0.0 }
 0x13c   :  { %v1170_v40 = vpop.eup %1169 }
 0x13d   :  { %455 = vst [vmem:[%s1748_s7 + $0x58] sm:$0xff] %v1170_v40  ;;  %v466_v41 = vpack.c.bf16 %v441_v38, %v440_v37  ;;  %v403_v42 = vpop.f32.mrb[28].mxu0 }
 0x13e   :  { %v404_v43 = vadd.f32 %v403_v42, %v1420_v63  ;;  %v405_v44 = vpop.f32.mrb[29].mxu0 }
 0x13f   :  { %v406_v45 = vadd.f32 %v405_v44, %v1424_v0  ;;  %v407_v46 = vpop.f32.mrb[30].mxu0  ;;  %669 = vmatmul.mubr.bf16.gmra.mrb[20].mxu1 %v466_v41 }
 0x140   :  { %1175 = vtanh.f32 %v404_v43  ;;  %v408_v47 = vadd.f32 %v407_v46, %v1420_v63  ;;  %v409_v48 = vpop.f32.mrb[31].mxu0  ;;  %678 = vmatprep.mubr.bf16.mxu1 %v1179_v56 }
 0x141   :  { %v410_v49 = vadd.f32 %v409_v48, %v1424_v0  ;;  %v442_v51 = vmax.f32 %v406_v45, 0.0  ;;  %v484_v0 = vld [vmem:[%s1749_s5] sm:$0x3] }
 0x142   :  { %v1172_v50 = vpop.eup %1171  ;;  %1177 = vtanh.f32 %v408_v47 }
 0x143   :  { %456 = vst [vmem:[%s1748_s7 + $0x60] sm:$0xff] %v1172_v50  ;;  %v443_v52 = vmax.f32 %v410_v49, 0.0 }
 0x144   :  { %v1174_v53 = vpop.eup %1173 }
 0x145   :  { %457 = vst [vmem:[%s1748_s7 + $0x68] sm:$0xff] %v1174_v53  ;;  %v467_v55 = vpack.c.bf16 %v443_v52, %v442_v51 }
 0x147   :  { %679 = vmatmul.mubr.bf16.gmra.mrb[24].mxu1 %v467_v55 }
 0x148   :  { %1022 = vmatprep.mubr.bf16.mxu1 %v1430_v11  ;;  %v1558_v11 = vrot.slane %v484_v0, %v74_v60 }
 0x14a   :  { %v1176_v56 = vpop.eup %1175 }
 0x14b   :  { %458 = vst [vmem:[%s1748_s7 + $0x70] sm:$0xff] %v1176_v56 }
 0x14c   :  { %v1178_v63 = vpop.eup %1177 }
 0x14d   :  { %459 = vst [vmem:[%s1748_s7 + $0x78] sm:$0xff] %v1178_v63 }
 0x14f   :  { %1023 = vmatmul.mubr.bf16.vlgmr.msra.gmra.mrb[28].mxu1 %v1443_v24  ;;  %v1562_v24 = vrot.slane %v484_v0, %v78_v62 }
 0x150   :  { %1026 = vmatprep.mubr.bf16.mxu1 %v1463_v39 }
 0x157   :  { %1027 = vmatmul.mubr.bf16.gmra.mrb[32].mxu1 %v1483_v54 }
 0x158   :  { %1030 = vmatprep.mubr.bf16.mxu1 %v1503_v12 }
 0x15f   :  { %1031 = vmatmul.mubr.bf16.gmra.mrb[36].mxu1 %v465_v27 }
 0x160   :  { %1034 = vmatprep.mubr.bf16.mxu1 %v466_v41 }
 0x167   :  { %1035 = vmatmul.mubr.bf16.gmra.mrb[40].mxu1 %v467_v55 }
 0x1e2   :  { %v610_v39 = vpop.f32.mrb[32].mxu0 }
 0x1e3   :  { %v611_v54 = vadd.f32 %v610_v39, %v1558_v11  ;;  %v612_v57 = vpop.f32.mrb[33].mxu0 }
 0x1e4   :  { %v613_v58 = vadd.f32 %v612_v57, %v1562_v24  ;;  %v614_v61 = vpop.f32.mrb[34].mxu0  ;;  %v981_v57 = vld [vmem:[%s1751_s6] ss:$0 sm:$0xff] }
 0x1e5   :  { %689 = vst [vmem:[%s1750_s8] sm:$0xff] %v611_v54  ;;  %v615_v1 = vadd.f32 %v614_v61, %v1558_v11  ;;  %v616_v2 = vpop.f32.mrb[35].mxu0 }
 0x1e6   :  { %690 = vst [vmem:[%s1750_s8 + $0x8] sm:$0xff] %v613_v58  ;;  %v617_v59 = vadd.f32 %v616_v2, %v1562_v24 }
 0x1e7   :  { %691 = vst [vmem:[%s1750_s8 + $0x10] sm:$0xff] %v615_v1 }
 0x1e8   :  { %692 = vst [vmem:[%s1750_s8 + $0x18] sm:$0xff] %v617_v59 }
 0x1ea   :  { %v620_v60 = vpop.f32.mrb[0].mxu1 }
 0x1eb   :  { %v621_v62 = vadd.f32 %v620_v60, %v1558_v11  ;;  %v622_v3 = vpop.f32.mrb[1].mxu1 }
 0x1ec   :  { %v623_v4 = vadd.f32 %v622_v3, %v1562_v24  ;;  %v624_v5 = vpop.f32.mrb[2].mxu1 }
 0x1ed   :  { %693 = vst [vmem:[%s1750_s8 + $0x20] sm:$0xff] %v621_v62  ;;  %v625_v6 = vadd.f32 %v624_v5, %v1558_v11  ;;  %v626_v7 = vpop.f32.mrb[3].mxu1 }
 0x1ee   :  { %694 = vst [vmem:[%s1750_s8 + $0x28] sm:$0xff] %v623_v4  ;;  %v627_v8 = vadd.f32 %v626_v7, %v1562_v24 }
 0x1ef   :  { %695 = vst [vmem:[%s1750_s8 + $0x30] sm:$0xff] %v625_v6 }
 0x1f0   :  { %696 = vst [vmem:[%s1750_s8 + $0x38] sm:$0xff] %v627_v8 }
 0x1f2   :  { %v630_v9 = vpop.f32.mrb[4].mxu1 }
 0x1f3   :  { %v631_v10 = vadd.f32 %v630_v9, %v1558_v11  ;;  %v632_v12 = vpop.f32.mrb[5].mxu1 }
 0x1f4   :  { %v633_v13 = vadd.f32 %v632_v12, %v1562_v24  ;;  %v634_v14 = vpop.f32.mrb[6].mxu1 }
 0x1f5   :  { %697 = vst [vmem:[%s1750_s8 + $0x40] sm:$0xff] %v631_v10  ;;  %v635_v15 = vadd.f32 %v634_v14, %v1558_v11  ;;  %v636_v16 = vpop.f32.mrb[7].mxu1 }
 0x1f6   :  { %698 = vst [vmem:[%s1750_s8 + $0x48] sm:$0xff] %v633_v13  ;;  %v637_v17 = vadd.f32 %v636_v16, %v1562_v24 }
 0x1f7   :  { %699 = vst [vmem:[%s1750_s8 + $0x50] sm:$0xff] %v635_v15 }
 0x1f8   :  { %700 = vst [vmem:[%s1750_s8 + $0x58] sm:$0xff] %v637_v17 }
 0x1fa   :  { %v640_v18 = vpop.f32.mrb[8].mxu1 }
 0x1fb   :  { %v641_v19 = vadd.f32 %v640_v18, %v1558_v11  ;;  %v642_v20 = vpop.f32.mrb[9].mxu1 }
 0x1fc   :  { %v643_v21 = vadd.f32 %v642_v20, %v1562_v24  ;;  %v644_v22 = vpop.f32.mrb[10].mxu1 }
 0x1fd   :  { %701 = vst [vmem:[%s1750_s8 + $0x60] sm:$0xff] %v641_v19  ;;  %v645_v23 = vadd.f32 %v644_v22, %v1558_v11  ;;  %v646_v25 = vpop.f32.mrb[11].mxu1 }
 0x1fe   :  { %702 = vst [vmem:[%s1750_s8 + $0x68] sm:$0xff] %v643_v21  ;;  %v647_v26 = vadd.f32 %v646_v25, %v1562_v24 }
 0x1ff   :  { %703 = vst [vmem:[%s1750_s8 + $0x70] sm:$0xff] %v645_v23 }
 0x200   :  { %704 = vst [vmem:[%s1750_s8 + $0x78] sm:$0xff] %v647_v26 }
 0x202   :  { %v650_v27 = vpop.f32.mrb[12].mxu1 }
 0x203   :  { %v651_v28 = vadd.f32 %v650_v27, %v1558_v11  ;;  %v652_v29 = vpop.f32.mrb[13].mxu1 }
 0x204   :  { %v653_v30 = vadd.f32 %v652_v29, %v1562_v24  ;;  %v654_v31 = vpop.f32.mrb[14].mxu1 }
 0x205   :  { %705 = vst [vmem:[%s1750_s8 + $0x80] sm:$0xff] %v651_v28  ;;  %v655_v32 = vadd.f32 %v654_v31, %v1558_v11  ;;  %v656_v33 = vpop.f32.mrb[15].mxu1 }
 0x206   :  { %706 = vst [vmem:[%s1750_s8 + $0x88] sm:$0xff] %v653_v30  ;;  %v657_v34 = vadd.f32 %v656_v33, %v1562_v24 }
 0x207   :  { %707 = vst [vmem:[%s1750_s8 + $0x90] sm:$0xff] %v655_v32 }
 0x208   :  { %708 = vst [vmem:[%s1750_s8 + $0x98] sm:$0xff] %v657_v34 }
 0x20a   :  { %v660_v35 = vpop.f32.mrb[16].mxu1 }
 0x20b   :  { %v661_v36 = vadd.f32 %v660_v35, %v1558_v11  ;;  %v662_v37 = vpop.f32.mrb[17].mxu1 }
 0x20c   :  { %v663_v38 = vadd.f32 %v662_v37, %v1562_v24  ;;  %v664_v40 = vpop.f32.mrb[18].mxu1 }
 0x20d   :  { %709 = vst [vmem:[%s1750_s8 + $0xa0] sm:$0xff] %v661_v36  ;;  %v665_v41 = vadd.f32 %v664_v40, %v1558_v11  ;;  %v666_v42 = vpop.f32.mrb[19].mxu1 }
 0x20e   :  { %710 = vst [vmem:[%s1750_s8 + $0xa8] sm:$0xff] %v663_v38  ;;  %v667_v43 = vadd.f32 %v666_v42, %v1562_v24 }
 0x20f   :  { %711 = vst [vmem:[%s1750_s8 + $0xb0] sm:$0xff] %v665_v41 }
 0x210   :  { %712 = vst [vmem:[%s1750_s8 + $0xb8] sm:$0xff] %v667_v43 }
 0x212   :  { %v670_v44 = vpop.f32.mrb[20].mxu1 }
 0x213   :  { %v671_v45 = vadd.f32 %v670_v44, %v1558_v11  ;;  %v672_v46 = vpop.f32.mrb[21].mxu1 }
 0x214   :  { %v673_v47 = vadd.f32 %v672_v46, %v1562_v24  ;;  %v674_v48 = vpop.f32.mrb[22].mxu1 }
 0x215   :  { %713 = vst [vmem:[%s1750_s8 + $0xc0] sm:$0xff] %v671_v45  ;;  %v675_v49 = vadd.f32 %v674_v48, %v1558_v11  ;;  %v676_v50 = vpop.f32.mrb[23].mxu1 }
 0x216   :  { %714 = vst [vmem:[%s1750_s8 + $0xc8] sm:$0xff] %v673_v47  ;;  %v677_v51 = vadd.f32 %v676_v50, %v1562_v24 }
 0x217   :  { %715 = vst [vmem:[%s1750_s8 + $0xd0] sm:$0xff] %v675_v49 }
 0x218   :  { %716 = vst [vmem:[%s1750_s8 + $0xd8] sm:$0xff] %v677_v51 }
 0x21a   :  { %v680_v52 = vpop.f32.mrb[24].mxu1 }
 0x21b   :  { %v681_v53 = vadd.f32 %v680_v52, %v1558_v11  ;;  %v682_v55 = vpop.f32.mrb[25].mxu1 }
 0x21c   :  { %v683_v56 = vadd.f32 %v682_v55, %v1562_v24  ;;  %v684_v63 = vpop.f32.mrb[26].mxu1 }
 0x21d   :  { %717 = vst [vmem:[%s1750_s8 + $0xe0] sm:$0xff] %v681_v53  ;;  %v685_v0 = vadd.f32 %v684_v63, %v1558_v11  ;;  %v686_v39 = vpop.f32.mrb[27].mxu1 }
 0x21e   :  { %718 = vst [vmem:[%s1750_s8 + $0xe8] sm:$0xff] %v683_v56  ;;  %v687_v54 = vadd.f32 %v686_v39, %v1562_v24 }
 0x21f   :  { %719 = vst [vmem:[%s1750_s8 + $0xf0] sm:$0xff] %v685_v0 }
 0x220   :  { %720 = vst [vmem:[%s1750_s8 + $0xf8] sm:$0xff] %v687_v54 }
 0x222   :  { %v1024_v11 = vpop.f32.mrb[28].mxu1 }
 0x223   :  { %v835_v58 = vadd.f32 %v1024_v11, %v981_v57  ;;  %v826_v61 = vpop.f32.mrb[29].mxu1 }
 0x224   :  { %v827_v1 = vadd.f32 %v981_v57, %v826_v61  ;;  %v1025_v2 = vpop.f32.mrb[30].mxu1 }
 0x225   :  { %891 = vst [vmem:[%s1752_s9 + $0x10] sm:$0xff] %v835_v58  ;;  %v838_v24 = vadd.f32 %v1025_v2, %v981_v57  ;;  %v829_v59 = vpop.f32.mrb[31].mxu1 }
 0x226   :  { %889 = vst [vmem:[%s1752_s9] sm:$0xff] %v827_v1  ;;  %v830_v60 = vadd.f32 %v981_v57, %v829_v59 }
 0x227   :  { %892 = vst [vmem:[%s1752_s9 + $0x18] sm:$0xff] %v838_v24 }
 0x228   :  { %890 = vst [vmem:[%s1752_s9 + $0x8] sm:$0xff] %v830_v60 }
 0x22a   :  { %v1028_v62 = vpop.f32.mrb[32].mxu1 }
 0x22b   :  { %v851_v3 = vadd.f32 %v1028_v62, %v981_v57  ;;  %v842_v4 = vpop.f32.mrb[33].mxu1 }
 0x22c   :  { %v843_v5 = vadd.f32 %v981_v57, %v842_v4  ;;  %v1029_v6 = vpop.f32.mrb[34].mxu1 }
 0x22d   :  { %895 = vst [vmem:[%s1752_s9 + $0x30] sm:$0xff] %v851_v3  ;;  %v854_v7 = vadd.f32 %v1029_v6, %v981_v57  ;;  %v845_v8 = vpop.f32.mrb[35].mxu1 }
 0x22e   :  { %893 = vst [vmem:[%s1752_s9 + $0x20] sm:$0xff] %v843_v5  ;;  %v846_v9 = vadd.f32 %v981_v57, %v845_v8 }
 0x22f   :  { %896 = vst [vmem:[%s1752_s9 + $0x38] sm:$0xff] %v854_v7 }
 0x230   :  { %894 = vst [vmem:[%s1752_s9 + $0x28] sm:$0xff] %v846_v9 }
 0x232   :  { %v1032_v10 = vpop.f32.mrb[36].mxu1 }
 0x233   :  { %v867_v12 = vadd.f32 %v1032_v10, %v981_v57  ;;  %v858_v13 = vpop.f32.mrb[37].mxu1 }
 0x234   :  { %v859_v14 = vadd.f32 %v981_v57, %v858_v13  ;;  %v1033_v15 = vpop.f32.mrb[38].mxu1 }
 0x235   :  { %899 = vst [vmem:[%s1752_s9 + $0x50] sm:$0xff] %v867_v12  ;;  %v870_v16 = vadd.f32 %v1033_v15, %v981_v57  ;;  %v861_v17 = vpop.f32.mrb[39].mxu1 }
 0x236   :  { %897 = vst [vmem:[%s1752_s9 + $0x40] sm:$0xff] %v859_v14  ;;  %v862_v18 = vadd.f32 %v981_v57, %v861_v17 }
 0x237   :  { %900 = vst [vmem:[%s1752_s9 + $0x58] sm:$0xff] %v870_v16 }
 0x238   :  { %898 = vst [vmem:[%s1752_s9 + $0x48] sm:$0xff] %v862_v18 }
 0x23a   :  { %v1036_v19 = vpop.f32.mrb[40].mxu1 }
 0x23b   :  { %v883_v20 = vadd.f32 %v1036_v19, %v981_v57  ;;  %v874_v21 = vpop.f32.mrb[41].mxu1 }
 0x23c   :  { %v875_v22 = vadd.f32 %v981_v57, %v874_v21  ;;  %v1037_v23 = vpop.f32.mrb[42].mxu1 }
 0x23d   :  { %903 = vst [vmem:[%s1752_s9 + $0x70] sm:$0xff] %v883_v20  ;;  %v886_v25 = vadd.f32 %v1037_v23, %v981_v57  ;;  %v877_v26 = vpop.f32.mrb[43].mxu1 }
 0x23e   :  { %901 = vst [vmem:[%s1752_s9 + $0x60] sm:$0xff] %v875_v22  ;;  %v878_v27 = vadd.f32 %v981_v57, %v877_v26 }
 0x23f   :  { %904 = vst [vmem:[%s1752_s9 + $0x78] sm:$0xff] %v886_v25 }
 0x240   :  { %902 = vst [vmem:[%s1752_s9 + $0x68] sm:$0xff] %v878_v27 }

// kernel: raft_forward.11
= control target key start
LH: loop header
LB: loop body
LE: loop exit
PB: predicated region body
PF: predicated region fallthrough
CT: control target
= control target key end

     0   :  { %s4079_s6 = smov 1   ;;  %s4080_s10 = smov 2   ;;  %s5295_s0 = inlined_call_operand.smem [shape: u32[30], index: -1, kind: input, shape index: {}] }
   0x1   :  { %s4120_s5 = sld [smem:[%s5295_s0]]   ;;  %s4081_s14 = smov 3  }
   0x2   :  { %s4125_s9 = sld [smem:[%s5295_s0 + %s4079_s6]]   ;;  %s4082_s18 = smov 4  }
   0x3   :  { %s4130_s13 = sld [smem:[%s5295_s0 + %s4080_s10]]   ;;  %s4083_s22 = smov 5  }
   0x4   :  { %s4135_s17 = sld [smem:[%s5295_s0 + %s4081_s14]]   ;;  %s4084_s26 = smov 6  }
   0x5   :  { %s4140_s21 = sld [smem:[%s5295_s0 + %s4082_s18]]   ;;  %s4085_s30 = smov 7  }
   0x6   :  { %s4145_s25 = sld [smem:[%s5295_s0 + %s4083_s22]]   ;;  %s4086_s4 = smov 8  }
   0x7   :  { %s4150_s29 = sld [smem:[%s5295_s0 + %s4084_s26]]   ;;  %s4087_s10 = smov 9  }
   0x8   :  { %s4155_s3 = sld [smem:[%s5295_s0 + %s4085_s30]]   ;;  %s4088_s15 = smov 10  }
   0x9   :  { %s4160_s8 = sld [smem:[%s5295_s0 + %s4086_s4]]   ;;  %s4089_s20 = smov 11  }
   0xa   :  { %5341 = sst [smem:[#allocation5_spill]] %s4135_s17  ;;  %s4090_s26 = smov 12  }
   0xb   :  { %5342 = sst [smem:[#allocation6_spill]] %s4140_s21  ;;  %s4091_s1 = smov 13  }
   0xc   :  { %5343 = sst [smem:[#allocation7_spill]] %s4145_s25  ;;  %s4092_s7 = smov 14  }
   0xd   :  { %s4165_s14 = sld [smem:[%s5295_s0 + %s4087_s10]]   ;;  %s4094_s22 = smov 16  }
   0xe   :  { %s4170_s19 = sld [smem:[%s5295_s0 + %s4088_s15]]   ;;  %s4093_s15 = smov 15  }
   0xf   :  { %s4175_s24 = sld [smem:[%s5295_s0 + %s4089_s20]]   ;;  %s4095_s28 = smov 17  }
  0x10   :  { %s4180_s30 = sld [smem:[%s5295_s0 + %s4090_s26]]  }
  0x11   :  { %s4185_s6 = sld [smem:[%s5295_s0 + %s4091_s1]]  }
  0x12   :  { %s4190_s12 = sld [smem:[%s5295_s0 + %s4092_s7]]   ;;  %s4096_s7 = smov 18  }
  0x13   :  { %s4195_s20 = sld [smem:[%s5295_s0 + %s4093_s15]]   ;;  %s4097_s15 = smov 19  }
  0x14   :  { %s4200_s27 = sld [smem:[%s5295_s0 + %s4094_s22]]   ;;  %s4098_s22 = smov 20  }
  0x15   :  { %s4205_s4 = sld [smem:[%s5295_s0 + %s4095_s28]]   ;;  %s4099_s28 = smov 21  }
  0x16   :  { %5344 = sst [smem:[#allocation8_spill]] %s4180_s30 }
  0x17   :  { %s4210_s25 = sld [smem:[%s5295_s0 + %s4096_s7]]   ;;  %s4100_s7 = smov 22  }
  0x18   :  { %s4215_s21 = sld [smem:[%s5295_s0 + %s4097_s15]]   ;;  %s4101_s15 = smov 23  }
  0x19   :  { %5345 = sst [smem:[#allocation9_spill]] %s4195_s20 }
  0x1a   :  { %5346 = sst [smem:[#allocation10_spill]] %s4200_s27 }
  0x1b   :  { %s4220_s17 = sld [smem:[%s5295_s0 + %s4098_s22]]   ;;  %s4102_s22 = smov 24  }
  0x1c   :  { %s4225_s20 = sld [smem:[%s5295_s0 + %s4099_s28]]   ;;  %s4103_s28 = smov 25  }
  0x1d   :  { %s4230_s27 = sld [smem:[%s5295_s0 + %s4100_s7]]   ;;  %s4104_s7 = smov 26  }
  0x1e   :  { %s4235_s30 = sld [smem:[%s5295_s0 + %s4101_s15]]   ;;  %s4105_s15 = smov 27  }
  0x21   :  { %5347 = sst [smem:[#allocation11_spill]] %s4220_s17 }
  0x22   :  { %5348 = sst [smem:[#allocation12_spill]] %s4225_s20 }
  0x23   :  { %5349 = sst [smem:[#allocation13_spill]] %s4230_s27 }
  0x24   :  { %5350 = sst [smem:[#allocation14_spill]] %s4235_s30 }
  0x25   :  { %s4240_s17 = sld [smem:[%s5295_s0 + %s4102_s22]]   ;;  %s4106_s22 = smov 28  }
  0x26   :  { %s4245_s20 = sld [smem:[%s5295_s0 + %s4103_s28]]   ;;  %s4107_s28 = smov 29  }
  0x27   :  { %s4250_s27 = sld [smem:[%s5295_s0 + %s4104_s7]]  }
  0x28   :  { %s4255_s30 = sld [smem:[%s5295_s0 + %s4105_s15]]  }
  0x2b   :  { %5351 = sst [smem:[#allocation15_spill]] %s4240_s17 }
  0x2c   :  { %5352 = sst [smem:[#allocation16_spill]] %s4245_s20 }
  0x2d   :  { %s4260_s17 = sld [smem:[%s5295_s0 + %s4106_s22]]  }
  0x2e   :  { %s4265_s20 = sld [smem:[%s5295_s0 + %s4107_s28]]  }
  0x2f   :  { %v139_v0 = vld [vmem:[%s4130_s13] sm:$0xff]  ;;  %v5303_v2 = vmov 0   ;;  %v140_v3 = vld [vmem:[%s4130_s13 + $0x8] sm:$0xff]  ;;  %v126_v5 = vld [vmem:[%s4125_s9 + $0x18] sm:$0xff]  ;;  %v1774_v20 = vlaneseq  ;;  %vm366_vm0 = vcmask 556032   ;;  %vm391_vm1 = vcmask 1041408  }
  0x30   :  { %v123_v1 = vld [vmem:[%s4125_s9] sm:$0xff]  ;;  %3735 = vset.pattern.permute.xlu1 %v5303_v2  ;;  %3734 = vset.pattern.permute.xlu0 %v5303_v2  ;;  %v124_v4 = vld [vmem:[%s4125_s9 + $0x8] sm:$0xff]  ;;  %v125_v6 = vld [vmem:[%s4125_s9 + $0x10] sm:$0xff] }
  0x31   :  { %614 = vperm.xlu1 %3735, %v139_v0   ;;  %511 = vperm.xlu0 %3734, %v123_v1   ;;  %v142_v7 = vld [vmem:[%s4130_s13 + $0x18] sm:$0xff]  ;;  %v141_v8 = vld [vmem:[%s4130_s13 + $0x10] sm:$0xff]  ;;  %v3736_v9 = vld [vmem:[%s4175_s24] sm:$0xff]   ;;  %v4298_v27 = vshrl.u32 %v1774_v20, 7 }
  0x32   :  { %395 = vmatprep.subr.bf16.mxu0 %v5303_v2  ;;  %v3737_v10 = vld [vmem:[%s4175_s24 + $0x8] sm:$0xff]   ;;  %3413 = vmatprep.subr.bf16.mxu1 %v3736_v9  ;;  %v3738_v11 = vld [vmem:[%s4150_s29] sm:$0xff]   ;;  %v3739_v14 = vld [vmem:[%s4175_s24 + $0x10] sm:$0xff]  }
  0x33   :  { %v128_v12 = vld [vmem:[%s4125_s9 + $0x28] sm:$0xff]  ;;  %v127_v13 = vld [vmem:[%s4125_s9 + $0x20] sm:$0xff]  ;;  %3414 = vmatpush3.bf16.msra.mxu1 %v3736_v9  ;;  %396 = vmatpush1.bf16.msra.mxu0 %v3738_v11  ;;  %v3742_v18 = vld [vmem:[%s4150_s29 + $0x10] sm:$0xff]   ;;  %v1776_v33 = vsub.s32 0, %v4298_v27 }
  0x34   :  { %3415 = vmatprep.subr.bf16.mxu1 %v3737_v10  ;;  %397 = vmatprep.subr.bf16.mxu0 %v5303_v2  ;;  %v3740_v15 = vld [vmem:[%s4150_s29 + $0x8] sm:$0xff]   ;;  %v143_v17 = vld [vmem:[%s4130_s13 + $0x20] sm:$0xff]  ;;  %v3741_v19 = vld [vmem:[%s4175_s24 + $0x18] sm:$0xff]  }
  0x35   :  { %619 = vperm.xlu1 %3735, %v140_v3   ;;  %516 = vperm.xlu0 %3734, %v124_v4   ;;  %v144_v16 = vld [vmem:[%s4130_s13 + $0x28] sm:$0xff]  ;;  %v130_v21 = vld [vmem:[%s4125_s9 + $0x38] sm:$0xff]  ;;  %v129_v22 = vld [vmem:[%s4125_s9 + $0x30] sm:$0xff] }
  0x36   :  { %v3744_v23 = vld [vmem:[%s4150_s29 + $0x18] sm:$0xff]   ;;  %v3743_v24 = vld [vmem:[%s4175_s24 + $0x20] sm:$0xff]   ;;  %v145_v26 = vld [vmem:[%s4130_s13 + $0x30] sm:$0xff] }
  0x37   :  { %3416 = vmatpush3.bf16.msra.mxu1 %v3737_v10  ;;  %398 = vmatpush1.bf16.msra.mxu0 %v3740_v15  ;;  %v146_v25 = vld [vmem:[%s4130_s13 + $0x38] sm:$0xff]  ;;  %v3745_v28 = vld [vmem:[%s4175_s24 + $0x28] sm:$0xff]   ;;  %v3746_v29 = vld [vmem:[%s4150_s29 + $0x20] sm:$0xff]  }
  0x38   :  { %3417 = vmatprep.subr.bf16.mxu1 %v3739_v14  ;;  %399 = vmatprep.subr.bf16.mxu0 %v5303_v2  ;;  %v132_v30 = vld [vmem:[%s4125_s9 + $0x48] sm:$0xff]  ;;  %v131_v31 = vld [vmem:[%s4125_s9 + $0x40] sm:$0xff]  ;;  %v3747_v34 = vld [vmem:[%s4175_s24 + $0x30] sm:$0xff]  }
  0x39   :  { %526 = vperm.xlu1 %3735, %v126_v5   ;;  %521 = vperm.xlu0 %3734, %v125_v6   ;;  %v3748_v32 = vld [vmem:[%s4150_s29 + $0x28] sm:$0xff]   ;;  %v1848_v35 = vld [vmem:[%s4215_s21] sm:$0x3]  ;;  %v3750_v38 = vld [vmem:[%s4150_s29 + $0x30] sm:$0xff]  }
  0x3a   :  { %v148_v36 = vld [vmem:[%s4130_s13 + $0x48] sm:$0xff]  ;;  %v147_v37 = vld [vmem:[%s4130_s13 + $0x40] sm:$0xff]  ;;  %v4315_v39 = vrot.slane %v1848_v35, %v1776_v33  ;;  %v3749_v40 = vld [vmem:[%s4175_s24 + $0x38] sm:$0xff]  }
  0x3b   :  { %3418 = vmatpush3.bf16.msra.mxu1 %v3739_v14  ;;  %400 = vmatpush1.bf16.msra.mxu0 %v3742_v18  ;;  %v134_v41 = vld [vmem:[%s4125_s9 + $0x58] sm:$0xff]  ;;  %v133_v42 = vld [vmem:[%s4125_s9 + $0x50] sm:$0xff]  ;;  %v3752_v46 = vld [vmem:[%s4150_s29 + $0x40] sm:$0xff]  }
  0x3c   :  { %3419 = vmatprep.subr.bf16.mxu1 %v3741_v19  ;;  %401 = vmatprep.subr.bf16.mxu0 %v5303_v2  ;;  %v3751_v43 = vld [vmem:[%s4150_s29 + $0x38] sm:$0xff]   ;;  %v149_v45 = vld [vmem:[%s4130_s13 + $0x50] sm:$0xff]  ;;  %v136_v47 = vld [vmem:[%s4125_s9 + $0x68] sm:$0xff] }
  0x3d   :  { %629 = vperm.xlu1 %3735, %v142_v7   ;;  %624 = vperm.xlu0 %3734, %v141_v8   ;;  %v150_v44 = vld [vmem:[%s4130_s13 + $0x58] sm:$0xff]  ;;  %v135_v48 = vld [vmem:[%s4125_s9 + $0x60] sm:$0xff]  ;;  %v3753_v49 = vld [vmem:[%s4150_s29 + $0x48] sm:$0xff]  }
  0x3e   :  { %v3759_v50 = vld [vmem:[%s4120_s5 + $0x4] ss:$8 sps:$4 sm:$0xff]   ;;  %v3754_v53 = vld [vmem:[%s4150_s29 + $0x50] sm:$0xff]   ;;  %v138_v54 = vld [vmem:[%s4125_s9 + $0x78] sm:$0xff] }
  0x3f   :  { %3420 = vmatpush3.bf16.msra.mxu1 %v3741_v19  ;;  %402 = vmatpush1.bf16.msra.mxu0 %v3744_v23  ;;  %v152_v51 = vld [vmem:[%s4130_s13 + $0x68] sm:$0xff]  ;;  %v151_v52 = vld [vmem:[%s4130_s13 + $0x60] sm:$0xff]  ;;  %v137_v55 = vld [vmem:[%s4125_s9 + $0x70] sm:$0xff] }
  0x40   :  { %3421 = vmatprep.subr.bf16.mxu1 %v3743_v24  ;;  %403 = vmatprep.subr.bf16.mxu0 %v5303_v2  ;;  %v3756_v56 = vld [vmem:[%s4150_s29 + $0x60] ss:$0 sps:$4 sm:$0x33]   ;;  %v3755_v57 = vld [vmem:[%s4150_s29 + $0x58] sm:$0xff]   ;;  %v153_v59 = vld [vmem:[%s4130_s13 + $0x70] sm:$0xff] }
  0x41   :  { %536 = vperm.xlu1 %3735, %v128_v12   ;;  %531 = vperm.xlu0 %3734, %v127_v13   ;;  %v154_v58 = vld [vmem:[%s4130_s13 + $0x78] sm:$0xff]  ;;  %v393_v60 = vsel %vm391_vm1, %v3756_v56, 0  ;;  %v3757_v61 = vld [vmem:[%s4120_s5] ss:$8 sps:$4 sm:$0xff]   ;;  %v3763_v3 = vld [vmem:[%s4120_s5 + $0x24] ss:$8 sps:$4 sm:$0xff]  }
  0x42   :  { %3196 = vmatprep.mubr.msk.bf16.mxu0 %vm366_vm0, %v3759_v50  ;;  %v3760_v62 = vld [vmem:[%s4120_s5 + $0x14] ss:$8 sps:$4 sm:$0xff]   ;;  %v1772_v63 = vld [vmem:[%s4210_s25] sm:$0x3]  ;;  %v3762_v0 = vld [vmem:[%s4120_s5 + $0x10] ss:$8 sps:$4 sm:$0xff]  }
  0x43   :  { %3422 = vmatpush3.bf16.msra.mxu1 %v3743_v24  ;;  %404 = vmatpush1.bf16.msra.mxu0 %v3746_v29  ;;  %v4352_v1 = vrot.slane %v1772_v63, %v1776_v33  ;;  %v4357_v4 = vld [vmem:[%s4190_s12] sm:$0xff]   ;;  %v3766_v6 = vld [vmem:[%s4120_s5 + $0x34] ss:$8 sps:$4 sm:$0xff]   ;;  %v3768_v7 = vld [vmem:[%s4120_s5 + $0x30] ss:$8 sps:$4 sm:$0xff]  }
  0x44   :  { %3423 = vmatprep.subr.bf16.mxu1 %v3745_v28  ;;  %405 = vmatprep.subr.bf16.mxu0 %v5303_v2  ;;  %v3765_v5 = vld [vmem:[%s4120_s5 + $0x20] ss:$8 sps:$4 sm:$0xff]   ;;  %v3769_v8 = vld [vmem:[%s4120_s5 + $0x44] ss:$8 sps:$4 sm:$0xff]  }
  0x45   :  { %639 = vperm.xlu1 %3735, %v144_v16   ;;  %634 = vperm.xlu0 %3734, %v143_v17  }
  0x47   :  { %3424 = vmatpush3.bf16.msra.mxu1 %v3745_v28  ;;  %406 = vmatpush1.bf16.msra.mxu0 %v3748_v32 }
  0x48   :  { %3425 = vmatprep.subr.bf16.mxu1 %v3747_v34  ;;  %407 = vmatprep.subr.bf16.mxu0 %v5303_v2 }
  0x49   :  { %546 = vperm.xlu1 %3735, %v130_v21   ;;  %541 = vperm.xlu0 %3734, %v129_v22  }
  0x4b   :  { %3426 = vmatpush3.bf16.msra.mxu1 %v3747_v34  ;;  %408 = vmatpush1.bf16.msra.mxu0 %v3750_v38 }
  0x4c   :  { %3427 = vmatprep.subr.bf16.mxu1 %v3749_v40  ;;  %409 = vmatprep.subr.bf16.mxu0 %v5303_v2 }
  0x4d   :  { %649 = vperm.xlu1 %3735, %v146_v25   ;;  %644 = vperm.xlu0 %3734, %v145_v26  }
  0x4f   :  { %3428 = vmatpush3.bf16.msra.mxu1 %v3749_v40  ;;  %410 = vmatpush1.bf16.msra.mxu0 %v3751_v43 }
  0x50   :  { %411 = vmatprep.subr.bf16.mxu0 %v5303_v2  ;;  %3445 = vmatprep.subr.bf16.mxu1 %v4357_v4 }
  0x51   :  { %556 = vperm.xlu1 %3735, %v132_v30   ;;  %551 = vperm.xlu0 %3734, %v131_v31  }
  0x53   :  { %412 = vmatpush1.bf16.msra.mxu0 %v3752_v46 }
  0x54   :  { %413 = vmatprep.subr.bf16.mxu0 %v5303_v2 }
  0x55   :  { %659 = vperm.xlu1 %3735, %v148_v36   ;;  %654 = vperm.xlu0 %3734, %v147_v37  }
  0x57   :  { %414 = vmatpush1.bf16.msra.mxu0 %v3753_v49 }
  0x58   :  { %415 = vmatprep.subr.bf16.mxu0 %v5303_v2 }
  0x59   :  { %566 = vperm.xlu1 %3735, %v134_v41   ;;  %561 = vperm.xlu0 %3734, %v133_v42  }
  0x5b   :  { %416 = vmatpush1.bf16.msra.mxu0 %v3754_v53 }
  0x5c   :  { %417 = vmatprep.subr.bf16.mxu0 %v5303_v2 }
  0x5d   :  { %669 = vperm.xlu1 %3735, %v150_v44   ;;  %664 = vperm.xlu0 %3734, %v149_v45  }
  0x5f   :  { %418 = vmatpush1.bf16.msra.mxu0 %v3755_v57 }
  0x60   :  { %419 = vmatprep.subr.bf16.mxu0 %v5303_v2 }
  0x61   :  { %576 = vperm.xlu1 %3735, %v136_v47   ;;  %571 = vperm.xlu0 %3734, %v135_v48  }
  0x63   :  { %420 = vmatpush1.bf16.msra.mxu0 %v393_v60 }
  0x65   :  { %679 = vperm.xlu1 %3735, %v152_v51   ;;  %674 = vperm.xlu0 %3734, %v151_v52  }
  0x66   :  { %428 = vmatmul.mubr.bf16.vlgmr.msra.gmra.mrb[0].mxu0 %v3757_v61 }
  0x67   :  { %3197 = vmatprep.mubr.msk.bf16.mxu0 %vm366_vm0, %v3760_v62 }
  0x69   :  { %586 = vperm.xlu1 %3735, %v138_v54   ;;  %581 = vperm.xlu0 %3734, %v137_v55  }
  0x6d   :  { %689 = vperm.xlu1 %3735, %v154_v58   ;;  %684 = vperm.xlu0 %3734, %v153_v59  }
  0x6e   :  { %436 = vmatmul.mubr.bf16.gmra.mrb[4].mxu0 %v3762_v0 }
  0x6f   :  { %3198 = vmatprep.mubr.msk.bf16.mxu0 %vm366_vm0, %v3763_v3 }
  0x76   :  { %444 = vmatmul.mubr.bf16.gmra.mrb[8].mxu0 %v3765_v5 }
  0x77   :  { %3199 = vmatprep.mubr.msk.bf16.mxu0 %vm366_vm0, %v3766_v6 }
  0x78   :  { %65 = vsyncpa [#allocation3], 0  ;;  %v3771_v9 = vld [vmem:[%s4120_s5 + $0x40] ss:$8 sps:$4 sm:$0xff]   ;;  %v3772_v10 = vld [vmem:[%s4120_s5 + $0x54] ss:$8 sps:$4 sm:$0xff]  }
  0x79   :  { %v3774_v11 = vld [vmem:[%s4120_s5 + $0x50] ss:$8 sps:$4 sm:$0xff]   ;;  %v3775_v12 = vld [vmem:[%s4120_s5 + $0x64] ss:$8 sps:$4 sm:$0xff]   ;;  %v3777_v13 = vld [vmem:[%s4120_s5 + $0x60] ss:$8 sps:$4 sm:$0xff]  }
  0x7a   :  { %v3778_v14 = vld [vmem:[%s4120_s5 + $0x74] ss:$8 sps:$4 sm:$0xff]   ;;  %v3780_v15 = vld [vmem:[%s4120_s5 + $0x70] ss:$8 sps:$4 sm:$0xff]   ;;  %v4378_v16 = vld [vmem:[%s4165_s14] ss:$0 sm:$0xff] }
  0x7b   :  { %v4381_v17 = vld [vmem:[%s4160_s8] ss:$0 sm:$0xff]  ;;  %s5384_s0 = sld [smem:[#allocation8_spill]]  ;;  %s5385_s5 = sld [smem:[#allocation12_spill]] }
  0x7c   :  { %v4404_v28 = vld [vmem:[%s4170_s19] ss:$0 sm:$0xff]  ;;  %s5386_s9 = sld [smem:[#allocation10_spill]]  ;;  %s5387_s13 = sld [smem:[#allocation9_spill]] }
  0x7d   :  { %s5389_s29 = sld [smem:[#allocation5_spill]]  ;;  %s5397_s8 = sld [smem:[#allocation15_spill]] }
  0x7e   :  { %452 = vmatmul.mubr.bf16.gmra.mrb[12].mxu0 %v3768_v7  ;;  %s5398_s14 = sld [smem:[#allocation6_spill]]  ;;  %s5434_s19 = sld [smem:[#allocation7_spill]] }
  0x7f   :  { %3200 = vmatprep.mubr.msk.bf16.mxu0 %vm366_vm0, %v3769_v8  ;;  %v3782_v8 = vld [vmem:[%s4190_s12 + $0x8] sm:$0xff]   ;;  %s5450_s24 = sld [smem:[#allocation16_spill]] }
  0x86   :  { %460 = vmatmul.mubr.bf16.gmra.mrb[16].mxu0 %v3771_v9 }
  0x87   :  { %3201 = vmatprep.mubr.msk.bf16.mxu0 %vm366_vm0, %v3772_v10 }
  0x8e   :  { %468 = vmatmul.mubr.bf16.gmra.mrb[20].mxu0 %v3774_v11 }
  0x8f   :  { %3202 = vmatprep.mubr.msk.bf16.mxu0 %vm366_vm0, %v3775_v12 }
  0x96   :  { %476 = vmatmul.mubr.bf16.gmra.mrb[24].mxu0 %v3777_v13 }
  0x97   :  { %3203 = vmatprep.mubr.msk.bf16.mxu0 %vm366_vm0, %v3778_v14 }
  0x9e   :  { %484 = vmatmul.mubr.bf16.gmra.mrb[28].mxu0 %v3780_v15 }
  0x9f   :  { %1498 = vmatprep.mubr.bf16.mxu0 %v5303_v2 }
  0xb0   :  { %v4383_v18 = vpop.permute.xlu1 %614  ;;  %v4385_v19 = vpop.permute.xlu0 %511 }
  0xb1   :  { %5353 = vst [vmem:[#allocation17_spill] sm:$0xff] %v4383_v18  ;;  %5354 = vst [vmem:[#allocation18_spill] sm:$0xff] %v4385_v19  ;;  %v698_v20 = vmul.f32 %v4378_v16, %v4383_v18  ;;  %v595_v21 = vmul.f32 %v4381_v17, %v4385_v19  ;;  %v4393_v22 = vmul.f32 %v4352_v1, %v4385_v19 }
  0xb2   :  { %v4397_v23 = vmul.f32 %v4315_v39, %v4383_v18 }
  0xb3   :  { %v714_v24 = vadd.f32 %v698_v20, %v595_v21  ;;  %v3783_v21 = vld [vmem:[%s4190_s12 + $0x10] sm:$0xff]  }
  0xb4   :  { %v4399_v25 = vpop.permute.xlu1 %619  ;;  %v4401_v26 = vpop.permute.xlu0 %516 }
  0xb5   :  { %5355 = vst [vmem:[#allocation19_spill] sm:$0xff] %v4401_v26  ;;  %v699_v29 = vmul.f32 %v4378_v16, %v4399_v25  ;;  %v596_v30 = vmul.f32 %v4381_v17, %v4401_v26  ;;  %v4412_v31 = vmul.f32 %v4352_v1, %v4401_v26  ;;  %v4416_v32 = vmul.f32 %v4315_v39, %v4399_v25 }
  0xb6   :  { %v737_v34 = vadd.f32 %v4404_v28, %v714_v24 }
  0xb7   :  { %v715_v33 = vadd.f32 %v699_v29, %v596_v30 }
  0xb8   :  { %v4419_v35 = vpop.permute.xlu1 %526  ;;  %v4421_v36 = vpop.permute.xlu0 %521  ;;  %v753_v41 = vmax.f32 %v737_v34, 0.0 }
  0xb9   :  { %v738_v37 = vadd.f32 %v4404_v28, %v715_v33  ;;  %v4426_v38 = vmul.f32 %v4352_v1, %v4421_v36  ;;  %v4430_v40 = vmul.f32 %v4352_v1, %v4419_v35  ;;  %v598_v43 = vmul.f32 %v4381_v17, %v4419_v35 }
  0xba   :  { %v597_v44 = vmul.f32 %v4381_v17, %v4421_v36 }
  0xbb   :  { %v754_v42 = vmax.f32 %v738_v37, 0.0 }
  0xbc   :  { %v4436_v45 = vpop.permute.xlu1 %629  ;;  %v4438_v46 = vpop.permute.xlu0 %624 }
  0xbd   :  { %v701_v47 = vmul.f32 %v4378_v16, %v4436_v45  ;;  %v700_v48 = vmul.f32 %v4378_v16, %v4438_v46  ;;  %v769_v49 = vpack.c.bf16 %v754_v42, %v753_v41  ;;  %v4446_v50 = vmul.f32 %v4315_v39, %v4438_v46 }
  0xbe   :  { %v4450_v51 = vmul.f32 %v4315_v39, %v4436_v45 }
  0xbf   :  { %v717_v52 = vadd.f32 %v701_v47, %v598_v43  ;;  %v716_v53 = vadd.f32 %v700_v48, %v597_v44  ;;  %3429 = vmatprep.mubr.bf16.mxu1 %v769_v49  ;;  %v3784_v47 = vld [vmem:[%s4190_s12 + $0x18] sm:$0xff]  }
  0xc0   :  { %v4452_v54 = vpop.permute.xlu1 %536  ;;  %v4454_v55 = vpop.permute.xlu0 %531 }
  0xc1   :  { %v739_v56 = vadd.f32 %v4404_v28, %v716_v53  ;;  %v740_v57 = vadd.f32 %v4404_v28, %v717_v52  ;;  %v4460_v58 = vmul.f32 %v4352_v1, %v4454_v55  ;;  %v4464_v59 = vmul.f32 %v4352_v1, %v4452_v54 }
  0xc2   :  { %v600_v62 = vmul.f32 %v4381_v17, %v4452_v54  ;;  %v599_v63 = vmul.f32 %v4381_v17, %v4454_v55 }
  0xc3   :  { %v755_v60 = vmax.f32 %v739_v56, 0.0  ;;  %v756_v61 = vmax.f32 %v740_v57, 0.0 }
  0xc4   :  { %v4470_v0 = vpop.permute.xlu1 %639  ;;  %v4472_v3 = vpop.permute.xlu0 %634 }
  0xc5   :  { %v703_v5 = vmul.f32 %v4378_v16, %v4470_v0  ;;  %v702_v6 = vmul.f32 %v4378_v16, %v4472_v3  ;;  %v770_v7 = vpack.c.bf16 %v756_v61, %v755_v60  ;;  %v4481_v9 = vmul.f32 %v4315_v39, %v4472_v3 }
  0xc6   :  { %v4485_v10 = vmul.f32 %v4315_v39, %v4470_v0 }
  0xc7   :  { %v719_v11 = vadd.f32 %v703_v5, %v600_v62  ;;  %v718_v12 = vadd.f32 %v702_v6, %v599_v63  ;;  %3430 = vmatmul.mubr.bf16.vlgmr.msra.gmra.mrb[0].mxu1 %v770_v7  ;;  %v3785_v62 = vld [vmem:[%s4190_s12 + $0x20] sm:$0xff]  }
  0xc8   :  { %v4487_v13 = vpop.permute.xlu1 %546  ;;  %v4489_v14 = vpop.permute.xlu0 %541  ;;  %3446 = vmatpush3.bf16.msra.mxu1 %v4357_v4 }
  0xc9   :  { %v741_v15 = vadd.f32 %v4404_v28, %v718_v12  ;;  %v742_v20 = vadd.f32 %v4404_v28, %v719_v11  ;;  %3447 = vmatprep.subr.bf16.mxu1 %v3782_v8  ;;  %v4497_v24 = vmul.f32 %v4352_v1, %v4489_v14  ;;  %v4501_v29 = vmul.f32 %v4352_v1, %v4487_v13 }
  0xca   :  { %v602_v4 = vmul.f32 %v4381_v17, %v4487_v13  ;;  %v601_v34 = vmul.f32 %v4381_v17, %v4489_v14 }
  0xcb   :  { %v757_v30 = vmax.f32 %v741_v15, 0.0  ;;  %v758_v33 = vmax.f32 %v742_v20, 0.0 }
  0xcc   :  { %v4507_v37 = vpop.permute.xlu1 %649  ;;  %v4509_v41 = vpop.permute.xlu0 %644  ;;  %3448 = vmatpush3.bf16.msra.mxu1 %v3782_v8 }
  0xcd   :  { %v705_v42 = vmul.f32 %v4378_v16, %v4507_v37  ;;  %v704_v43 = vmul.f32 %v4378_v16, %v4509_v41  ;;  %v771_v44 = vpack.c.bf16 %v758_v33, %v757_v30  ;;  %3449 = vmatprep.subr.bf16.mxu1 %v3783_v21  ;;  %v4518_v48 = vmul.f32 %v4315_v39, %v4509_v41  ;;  %v3786_v33 = vld [vmem:[%s4190_s12 + $0x28] sm:$0xff]  }
  0xce   :  { %v4522_v49 = vmul.f32 %v4315_v39, %v4507_v37 }
  0xcf   :  { %v721_v52 = vadd.f32 %v705_v42, %v602_v4  ;;  %v720_v53 = vadd.f32 %v704_v43, %v601_v34  ;;  %3433 = vmatprep.mubr.bf16.mxu1 %v771_v44 }
  0xd0   :  { %v4524_v56 = vpop.permute.xlu1 %556  ;;  %v4526_v57 = vpop.permute.xlu0 %551  ;;  %3450 = vmatpush3.bf16.msra.mxu1 %v3783_v21 }
  0xd1   :  { %v743_v60 = vadd.f32 %v4404_v28, %v720_v53  ;;  %v744_v61 = vadd.f32 %v4404_v28, %v721_v52  ;;  %3451 = vmatprep.subr.bf16.mxu1 %v3784_v47  ;;  %v4533_v63 = vmul.f32 %v4352_v1, %v4526_v57  ;;  %v4537_v5 = vmul.f32 %v4352_v1, %v4524_v56 }
  0xd2   :  { %v604_v8 = vmul.f32 %v4381_v17, %v4524_v56  ;;  %v603_v11 = vmul.f32 %v4381_v17, %v4526_v57 }
  0xd3   :  { %5356 = vst [vmem:[#allocation20_spill] sm:$0xff] %v4537_v5  ;;  %v759_v6 = vmax.f32 %v743_v60, 0.0  ;;  %v760_v7 = vmax.f32 %v744_v61, 0.0 }
  0xd4   :  { %v4543_v12 = vpop.permute.xlu1 %659  ;;  %v4545_v15 = vpop.permute.xlu0 %654  ;;  %3452 = vmatpush3.bf16.msra.mxu1 %v3784_v47 }
  0xd5   :  { %5357 = vst [vmem:[#allocation21_spill] sm:$0xff] %v4543_v12  ;;  %5358 = vst [vmem:[#allocation22_spill] sm:$0xff] %v4545_v15  ;;  %v707_v20 = vmul.f32 %v4378_v16, %v4543_v12  ;;  %v706_v21 = vmul.f32 %v4378_v16, %v4545_v15  ;;  %v772_v30 = vpack.c.bf16 %v760_v7, %v759_v6  ;;  %3453 = vmatprep.subr.bf16.mxu1 %v3785_v62 }
  0xd6   :  { %v4554_v4 = vmul.f32 %v4315_v39, %v4545_v15  ;;  %v4558_v34 = vmul.f32 %v4315_v39, %v4543_v12  ;;  %v3790_v12 = vld [vmem:[%s4185_s6 + $0x8] sm:$0xff]  }
  0xd7   :  { %v723_v42 = vadd.f32 %v707_v20, %v604_v8  ;;  %v722_v43 = vadd.f32 %v706_v21, %v603_v11  ;;  %3434 = vmatmul.mubr.bf16.gmra.mrb[4].mxu1 %v772_v30 }
  0xd8   :  { %5359 = vst [vmem:[#allocation23_spill] sm:$0xff] %v4558_v34  ;;  %v4560_v44 = vpop.permute.xlu1 %566  ;;  %v4562_v47 = vpop.permute.xlu0 %561  ;;  %3454 = vmatpush3.bf16.msra.mxu1 %v3785_v62 }
  0xd9   :  { %5360 = vst [vmem:[#allocation24_spill] sm:$0xff] %v4560_v44  ;;  %5361 = vst [vmem:[#allocation25_spill] sm:$0xff] %v4562_v47  ;;  %v745_v52 = vadd.f32 %v4404_v28, %v722_v43  ;;  %v746_v53 = vadd.f32 %v4404_v28, %v723_v42  ;;  %3455 = vmatprep.subr.bf16.mxu1 %v3786_v33  ;;  %v4568_v60 = vmul.f32 %v4352_v1, %v4562_v47 }
  0xda   :  { %v4572_v61 = vmul.f32 %v4352_v1, %v4560_v44  ;;  %v606_v8 = vmul.f32 %v4381_v17, %v4560_v44  ;;  %v605_v62 = vmul.f32 %v4381_v17, %v4562_v47 }
  0xdb   :  { %5362 = vst [vmem:[#allocation26_spill] sm:$0xff] %v4568_v60  ;;  %v761_v6 = vmax.f32 %v745_v52, 0.0  ;;  %v762_v7 = vmax.f32 %v746_v53, 0.0 }
  0xdc   :  { %5363 = vst [vmem:[#allocation27_spill] sm:$0xff] %v4572_v61  ;;  %v4578_v11 = vpop.permute.xlu1 %669  ;;  %v4580_v20 = vpop.permute.xlu0 %664  ;;  %3456 = vmatpush3.bf16.msra.mxu1 %v3786_v33 }
  0xdd   :  { %5364 = vst [vmem:[#allocation28_spill] sm:$0xff] %v4578_v11  ;;  %5365 = vst [vmem:[#allocation29_spill] sm:$0xff] %v4580_v20  ;;  %v709_v21 = vmul.f32 %v4378_v16, %v4578_v11  ;;  %v708_v30 = vmul.f32 %v4378_v16, %v4580_v20  ;;  %v773_v42 = vpack.c.bf16 %v762_v7, %v761_v6 }
  0xde   :  { %v4588_v43 = vmul.f32 %v4315_v39, %v4580_v20  ;;  %v4592_v52 = vmul.f32 %v4315_v39, %v4578_v11 }
  0xdf   :  { %v725_v53 = vadd.f32 %v709_v21, %v606_v8  ;;  %v724_v2 = vadd.f32 %v708_v30, %v605_v62  ;;  %3437 = vmatprep.mubr.bf16.mxu1 %v773_v42 }
  0xe0   :  { %5366 = vst [vmem:[#allocation30_spill] sm:$0xff] %v4588_v43  ;;  %5367 = vst [vmem:[#allocation31_spill] sm:$0xff] %v4592_v52  ;;  %v4594_v61 = vpop.permute.xlu1 %576  ;;  %v4596_v33 = vpop.permute.xlu0 %571 }
  0xe1   :  { %5368 = vst [vmem:[#allocation32_spill] sm:$0xff] %v4594_v61  ;;  %5369 = vst [vmem:[#allocation33_spill] sm:$0xff] %v4596_v33  ;;  %v747_v44 = vadd.f32 %v4404_v28, %v724_v2  ;;  %v748_v60 = vadd.f32 %v4404_v28, %v725_v53  ;;  %v4602_v6 = vmul.f32 %v4352_v1, %v4596_v33 }
  0xe2   :  { %v4606_v7 = vmul.f32 %v4352_v1, %v4594_v61  ;;  %v608_v62 = vmul.f32 %v4381_v17, %v4594_v61  ;;  %v607_v21 = vmul.f32 %v4381_v17, %v4596_v33 }
  0xe3   :  { %5370 = vst [vmem:[#allocation34_spill] sm:$0xff] %v4602_v6  ;;  %v763_v52 = vmax.f32 %v747_v44, 0.0  ;;  %v764_v8 = vmax.f32 %v748_v60, 0.0 }
  0xe4   :  { %5371 = vst [vmem:[#allocation35_spill] sm:$0xff] %v4606_v7  ;;  %v4612_v30 = vpop.permute.xlu1 %679  ;;  %v4614_v2 = vpop.permute.xlu0 %674 }
  0xe5   :  { %5372 = vst [vmem:[#allocation36_spill] sm:$0xff] %v4612_v30  ;;  %5373 = vst [vmem:[#allocation37_spill] sm:$0xff] %v4614_v2  ;;  %v711_v42 = vmul.f32 %v4378_v16, %v4612_v30  ;;  %v710_v53 = vmul.f32 %v4378_v16, %v4614_v2  ;;  %v774_v6 = vpack.c.bf16 %v764_v8, %v763_v52 }
  0xe6   :  { %v4622_v44 = vmul.f32 %v4315_v39, %v4614_v2  ;;  %v4626_v60 = vmul.f32 %v4315_v39, %v4612_v30 }
  0xe7   :  { %v727_v7 = vadd.f32 %v711_v42, %v608_v62  ;;  %v726_v61 = vadd.f32 %v710_v53, %v607_v21  ;;  %3438 = vmatmul.mubr.bf16.gmra.mrb[8].mxu1 %v774_v6 }
  0xe8   :  { %5374 = vst [vmem:[#allocation38_spill] sm:$0xff] %v4622_v44  ;;  %5375 = vst [vmem:[#allocation39_spill] sm:$0xff] %v4626_v60  ;;  %v4628_v33 = vpop.permute.xlu1 %586  ;;  %v4630_v43 = vpop.permute.xlu0 %581  ;;  %v3787_v60 = vld [vmem:[%s4190_s12 + $0x30] sm:$0xff]  }
  0xe9   :  { %5376 = vst [vmem:[#allocation40_spill] sm:$0xff] %v4628_v33  ;;  %5377 = vst [vmem:[#allocation41_spill] sm:$0xff] %v4630_v43  ;;  %v749_v11 = vadd.f32 %v4404_v28, %v726_v61  ;;  %v750_v20 = vadd.f32 %v4404_v28, %v727_v7  ;;  %v4636_v52 = vmul.f32 %v4352_v1, %v4630_v43  ;;  %3457 = vmatprep.subr.bf16.mxu1 %v3787_v60 }
  0xea   :  { %v4640_v8 = vmul.f32 %v4352_v1, %v4628_v33  ;;  %v610_v42 = vmul.f32 %v4381_v17, %v4628_v33  ;;  %v609_v1 = vmul.f32 %v4381_v17, %v4630_v43  ;;  %3458 = vmatpush3.bf16.msra.mxu1 %v3787_v60 }
  0xeb   :  { %5378 = vst [vmem:[#allocation42_spill] sm:$0xff] %v4636_v52  ;;  %v765_v30 = vmax.f32 %v749_v11, 0.0  ;;  %v766_v62 = vmax.f32 %v750_v20, 0.0 }
  0xec   :  { %5379 = vst [vmem:[#allocation43_spill] sm:$0xff] %v4640_v8  ;;  %v4642_v21 = vpop.permute.xlu1 %689  ;;  %v4644_v6 = vpop.permute.xlu0 %684 }
  0xed   :  { %5380 = vst [vmem:[#allocation44_spill] sm:$0xff] %v4642_v21  ;;  %5381 = vst [vmem:[#allocation45_spill] sm:$0xff] %v4644_v6  ;;  %v713_v61 = vmul.f32 %v4378_v16, %v4642_v21  ;;  %v4652_v7 = vmul.f32 %v4315_v39, %v4642_v21  ;;  %v712_v11 = vmul.f32 %v4378_v16, %v4644_v6  ;;  %v3788_v16 = vld [vmem:[%s4190_s12 + $0x38] sm:$0xff]  }
  0xee   :  { %v4660_v20 = vmul.f32 %v4315_v39, %v4644_v6  ;;  %v775_v8 = vpack.c.bf16 %v766_v62, %v765_v30  ;;  %3459 = vmatprep.subr.bf16.mxu1 %v3788_v16  ;;  %v4667_v39 = vld [vmem:[%s4185_s6] sm:$0xff]  }
  0xef   :  { %5382 = vst [vmem:[#allocation46_spill] sm:$0xff] %v4652_v7  ;;  %v729_v53 = vadd.f32 %v713_v61, %v610_v42  ;;  %v728_v33 = vadd.f32 %v712_v11, %v609_v1  ;;  %3460 = vmatpush3.bf16.msra.mxu1 %v3788_v16  ;;  %v4671_v62 = vld [vmem:[%s4155_s3] ss:$0 sm:$0xff]  ;;  %s5390_s3 = sld [smem:[#allocation11_spill]] }
  0xf0   :  { %5383 = vst [vmem:[#allocation47_spill] sm:$0xff] %v4660_v20  ;;  %3441 = vmatprep.mubr.bf16.mxu1 %v775_v8  ;;  %3477 = vmatprep.subr.bf16.mxu1 %v4667_v39 }
  0xf1   :  { %v752_v52 = vadd.f32 %v4404_v28, %v729_v53  ;;  %v751_v21 = vadd.f32 %v4404_v28, %v728_v33 }
  0xf3   :  { %v768_v7 = vmax.f32 %v752_v52, 0.0  ;;  %v767_v17 = vmax.f32 %v751_v21, 0.0 }
  0xf5   :  { %v776_v43 = vpack.c.bf16 %v768_v7, %v767_v17 }
  0xf7   :  { %3442 = vmatmul.mubr.bf16.gmra.mrb[12].mxu1 %v776_v43 }
 0x139   :  { %v429_v30 = vpop.f32.mrb[0].mxu0 }
 0x13a   :  { %v431_v8 = vpop.f32.mrb[1].mxu0  ;;  %v430_v28 = vadd.f32 %v4671_v62, %v429_v30 }
 0x13b   :  { %v432_v33 = vpop.f32.mrb[2].mxu0 }
 0x13c   :  { %v492_v52 = vmax.f32 %v430_v28, 0.0  ;;  %v433_v43 = vadd.f32 %v4671_v62, %v432_v33  ;;  %v434_v21 = vpop.f32.mrb[3].mxu0 }
 0x13e   :  { %v493_v42 = vmax.f32 %v433_v43, 0.0 }
 0x140   :  { %v4675_v60 = vpack.c.bf16 %v493_v42, %v492_v52 }
 0x141   :  { %v437_v61 = vpop.f32.mrb[4].mxu0 }
 0x142   :  { %v438_v7 = vadd.f32 %v4671_v62, %v437_v61  ;;  %v439_v1 = vpop.f32.mrb[5].mxu0 }
 0x143   :  { %v440_v11 = vpop.f32.mrb[6].mxu0 }
 0x144   :  { %v494_v53 = vmax.f32 %v438_v7, 0.0  ;;  %v441_v17 = vadd.f32 %v4671_v62, %v440_v11  ;;  %v442_v16 = vpop.f32.mrb[7].mxu0 }
 0x146   :  { %v495_v6 = vmax.f32 %v441_v17, 0.0 }
 0x148   :  { %v4680_v33 = vpack.c.bf16 %v495_v6, %v494_v53 }
 0x149   :  { %v445_v8 = vpop.f32.mrb[8].mxu0 }
 0x14a   :  { %v446_v30 = vadd.f32 %v4671_v62, %v445_v8  ;;  %v447_v28 = vpop.f32.mrb[9].mxu0 }
 0x14b   :  { %v448_v20 = vpop.f32.mrb[10].mxu0 }
 0x14c   :  { %v496_v43 = vmax.f32 %v446_v30, 0.0  ;;  %v449_v52 = vadd.f32 %v4671_v62, %v448_v20  ;;  %v450_v21 = vpop.f32.mrb[11].mxu0 }
 0x14e   :  { %v497_v42 = vmax.f32 %v449_v52, 0.0 }
 0x150   :  { %v4684_v44 = vpack.c.bf16 %v497_v42, %v496_v43 }
 0x151   :  { %v453_v61 = vpop.f32.mrb[12].mxu0 }
 0x152   :  { %v454_v1 = vadd.f32 %v4671_v62, %v453_v61  ;;  %v455_v7 = vpop.f32.mrb[13].mxu0 }
 0x153   :  { %v456_v11 = vpop.f32.mrb[14].mxu0 }
 0x154   :  { %v498_v16 = vmax.f32 %v454_v1, 0.0  ;;  %v457_v17 = vadd.f32 %v4671_v62, %v456_v11  ;;  %v458_v8 = vpop.f32.mrb[15].mxu0 }
 0x156   :  { %v499_v28 = vmax.f32 %v457_v17, 0.0 }
 0x158   :  { %v4687_v2 = vpack.c.bf16 %v499_v28, %v498_v16 }
 0x159   :  { %v461_v6 = vpop.f32.mrb[16].mxu0 }
 0x15a   :  { %v462_v53 = vadd.f32 %v4671_v62, %v461_v6  ;;  %v463_v20 = vpop.f32.mrb[17].mxu0 }
 0x15b   :  { %v464_v30 = vpop.f32.mrb[18].mxu0 }
 0x15c   :  { %v500_v52 = vmax.f32 %v462_v53, 0.0  ;;  %v465_v21 = vadd.f32 %v4671_v62, %v464_v30  ;;  %v466_v61 = vpop.f32.mrb[19].mxu0 }
 0x15d   :  { %v3797_v61 = vld [vmem:[%s4205_s4] ss:$8 sps:$4 sm:$0xff]  }
 0x15e   :  { %v501_v43 = vmax.f32 %v465_v21, 0.0 }
 0x160   :  { %v4691_v42 = vpack.c.bf16 %v501_v43, %v500_v52  ;;  %v3799_v43 = vld [vmem:[%s4205_s4 + $0x4] ss:$8 sps:$4 sm:$0xff]  }
 0x161   :  { %v469_v1 = vpop.f32.mrb[20].mxu0  ;;  %1466 = vmatprep.subr.bf16.mxu0 %v3799_v43  ;;  %v3808_v43 = vld [vmem:[%s4205_s4 + $0x34] ss:$8 sps:$4 sm:$0xff]  }
 0x162   :  { %v470_v7 = vadd.f32 %v4671_v62, %v469_v1  ;;  %v471_v11 = vpop.f32.mrb[21].mxu0  ;;  %1467 = vmatpush1.bf16.msra.mxu0 %v3797_v61 }
 0x163   :  { %v472_v16 = vpop.f32.mrb[22].mxu0 }
 0x164   :  { %v502_v17 = vmax.f32 %v470_v7, 0.0  ;;  %v473_v8 = vadd.f32 %v4671_v62, %v472_v16  ;;  %v474_v28 = vpop.f32.mrb[23].mxu0  ;;  %v3802_v16 = vld [vmem:[%s4205_s4 + $0x14] ss:$8 sps:$4 sm:$0xff]  }
 0x165   :  { %1468 = vmatprep.subr.bf16.mxu0 %v3802_v16  ;;  %v3806_v16 = vld [vmem:[%s4205_s4 + $0x30] ss:$8 sps:$4 sm:$0xff]  }
 0x166   :  { %v503_v6 = vmax.f32 %v473_v8, 0.0  ;;  %v3805_v8 = vld [vmem:[%s4205_s4 + $0x24] ss:$8 sps:$4 sm:$0xff]  }
 0x168   :  { %v4695_v53 = vpack.c.bf16 %v503_v6, %v502_v17  ;;  %v3800_v17 = vld [vmem:[%s4205_s4 + $0x10] ss:$8 sps:$4 sm:$0xff]  }
 0x169   :  { %v477_v20 = vpop.f32.mrb[24].mxu0  ;;  %1469 = vmatpush1.bf16.msra.mxu0 %v3800_v17  ;;  %v3809_v17 = vld [vmem:[%s4205_s4 + $0x40] ss:$8 sps:$4 sm:$0xff]  }
 0x16a   :  { %v478_v30 = vadd.f32 %v4671_v62, %v477_v20  ;;  %v479_v52 = vpop.f32.mrb[25].mxu0  ;;  %1470 = vmatprep.subr.bf16.mxu0 %v3805_v8  ;;  %v3816_v8 = vld [vmem:[%s4205_s4 + $0x54] ss:$8 sps:$4 sm:$0xff]  }
 0x16b   :  { %v480_v21 = vpop.f32.mrb[26].mxu0 }
 0x16c   :  { %v504_v1 = vmax.f32 %v478_v30, 0.0  ;;  %v481_v11 = vadd.f32 %v4671_v62, %v480_v21  ;;  %v482_v7 = vpop.f32.mrb[27].mxu0  ;;  %v3803_v30 = vld [vmem:[%s4205_s4 + $0x20] ss:$8 sps:$4 sm:$0xff]  }
 0x16d   :  { %1471 = vmatpush1.bf16.msra.mxu0 %v3803_v30  ;;  %v4720_v30 = vld [vmem:[%s5384_s0] ss:$0 sm:$0xff] }
 0x16e   :  { %v505_v28 = vmax.f32 %v481_v11, 0.0  ;;  %1472 = vmatprep.subr.bf16.mxu0 %v3808_v43 }
 0x170   :  { %v4704_v6 = vpack.c.bf16 %v505_v28, %v504_v1 }
 0x171   :  { %v485_v20 = vpop.f32.mrb[28].mxu0  ;;  %1473 = vmatpush1.bf16.msra.mxu0 %v3806_v16 }
 0x172   :  { %v486_v52 = vadd.f32 %v4671_v62, %v485_v20  ;;  %v487_v47 = vpop.f32.mrb[29].mxu0  ;;  %v3814_v20 = vld [vmem:[%s4205_s4 + $0x50] ss:$8 sps:$4 sm:$0xff]  }
 0x173   :  { %v488_v21 = vpop.f32.mrb[30].mxu0  ;;  %v3811_v47 = vld [vmem:[%s4205_s4 + $0x44] ss:$8 sps:$4 sm:$0xff]  }
 0x174   :  { %v506_v61 = vmax.f32 %v486_v52, 0.0  ;;  %v489_v11 = vadd.f32 %v4671_v62, %v488_v21  ;;  %v490_v7 = vpop.f32.mrb[31].mxu0  ;;  %1474 = vmatprep.subr.bf16.mxu0 %v3811_v47  ;;  %v3821_v52 = vld [vmem:[%s4205_s4 + $0x64] ss:$8 sps:$4 sm:$0xff]   ;;  %v3819_v62 = vld [vmem:[%s4205_s4 + $0x60] ss:$8 sps:$4 sm:$0xff]  }
 0x175   :  { %1475 = vmatpush1.bf16.msra.mxu0 %v3809_v17 }
 0x176   :  { %v507_v1 = vmax.f32 %v489_v11, 0.0  ;;  %1476 = vmatprep.subr.bf16.mxu0 %v3816_v8 }
 0x178   :  { %v4712_v28 = vpack.c.bf16 %v507_v1, %v506_v61 }
 0x179   :  { %1477 = vmatpush1.bf16.msra.mxu0 %v3814_v20 }
 0x17a   :  { %1478 = vmatprep.subr.bf16.mxu0 %v3821_v52 }
 0x17d   :  { %1479 = vmatpush1.bf16.msra.mxu0 %v3819_v62 }
 0x19a   :  { %v3431_v21 = vpop.f32.mrb[0].mxu1 }
 0x19b   :  { %v891_v43 = vadd.f32 %v3431_v21, %v4720_v30  ;;  %v882_v61 = vpop.f32.mrb[1].mxu1  ;;  %v3791_v21 = vld [vmem:[%s4185_s6 + $0x10] sm:$0xff]  }
 0x19c   :  { %v883_v11 = vadd.f32 %v4720_v30, %v882_v61  ;;  %v3432_v7 = vpop.f32.mrb[2].mxu1 }
 0x19d   :  { %v894_v1 = vadd.f32 %v3432_v7, %v4720_v30  ;;  %v885_v16 = vpop.f32.mrb[3].mxu1  ;;  %v947_v17 = vmax.f32 %v891_v43, 0.0  ;;  %v3792_v43 = vld [vmem:[%s4185_s6 + $0x18] sm:$0xff]  }
 0x19e   :  { %v886_v47 = vadd.f32 %v4720_v30, %v885_v16  ;;  %v945_v20 = vmax.f32 %v883_v11, 0.0 }
 0x19f   :  { %v948_v8 = vmax.f32 %v894_v1, 0.0 }
 0x1a0   :  { %v946_v52 = vmax.f32 %v886_v47, 0.0 }
 0x1a1   :  { %v986_v62 = vpack.c.bf16 %v948_v8, %v947_v17 }
 0x1a2   :  { %v985_v34 = vpack.c.bf16 %v946_v52, %v945_v20 }
 0x1a4   :  { %3461 = vmatprep.mubr.bf16.mxu1 %v985_v34 }
 0x1a5   :  { %3462 = vmatmul.mubr.bf16.vlgmr.msra.gmra.mrb[16].mxu1 %v986_v62 }
 0x1a6   :  { %3478 = vmatpush3.bf16.msra.mxu1 %v4667_v39 }
 0x1a7   :  { %3479 = vmatprep.subr.bf16.mxu1 %v3790_v12 }
 0x1aa   :  { %v3435_v61 = vpop.f32.mrb[4].mxu1  ;;  %3480 = vmatpush3.bf16.msra.mxu1 %v3790_v12  ;;  %v3793_v12 = vld [vmem:[%s4185_s6 + $0x20] sm:$0xff]  }
 0x1ab   :  { %v907_v7 = vadd.f32 %v3435_v61, %v4720_v30  ;;  %v898_v16 = vpop.f32.mrb[5].mxu1  ;;  %3481 = vmatprep.subr.bf16.mxu1 %v3791_v21 }
 0x1ac   :  { %v899_v11 = vadd.f32 %v4720_v30, %v898_v16  ;;  %v3436_v1 = vpop.f32.mrb[6].mxu1  ;;  %v3794_v16 = vld [vmem:[%s4185_s6 + $0x28] sm:$0xff]  }
 0x1ad   :  { %v910_v47 = vadd.f32 %v3436_v1, %v4720_v30  ;;  %v901_v34 = vpop.f32.mrb[7].mxu1  ;;  %v951_v39 = vmax.f32 %v907_v7, 0.0  ;;  %v3795_v1 = vld [vmem:[%s4185_s6 + $0x30] sm:$0xff]  }
 0x1ae   :  { %v902_v17 = vadd.f32 %v4720_v30, %v901_v34  ;;  %3482 = vmatpush3.bf16.msra.mxu1 %v3791_v21  ;;  %v949_v20 = vmax.f32 %v899_v11, 0.0  ;;  %v3796_v11 = vld [vmem:[%s4185_s6 + $0x38] sm:$0xff]   ;;  %s4109_s6 = smov [#allocation2]  }
 0x1af   :  { %v952_v8 = vmax.f32 %v910_v47, 0.0  ;;  %3483 = vmatprep.subr.bf16.mxu1 %v3792_v43  ;;  %s3122_s12 = sshll.u32 %s4109_s6, 4  ;;  %s3123_s12 = int_to_ptr.vmem [resolvable:$true] %s3122_s12 }
 0x1b0   :  { %v950_v52 = vmax.f32 %v902_v17, 0.0  ;;  %p4060_p1 = scmp.lt.s32.totalorder %s3123_s12, %s3123_s12 }
 0x1b1   :  { %v988_v62 = vpack.c.bf16 %v952_v8, %v951_v39 }
 0x1b2   :  { %v987_v61 = vpack.c.bf16 %v950_v52, %v949_v20  ;;  %3484 = vmatpush3.bf16.msra.mxu1 %v3792_v43  ;;  %v3812_v52 = vld [vmem:[%s5385_s5] sm:$0xff]  }
 0x1b3   :  { %3485 = vmatprep.subr.bf16.mxu1 %v3793_v12 }
 0x1b4   :  { %3465 = vmatprep.mubr.bf16.mxu1 %v987_v61 }
 0x1b5   :  { %3466 = vmatmul.mubr.bf16.gmra.mrb[20].mxu1 %v988_v62 }
 0x1b6   :  { %3486 = vmatpush3.bf16.msra.mxu1 %v3793_v12 }
 0x1b7   :  { %3487 = vmatprep.subr.bf16.mxu1 %v3794_v16 }
 0x1ba   :  { %v3439_v21 = vpop.f32.mrb[8].mxu1  ;;  %3488 = vmatpush3.bf16.msra.mxu1 %v3794_v16 }
 0x1bb   :  { %v923_v7 = vadd.f32 %v3439_v21, %v4720_v30  ;;  %v914_v47 = vpop.f32.mrb[9].mxu1  ;;  %3489 = vmatprep.subr.bf16.mxu1 %v3795_v1 }
 0x1bc   :  { %v915_v34 = vadd.f32 %v4720_v30, %v914_v47  ;;  %v3440_v17 = vpop.f32.mrb[10].mxu1 }
 0x1bd   :  { %v926_v43 = vadd.f32 %v3440_v17, %v4720_v30  ;;  %v917_v39 = vpop.f32.mrb[11].mxu1  ;;  %v955_v12 = vmax.f32 %v923_v7, 0.0 }
 0x1be   :  { %v918_v8 = vadd.f32 %v4720_v30, %v917_v39  ;;  %3490 = vmatpush3.bf16.msra.mxu1 %v3795_v1  ;;  %v953_v62 = vmax.f32 %v915_v34, 0.0 }
 0x1bf   :  { %v956_v20 = vmax.f32 %v926_v43, 0.0  ;;  %3491 = vmatprep.subr.bf16.mxu1 %v3796_v11 }
 0x1c0   :  { %v954_v61 = vmax.f32 %v918_v8, 0.0 }
 0x1c1   :  { %v990_v16 = vpack.c.bf16 %v956_v20, %v955_v12 }
 0x1c2   :  { %v989_v21 = vpack.c.bf16 %v954_v61, %v953_v62  ;;  %3492 = vmatpush3.bf16.msra.mxu1 %v3796_v11 }
 0x1c3   :  { %3509 = vmatprep.subr.bf16.mxu1 %v3812_v52 }
 0x1c4   :  { %3469 = vmatprep.mubr.bf16.mxu1 %v989_v21 }
 0x1c5   :  { %3470 = vmatmul.mubr.bf16.gmra.mrb[24].mxu1 %v990_v16  ;;  %v3813_v16 = vld [vmem:[%s5385_s5 + $0x8] sm:$0xff]  }
 0x1ca   :  { %v3443_v47 = vpop.f32.mrb[12].mxu1 }
 0x1cb   :  { %v939_v5 = vadd.f32 %v3443_v47, %v4720_v30  ;;  %v930_v17 = vpop.f32.mrb[13].mxu1 }
 0x1cc   :  { %v931_v39 = vadd.f32 %v4720_v30, %v930_v17  ;;  %v3444_v1 = vpop.f32.mrb[14].mxu1 }
 0x1cd   :  { %v942_v7 = vadd.f32 %v3444_v1, %v4720_v30  ;;  %v933_v43 = vpop.f32.mrb[15].mxu1  ;;  %v959_v8 = vmax.f32 %v939_v5, 0.0  ;;  %v3817_v5 = vld [vmem:[%s5385_s5 + $0x10] sm:$0xff]  }
 0x1ce   :  { %v934_v34 = vadd.f32 %v4720_v30, %v933_v43  ;;  %v957_v11 = vmax.f32 %v931_v39, 0.0  ;;  %v3818_v30 = vld [vmem:[%s5385_s5 + $0x18] sm:$0xff]  }
 0x1cf   :  { %v960_v12 = vmax.f32 %v942_v7, 0.0 }
 0x1d0   :  { %v958_v20 = vmax.f32 %v934_v34, 0.0 }
 0x1d1   :  { %v992_v62 = vpack.c.bf16 %v960_v12, %v959_v8 }
 0x1d2   :  { %v991_v61 = vpack.c.bf16 %v958_v20, %v957_v11 }
 0x1d4   :  { %3473 = vmatprep.mubr.bf16.mxu1 %v991_v61 }
 0x1d5   :  { %3474 = vmatmul.mubr.bf16.gmra.mrb[28].mxu1 %v992_v62  ;;  %v3829_v62 = vld [vmem:[%s5386_s9] ss:$8 sps:$4 sm:$0xff]  }
 0x1d6   :  { %3493 = vmatprep.mubr.bf16.mxu1 %v4675_v60  ;;  %v3822_v60 = vld [vmem:[%s5385_s5 + $0x20] sm:$0xff]  }
 0x1dd   :  { %3494 = vmatmul.mubr.bf16.vlgmr.msra.gmra.mrb[16].mxu1 %v4680_v33  ;;  %v3824_v33 = vld [vmem:[%s4205_s4 + $0x70] ss:$8 sps:$4 sm:$0xff]  }
 0x1de   :  { %3497 = vmatprep.mubr.bf16.mxu1 %v4684_v44  ;;  %3510 = vmatpush3.bf16.msra.mxu1 %v3812_v52  ;;  %v3823_v44 = vld [vmem:[%s5385_s5 + $0x28] sm:$0xff]   ;;  %v3828_v52 = vld [vmem:[%s5385_s5 + $0x38] sm:$0xff]  }
 0x1df   :  { %3511 = vmatprep.subr.bf16.mxu1 %v3813_v16 }
 0x1e2   :  { %3512 = vmatpush3.bf16.msra.mxu1 %v3813_v16 }
 0x1e3   :  { %3513 = vmatprep.subr.bf16.mxu1 %v3817_v5 }
 0x1e5   :  { %3498 = vmatmul.mubr.bf16.gmra.mrb[20].mxu1 %v4687_v2  ;;  %v3827_v2 = vld [vmem:[%s5385_s5 + $0x30] sm:$0xff]  }
 0x1e6   :  { %3501 = vmatprep.mubr.bf16.mxu1 %v4691_v42  ;;  %3514 = vmatpush3.bf16.msra.mxu1 %v3817_v5  ;;  %v3826_v42 = vld [vmem:[%s4205_s4 + $0x74] ss:$8 sps:$4 sm:$0xff]  }
 0x1e7   :  { %3515 = vmatprep.subr.bf16.mxu1 %v3818_v30  ;;  %1480 = vmatprep.subr.bf16.mxu0 %v3826_v42  ;;  %v3834_v5 = vld [vmem:[%s5386_s9 + $0x14] ss:$8 sps:$4 sm:$0xff]  }
 0x1e8   :  { %1481 = vmatpush1.bf16.msra.mxu0 %v3824_v33 }
 0x1ea   :  { %3516 = vmatpush3.bf16.msra.mxu1 %v3818_v30 }
 0x1eb   :  { %3517 = vmatprep.subr.bf16.mxu1 %v3822_v60 }
 0x1ed   :  { %3502 = vmatmul.mubr.bf16.gmra.mrb[24].mxu1 %v4695_v53  ;;  %v3831_v53 = vld [vmem:[%s5386_s9 + $0x4] ss:$8 sps:$4 sm:$0xff]  }
 0x1ee   :  { %3505 = vmatprep.mubr.bf16.mxu1 %v4704_v6  ;;  %3518 = vmatpush3.bf16.msra.mxu1 %v3822_v60  ;;  %v4766_v6 = vld [vmem:[%s5387_s13] ss:$0 sm:$0xff] }
 0x1ef   :  { %3519 = vmatprep.subr.bf16.mxu1 %v3823_v44  ;;  %1659 = vmatprep.subr.bf16.mxu0 %v3831_v53 }
 0x1f2   :  { %3520 = vmatpush3.bf16.msra.mxu1 %v3823_v44 }
 0x1f3   :  { %3521 = vmatprep.subr.bf16.mxu1 %v3827_v2 }
 0x1f5   :  { %3506 = vmatmul.mubr.bf16.gmra.mrb[28].mxu1 %v4712_v28 }
 0x1f6   :  { %3522 = vmatpush3.bf16.msra.mxu1 %v3827_v2 }
 0x1f7   :  { %3523 = vmatprep.subr.bf16.mxu1 %v3828_v52 }
 0x1fa   :  { %3524 = vmatpush3.bf16.msra.mxu1 %v3828_v52  ;;  %v3832_v52 = vld [vmem:[%s5386_s9 + $0x10] ss:$8 sps:$4 sm:$0xff]  }
 0x2b0   :  { %v3495_v21 = vpop.f32.mrb[16].mxu1 }
 0x2b1   :  { %v1308_v47 = vadd.f32 %v3495_v21, %v4766_v6  ;;  %v1236_v28 = vpop.f32.mrb[17].mxu1  ;;  %v5388_v21 = vmov 0  }
 0x2b2   :  { %v1306_v17 = vadd.f32 %v4766_v6, %v1236_v28  ;;  %v3496_v39 = vpop.f32.mrb[18].mxu1 }
 0x2b3   :  { %v1309_v1 = vadd.f32 %v3496_v39, %v4766_v6  ;;  %v1239_v7 = vpop.f32.mrb[19].mxu1  ;;  %v1324_v34 = vmax.f32 %v1308_v47, 0.0  ;;  %v3837_v47 = vld [vmem:[%s5386_s9 + $0x24] ss:$8 sps:$4 sm:$0xff]  }
 0x2b4   :  { %v1307_v43 = vadd.f32 %v4766_v6, %v1239_v7  ;;  %v1322_v12 = vmax.f32 %v1306_v17, 0.0 }
 0x2b5   :  { %v1325_v8 = vmax.f32 %v1309_v1, 0.0 }
 0x2b6   :  { %v1323_v11 = vmax.f32 %v1307_v43, 0.0 }
 0x2b7   :  { %v1339_v20 = vpack.c.bf16 %v1325_v8, %v1324_v34  ;;  %v3835_v8 = vld [vmem:[%s5386_s9 + $0x20] ss:$8 sps:$4 sm:$0xff]  }
 0x2b8   :  { %v1338_v61 = vpack.c.bf16 %v1323_v11, %v1322_v12  ;;  %v3499_v16 = vpop.f32.mrb[20].mxu1 }
 0x2b9   :  { %v1312_v30 = vadd.f32 %v3499_v16, %v4766_v6  ;;  %v1252_v60 = vpop.f32.mrb[21].mxu1 }
 0x2ba   :  { %v1310_v44 = vadd.f32 %v4766_v6, %v1252_v60  ;;  %v3500_v2 = vpop.f32.mrb[22].mxu1  ;;  %1499 = vmatmul.mubr.bf16.vlgmr.msra.gmra.mrb[32].mxu0 %v1338_v61  ;;  %3525 = vmatprep.mubr.bf16.mxu1 %v1338_v61 }
 0x2bb   :  { %v1313_v33 = vadd.f32 %v3500_v2, %v4766_v6  ;;  %1660 = vmatpush1.bf16.msra.mxu0 %v3829_v62  ;;  %v1255_v42 = vpop.f32.mrb[23].mxu1  ;;  %3526 = vmatmul.mubr.bf16.vlgmr.msra.gmra.mrb[32].mxu1 %v1339_v20  ;;  %v1328_v28 = vmax.f32 %v1312_v30, 0.0  ;;  %v3840_v62 = vld [vmem:[%s5386_s9 + $0x34] ss:$8 sps:$4 sm:$0xff]  }
 0x2bc   :  { %v1311_v53 = vadd.f32 %v4766_v6, %v1255_v42  ;;  %1508 = vmatprep.mubr.bf16.mxu0 %v5388_v21  ;;  %1661 = vmatprep.subr.bf16.mxu0 %v3834_v5  ;;  %v1326_v39 = vmax.f32 %v1310_v44, 0.0  ;;  %v3838_v44 = vld [vmem:[%s5386_s9 + $0x30] ss:$8 sps:$4 sm:$0xff]   ;;  %v3843_v42 = vld [vmem:[%s5386_s9 + $0x44] ss:$8 sps:$4 sm:$0xff]  }
 0x2bd   :  { %v1329_v17 = vmax.f32 %v1313_v33, 0.0 }
 0x2be   :  { %v1327_v1 = vmax.f32 %v1311_v53, 0.0 }
 0x2bf   :  { %v1341_v7 = vpack.c.bf16 %v1329_v17, %v1328_v28  ;;  %1662 = vmatpush1.bf16.msra.mxu0 %v3832_v52  ;;  %v3841_v17 = vld [vmem:[%s5386_s9 + $0x40] ss:$8 sps:$4 sm:$0xff]  }
 0x2c0   :  { %v1340_v43 = vpack.c.bf16 %v1327_v1, %v1326_v39  ;;  %v3503_v34 = vpop.f32.mrb[24].mxu1  ;;  %1663 = vmatprep.subr.bf16.mxu0 %v3837_v47 }
 0x2c1   :  { %v1316_v12 = vadd.f32 %v3503_v34, %v4766_v6  ;;  %v1268_v11 = vpop.f32.mrb[25].mxu1  ;;  %v3846_v34 = vld [vmem:[%s5386_s9 + $0x54] ss:$8 sps:$4 sm:$0xff]  }
 0x2c2   :  { %v1314_v61 = vadd.f32 %v4766_v6, %v1268_v11  ;;  %v3504_v16 = vpop.f32.mrb[26].mxu1  ;;  %1509 = vmatmul.mubr.bf16.gmra.mrb[36].mxu0 %v1339_v20  ;;  %3529 = vmatprep.mubr.bf16.mxu1 %v1340_v43 }
 0x2c3   :  { %v1317_v5 = vadd.f32 %v3504_v16, %v4766_v6  ;;  %v1271_v30 = vpop.f32.mrb[27].mxu1  ;;  %3530 = vmatmul.mubr.bf16.gmra.mrb[36].mxu1 %v1341_v7  ;;  %1518 = vmatprep.mubr.bf16.mxu0 %v5388_v21  ;;  %v1332_v2 = vmax.f32 %v1316_v12, 0.0  ;;  %v3844_v16 = vld [vmem:[%s5386_s9 + $0x50] ss:$8 sps:$4 sm:$0xff]  }
 0x2c4   :  { %v1315_v60 = vadd.f32 %v4766_v6, %v1271_v30  ;;  %1664 = vmatpush1.bf16.msra.mxu0 %v3835_v8  ;;  %v1330_v52 = vmax.f32 %v1314_v61, 0.0 }
 0x2c5   :  { %v1333_v33 = vmax.f32 %v1317_v5, 0.0  ;;  %1665 = vmatprep.subr.bf16.mxu0 %v3840_v62 }
 0x2c6   :  { %v1331_v53 = vmax.f32 %v1315_v60, 0.0  ;;  %v3849_v60 = vld [vmem:[%s5386_s9 + $0x64] ss:$8 sps:$4 sm:$0xff]  }
 0x2c7   :  { %v1343_v20 = vpack.c.bf16 %v1333_v33, %v1332_v2 }
 0x2c8   :  { %v1342_v47 = vpack.c.bf16 %v1331_v53, %v1330_v52  ;;  %v3507_v28 = vpop.f32.mrb[28].mxu1  ;;  %1666 = vmatpush1.bf16.msra.mxu0 %v3838_v44  ;;  %v3852_v52 = vld [vmem:[%s5386_s9 + $0x74] ss:$8 sps:$4 sm:$0xff]   ;;  %v4811_v53 = vld [vmem:[%s5389_s29 + $0x8] sm:$0xff] }
 0x2c9   :  { %v1320_v39 = vadd.f32 %v3507_v28, %v4766_v6  ;;  %v1284_v1 = vpop.f32.mrb[29].mxu1  ;;  %1667 = vmatprep.subr.bf16.mxu0 %v3843_v42  ;;  %v3847_v42 = vld [vmem:[%s5386_s9 + $0x60] ss:$8 sps:$4 sm:$0xff]   ;;  %v4820_v28 = vld [vmem:[%s5389_s29 + $0x18] sm:$0xff] }
 0x2ca   :  { %v1318_v8 = vadd.f32 %v4766_v6, %v1284_v1  ;;  %v3508_v12 = vpop.f32.mrb[30].mxu1  ;;  %1519 = vmatmul.mubr.bf16.gmra.mrb[40].mxu0 %v1340_v43  ;;  %3533 = vmatprep.mubr.bf16.mxu1 %v1342_v47  ;;  %v4829_v1 = vld [vmem:[%s5389_s29 + $0x28] sm:$0xff] }
 0x2cb   :  { %v1321_v11 = vadd.f32 %v3508_v12, %v4766_v6  ;;  %v1287_v62 = vpop.f32.mrb[31].mxu1  ;;  %3534 = vmatmul.mubr.bf16.gmra.mrb[40].mxu1 %v1343_v20  ;;  %1528 = vmatprep.mubr.bf16.mxu0 %v5388_v21  ;;  %v1336_v5 = vmax.f32 %v1320_v39, 0.0  ;;  %v4826_v39 = vld [vmem:[%s5389_s29 + $0x20] sm:$0xff]  ;;  %v4838_v12 = vld [vmem:[%s5389_s29 + $0x38] sm:$0xff] }
 0x2cc   :  { %v1319_v61 = vadd.f32 %v4766_v6, %v1287_v62  ;;  %1668 = vmatpush1.bf16.msra.mxu0 %v3841_v17  ;;  %v1334_v44 = vmax.f32 %v1318_v8, 0.0  ;;  %v3850_v6 = vld [vmem:[%s5386_s9 + $0x70] ss:$8 sps:$4 sm:$0xff]   ;;  %v4844_v62 = vld [vmem:[%s5389_s29 + $0x40] sm:$0xff] }
 0x2cd   :  { %v1337_v30 = vmax.f32 %v1321_v11, 0.0  ;;  %1669 = vmatprep.subr.bf16.mxu0 %v3846_v34  ;;  %v1348_v34 = vpack.c.bf16 %v4829_v1, %v4826_v39  ;;  %v4835_v8 = vld [vmem:[%s5389_s29 + $0x30] sm:$0xff] }
 0x2ce   :  { %v1335_v43 = vmax.f32 %v1319_v61, 0.0  ;;  %v1349_v11 = vpack.c.bf16 %v4838_v12, %v4835_v8  ;;  %v4847_v61 = vld [vmem:[%s5389_s29 + $0x48] sm:$0xff] }
 0x2cf   :  { %v1345_v2 = vpack.c.bf16 %v1337_v30, %v1336_v5  ;;  %v4853_v5 = vld [vmem:[%s5389_s29 + $0x50] sm:$0xff]  ;;  %v4856_v30 = vld [vmem:[%s5389_s29 + $0x58] sm:$0xff] }
 0x2d0   :  { %v1344_v33 = vpack.c.bf16 %v1335_v43, %v1334_v44  ;;  %1670 = vmatpush1.bf16.msra.mxu0 %v3844_v16  ;;  %v1350_v16 = vpack.c.bf16 %v4847_v61, %v4844_v62  ;;  %5391 = vst [vmem:[#allocation48_spill] sm:$0xff] %v4853_v5  ;;  %5392 = vst [vmem:[#allocation49_spill] sm:$0xff] %v4856_v30  ;;  %v4862_v44 = vld [vmem:[%s5389_s29 + $0x60] sm:$0xff]  ;;  %v4865_v43 = vld [vmem:[%s5389_s29 + $0x68] sm:$0xff] }
 0x2d1   :  { %1671 = vmatprep.subr.bf16.mxu0 %v3849_v60  ;;  %v1351_v60 = vpack.c.bf16 %v4856_v30, %v4853_v5  ;;  %5393 = vst [vmem:[#allocation50_spill] sm:$0xff] %v4862_v44  ;;  %5394 = vst [vmem:[#allocation51_spill] sm:$0xff] %v4865_v43 }
 0x2d2   :  { %1529 = vmatmul.mubr.bf16.gmra.mrb[44].mxu0 %v1341_v7  ;;  %3537 = vmatprep.mubr.bf16.mxu1 %v1344_v33  ;;  %v4808_v7 = vld [vmem:[%s5389_s29] sm:$0xff] }
 0x2d3   :  { %3538 = vmatmul.mubr.bf16.gmra.mrb[44].mxu1 %v1345_v2  ;;  %1538 = vmatprep.mubr.bf16.mxu0 %v5388_v21 }
 0x2d4   :  { %1672 = vmatpush1.bf16.msra.mxu0 %v3847_v42  ;;  %v4874_v42 = vld [vmem:[%s5389_s29 + $0x78] sm:$0xff] }
 0x2d5   :  { %1673 = vmatprep.subr.bf16.mxu0 %v3852_v52  ;;  %5396 = vst [vmem:[#allocation53_spill] sm:$0xff] %v4874_v42 }
 0x2d8   :  { %1674 = vmatpush1.bf16.msra.mxu0 %v3850_v6  ;;  %v3853_v6 = vld [vmem:[%s5390_s3] sm:$0xff]  }
 0x2d9   :  { %3541 = vmatprep.subr.bf16.mxu1 %v3853_v6 }
 0x2da   :  { %1539 = vmatmul.mubr.bf16.gmra.mrb[48].mxu0 %v1342_v47  ;;  %v1346_v47 = vpack.c.bf16 %v4811_v53, %v4808_v7  ;;  %3542 = vmatpush3.bf16.msra.mxu1 %v3853_v6  ;;  %v4037_v6 = vld [vmem:[%s4210_s25] sm:$0x3]  ;;  %s5433_s25 = sld [smem:[#allocation14_spill]] }
 0x2db   :  { %1548 = vmatprep.mubr.bf16.mxu0 %v5388_v21 }
 0x2e2   :  { %1549 = vmatmul.mubr.bf16.gmra.mrb[52].mxu0 %v1343_v20  ;;  %v4817_v20 = vld [vmem:[%s5389_s29 + $0x10] sm:$0xff] }
 0x2e3   :  { %1558 = vmatprep.mubr.bf16.mxu0 %v5388_v21  ;;  %v1347_v17 = vpack.c.bf16 %v4820_v28, %v4817_v20 }
 0x2ea   :  { %1559 = vmatmul.mubr.bf16.gmra.mrb[56].mxu0 %v1344_v33  ;;  %v4871_v33 = vld [vmem:[%s5389_s29 + $0x70] sm:$0xff] }
 0x2eb   :  { %1568 = vmatprep.mubr.bf16.mxu0 %v5388_v21  ;;  %5395 = vst [vmem:[#allocation52_spill] sm:$0xff] %v4871_v33  ;;  %v1353_v52 = vpack.c.bf16 %v4874_v42, %v4871_v33 }
 0x2f2   :  { %1569 = vmatmul.mubr.bf16.gmra.mrb[60].mxu0 %v1345_v2  ;;  %v1352_v2 = vpack.c.bf16 %v4865_v43, %v4862_v44 }
 0x2f3   :  { %1691 = vmatprep.mubr.bf16.mxu0 %v5388_v21 }
 0x2fa   :  { %1692 = vmatmul.mubr.bf16.vlgmr.msra.gmra.mrb[32].mxu0 %v1346_v47  ;;  %v3854_v47 = vld [vmem:[%s5390_s3 + $0x8] sm:$0xff]  }
 0x2fb   :  { %1701 = vmatprep.mubr.bf16.mxu0 %v5388_v21  ;;  %3543 = vmatprep.subr.bf16.mxu1 %v3854_v47 }
 0x2fc   :  { %3544 = vmatpush3.bf16.msra.mxu1 %v3854_v47 }
 0x302   :  { %1702 = vmatmul.mubr.bf16.gmra.mrb[36].mxu0 %v1347_v17  ;;  %v3855_v17 = vld [vmem:[%s5390_s3 + $0x10] sm:$0xff]  }
 0x303   :  { %1711 = vmatprep.mubr.bf16.mxu0 %v5388_v21  ;;  %3545 = vmatprep.subr.bf16.mxu1 %v3855_v17 }
 0x304   :  { %3546 = vmatpush3.bf16.msra.mxu1 %v3855_v17  ;;  %v4038_v17 = vld [vmem:[%s4215_s21] sm:$0x3]  ;;  %s5432_s21 = sld [smem:[#allocation13_spill]] }
 0x30a   :  { %1712 = vmatmul.mubr.bf16.gmra.mrb[40].mxu0 %v1348_v34  ;;  %v3857_v34 = vld [vmem:[%s5390_s3 + $0x20] sm:$0xff]  }
 0x30b   :  { %1721 = vmatprep.mubr.bf16.mxu0 %v5388_v21 }
 0x312   :  { %1722 = vmatmul.mubr.bf16.gmra.mrb[44].mxu0 %v1349_v11  ;;  %v3858_v11 = vld [vmem:[%s5390_s3 + $0x28] sm:$0xff]  }
 0x313   :  { %1731 = vmatprep.mubr.bf16.mxu0 %v5388_v21 }
 0x31a   :  { %1732 = vmatmul.mubr.bf16.gmra.mrb[48].mxu0 %v1350_v16  ;;  %v3859_v16 = vld [vmem:[%s5390_s3 + $0x30] sm:$0xff]  }
 0x31b   :  { %1741 = vmatprep.mubr.bf16.mxu0 %v5388_v21 }
 0x322   :  { %1742 = vmatmul.mubr.bf16.gmra.mrb[52].mxu0 %v1351_v60  ;;  %v3860_v60 = vld [vmem:[%s5390_s3 + $0x38] sm:$0xff]  }
 0x323   :  { %1751 = vmatprep.mubr.bf16.mxu0 %v5388_v21 }
 0x32a   :  { %1752 = vmatmul.mubr.bf16.gmra.mrb[56].mxu0 %v1352_v2  ;;  %v4887_v2 = vld [vmem:[%s5397_s8] sm:$0xff]  }
 0x32b   :  { %1761 = vmatprep.mubr.bf16.mxu0 %v5388_v21  ;;  %v3856_v21 = vld [vmem:[%s5390_s3 + $0x18] sm:$0xff]  }
 0x32c   :  { %3547 = vmatprep.subr.bf16.mxu1 %v3856_v21 }
 0x32d   :  { %3548 = vmatpush3.bf16.msra.mxu1 %v3856_v21 }
 0x32e   :  { %3549 = vmatprep.subr.bf16.mxu1 %v3857_v34 }
 0x331   :  { %3550 = vmatpush3.bf16.msra.mxu1 %v3857_v34 }
 0x332   :  { %1762 = vmatmul.mubr.bf16.gmra.mrb[60].mxu0 %v1353_v52  ;;  %3551 = vmatprep.subr.bf16.mxu1 %v3858_v11  ;;  %v1780_v52 = vsub.s32 1, %v4298_v27 }
 0x334   :  { %v4892_v47 = vrot.slane %v4037_v6, %v1780_v52  ;;  %v4895_v21 = vrot.slane %v4038_v17, %v1780_v52  ;;  %v1925_v52 = vld [vmem:[%s5398_s14 + $0x8] sm:$0xff] }
 0x335   :  { %3552 = vmatpush3.bf16.msra.mxu1 %v3858_v11 }
 0x336   :  { %3553 = vmatprep.subr.bf16.mxu1 %v3859_v16  ;;  %v1785_v11 = vmul.f32 %v4892_v47, %v4385_v19  ;;  %v1861_v33 = vmul.f32 %v4895_v21, %v4383_v18  ;;  %v1787_v27 = vmul.f32 %v4892_v47, %v4401_v26 }
 0x339   :  { %3554 = vmatpush3.bf16.msra.mxu1 %v3859_v16 }
 0x33a   :  { %3555 = vmatprep.subr.bf16.mxu1 %v3860_v60 }
 0x33d   :  { %3556 = vmatpush3.bf16.msra.mxu1 %v3860_v60 }
 0x33e   :  { %3573 = vmatprep.subr.bf16.mxu1 %v4887_v2 }
 0x3cd   :  { %v1693_v34 = vpop.f32.mrb[32].mxu0 }
 0x3ce   :  { %v1816_v16 = vadd.f32 %v4393_v22, %v1693_v34  ;;  %v1695_v60 = vpop.f32.mrb[33].mxu0  ;;  %v1863_v22 = vmul.f32 %v4895_v21, %v4399_v25 }
 0x3cf   :  { %v1817_v42 = vadd.f32 %v1785_v11, %v1695_v60  ;;  %v1697_v43 = vpop.f32.mrb[34].mxu0  ;;  %v1927_v11 = vld [vmem:[%s5398_s14 + $0x18] sm:$0xff] }
 0x3d0   :  { %v4905_v6 = vadd.f32 %v4397_v23, %v1816_v16  ;;  %v1818_v17 = vadd.f32 %v4412_v31, %v1697_v43  ;;  %v1699_v44 = vpop.f32.mrb[35].mxu0  ;;  %v1789_v16 = vmul.f32 %v4892_v47, %v4421_v36 }
 0x3d1   :  { %v1893_v30 = vadd.f32 %v1861_v33, %v1817_v42  ;;  %v1819_v19 = vadd.f32 %v1787_v27, %v1699_v44  ;;  %v1791_v44 = vmul.f32 %v4892_v47, %v4419_v35  ;;  %v1929_v27 = vld [vmem:[%s5398_s14 + $0x28] sm:$0xff] }
 0x3d2   :  { %v4912_v34 = vadd.f32 %v4416_v32, %v1818_v17 }
 0x3d3   :  { %v1957_v60 = vadd.f32 %v1925_v52, %v1893_v30  ;;  %v1895_v18 = vadd.f32 %v1863_v22, %v1819_v19  ;;  %v1865_v30 = vmul.f32 %v4895_v21, %v4438_v46 }
 0x3d5   :  { %v1989_v26 = vsub.f32 0.0, %v1957_v60  ;;  %v1959_v5 = vadd.f32 %v1927_v11, %v1895_v18  ;;  %v1703_v23 = vpop.f32.mrb[36].mxu0  ;;  %v1931_v60 = vld [vmem:[%s5398_s14 + $0x38] sm:$0xff] }
 0x3d6   :  { %v1820_v31 = vadd.f32 %v4426_v38, %v1703_v23  ;;  %v1705_v43 = vpop.f32.mrb[37].mxu0  ;;  %v1867_v38 = vmul.f32 %v4895_v21, %v4436_v45 }
 0x3d7   :  { %v2022_v33 = vmul.f32 1.442695, %v1989_v26  ;;  %v1991_v32 = vsub.f32 0.0, %v1959_v5  ;;  %v1821_v42 = vadd.f32 %v1789_v16, %v1705_v43  ;;  %v1707_v19 = vpop.f32.mrb[38].mxu0 }
 0x3d8   :  { %v4923_v18 = vadd.f32 %v4446_v50, %v1820_v31  ;;  %v1822_v52 = vadd.f32 %v4430_v40, %v1707_v19  ;;  %v1709_v17 = vpop.f32.mrb[39].mxu0  ;;  %v1793_v40 = vmul.f32 %v4892_v47, %v4454_v55 }
 0x3d9   :  { %3877 = vpow2.f32 %v2022_v33  ;;  %v2026_v22 = vmul.f32 1.442695, %v1991_v32  ;;  %v1897_v11 = vadd.f32 %v1865_v30, %v1821_v42  ;;  %v1823_v26 = vadd.f32 %v1791_v44, %v1709_v17  ;;  %v1933_v17 = vld [vmem:[%s5398_s14 + $0x48] sm:$0xff] }
 0x3da   :  { %v4930_v5 = vadd.f32 %v4450_v51, %v1822_v52  ;;  %v1795_v44 = vmul.f32 %v4892_v47, %v4452_v54  ;;  %v1869_v30 = vmul.f32 %v4895_v21, %v4472_v3 }
 0x3db   :  { %3879 = vpow2.f32 %v2026_v22  ;;  %v1961_v23 = vadd.f32 %v1929_v27, %v1897_v11  ;;  %v1899_v50 = vadd.f32 %v1867_v38, %v1823_v26 }
 0x3dd   :  { %v1993_v16 = vsub.f32 0.0, %v1961_v23  ;;  %v1963_v31 = vadd.f32 %v1931_v60, %v1899_v50  ;;  %v1713_v43 = vpop.f32.mrb[40].mxu0  ;;  %v1871_v60 = vmul.f32 %v4895_v21, %v4470_v0  ;;  %v1935_v50 = vld [vmem:[%s5398_s14 + $0x58] sm:$0xff] }
 0x3de   :  { %v1824_v19 = vadd.f32 %v4460_v58, %v1713_v43  ;;  %v1715_v33 = vpop.f32.mrb[41].mxu0 }
 0x3df   :  { %v2030_v51 = vmul.f32 1.442695, %v1993_v16  ;;  %v1995_v32 = vsub.f32 0.0, %v1963_v31  ;;  %v1825_v42 = vadd.f32 %v1793_v40, %v1715_v33  ;;  %v1717_v27 = vpop.f32.mrb[42].mxu0 }
 0x3e0   :  { %v4941_v52 = vadd.f32 %v4481_v9, %v1824_v19  ;;  %v1826_v38 = vadd.f32 %v4464_v59, %v1717_v27  ;;  %v1719_v22 = vpop.f32.mrb[43].mxu0  ;;  %v1799_v27 = vmul.f32 %v4892_v47, %v4487_v13 }
 0x3e1   :  { %v2034_v58 = vmul.f32 1.442695, %v1995_v32  ;;  %v1901_v11 = vadd.f32 %v1869_v30, %v1825_v42  ;;  %v1827_v26 = vadd.f32 %v1795_v44, %v1719_v22  ;;  %3881 = vpow2.f32 %v2030_v51 }
 0x3e2   :  { %v4948_v23 = vadd.f32 %v4485_v10, %v1826_v38  ;;  %v1797_v51 = vmul.f32 %v4892_v47, %v4489_v14  ;;  %v1873_v38 = vmul.f32 %v4895_v21, %v4509_v41 }
 0x3e3   :  { %v3878_v16 = vpop.eup %3877  ;;  %v1965_v31 = vadd.f32 %v1933_v17, %v1901_v11  ;;  %v1903_v43 = vadd.f32 %v1871_v60, %v1827_v26  ;;  %3883 = vpow2.f32 %v2034_v58  ;;  %v1937_v60 = vld [vmem:[%s5398_s14 + $0x68] sm:$0xff] }
 0x3e4   :  { %v2085_v9 = vadd.f32 1.0, %v3878_v16 }
 0x3e5   :  { %v3880_v40 = vpop.eup %3879  ;;  %v1967_v19 = vadd.f32 %v1935_v50, %v1903_v43  ;;  %v1723_v59 = vpop.f32.mrb[44].mxu0  ;;  %v1997_v44 = vsub.f32 0.0, %v1965_v31 }
 0x3e6   :  { %3885 = vrcp.f32 %v2085_v9  ;;  %v2087_v33 = vadd.f32 1.0, %v3880_v40  ;;  %v1725_v32 = vpop.f32.mrb[45].mxu0  ;;  %v1828_v10 = vadd.f32 %v4497_v24, %v1723_v59  ;;  %v1875_v24 = vmul.f32 %v4895_v21, %v4507_v37  ;;  %v1939_v9 = vld [vmem:[%s5398_s14 + $0x78] sm:$0xff] }
 0x3e7   :  { %v1999_v42 = vsub.f32 0.0, %v1967_v19  ;;  %v1727_v30 = vpop.f32.mrb[46].mxu0  ;;  %v1829_v17 = vadd.f32 %v1797_v51, %v1725_v32  ;;  %v2038_v16 = vmul.f32 1.442695, %v1997_v44  ;;  %v1801_v51 = vmul.f32 %v4892_v47, %v4526_v57 }
 0x3e8   :  { %3887 = vrcp.f32 %v2087_v33  ;;  %v1830_v22 = vadd.f32 %v4501_v29, %v1727_v30  ;;  %v1729_v58 = vpop.f32.mrb[47].mxu0  ;;  %v4960_v26 = vadd.f32 %v4518_v48, %v1828_v10 }
 0x3e9   :  { %v2042_v11 = vmul.f32 1.442695, %v1999_v42  ;;  %v1831_v50 = vadd.f32 %v1799_v27, %v1729_v58  ;;  %v1905_v31 = vadd.f32 %v1873_v38, %v1829_v17 }
 0x3ea   :  { %v4966_v43 = vadd.f32 %v4522_v49, %v1830_v22  ;;  %v1877_v22 = vmul.f32 %v4895_v21, %v4545_v15 }
 0x3eb   :  { %v1907_v40 = vadd.f32 %v1875_v24, %v1831_v50  ;;  %v3882_v19 = vpop.eup %3881  ;;  %v1969_v59 = vadd.f32 %v1937_v60, %v1905_v31  ;;  %3889 = vpow2.f32 %v2042_v11  ;;  %v1803_v11 = vmul.f32 %v4892_v47, %v4524_v56  ;;  %v1941_v24 = vld [vmem:[%s5398_s14 + $0x88] sm:$0xff] }
 0x3ec   :  { %3891 = vpow2.f32 %v2038_v16  ;;  %v2089_v44 = vadd.f32 1.0, %v3882_v19  ;;  %v5399_v16 = vld [vmem:[#allocation20_spill] sm:$0xff] }
 0x3ed   :  { %v1971_v29 = vadd.f32 %v1939_v9, %v1907_v40  ;;  %v1733_v33 = vpop.f32.mrb[48].mxu0  ;;  %v2001_v48 = vsub.f32 0.0, %v1969_v59  ;;  %v3884_v42 = vpop.eup %3883 }
 0x3ee   :  { %v1735_v32 = vpop.f32.mrb[49].mxu0  ;;  %v1832_v49 = vadd.f32 %v4533_v63, %v1733_v33  ;;  %v5400_v63 = vld [vmem:[#allocation21_spill] sm:$0xff]  ;;  %v2091_v19 = vadd.f32 1.0, %v3884_v42  ;;  %v5401_v33 = vld [vmem:[#allocation23_spill] sm:$0xff] }
 0x3ef   :  { %v2003_v10 = vsub.f32 0.0, %v1971_v29  ;;  %v1737_v30 = vpop.f32.mrb[50].mxu0  ;;  %v2046_v17 = vmul.f32 1.442695, %v2001_v48  ;;  %v1833_v38 = vadd.f32 %v1801_v51, %v1735_v32  ;;  %v1879_v9 = vmul.f32 %v4895_v21, %v5400_v63  ;;  %v1943_v32 = vld [vmem:[%s5398_s14 + $0x98] sm:$0xff] }
 0x3f0   :  { %v3886_v27 = vpop.eup %3885  ;;  %v1739_v58 = vpop.f32.mrb[51].mxu0  ;;  %v4977_v50 = vadd.f32 %v4554_v4, %v1832_v49  ;;  %v1834_v31 = vadd.f32 %v5399_v16, %v1737_v30 }
 0x3f1   :  { %v2050_v60 = vmul.f32 1.442695, %v2003_v10  ;;  %3893 = vpow2.f32 %v2046_v17  ;;  %v1909_v59 = vadd.f32 %v1877_v22, %v1833_v38  ;;  %v1835_v29 = vadd.f32 %v1803_v11, %v1739_v58  ;;  %v5402_v22 = vld [vmem:[#allocation25_spill] sm:$0xff] }
 0x3f2   :  { %v3888_v40 = vpop.eup %3887  ;;  %3895 = vrcp.f32 %v2089_v44  ;;  %v4984_v48 = vadd.f32 %v5401_v33, %v1834_v31  ;;  %v2180_v51 = vmul.f32 %v3886_v27, %v4808_v7  ;;  %v1805_v44 = vmul.f32 %v4892_v47, %v5402_v22  ;;  %v5404_v31 = vld [vmem:[#allocation24_spill] sm:$0xff] }
 0x3f3   :  { %v2181_v4 = vmul.f32 %v3888_v40, %v4811_v53  ;;  %3897 = vpow2.f32 %v2050_v60  ;;  %v1973_v10 = vadd.f32 %v1941_v24, %v1909_v59  ;;  %v1911_v49 = vadd.f32 %v1879_v9, %v1835_v29  ;;  %v5403_v53 = vld [vmem:[#allocation26_spill] sm:$0xff]  ;;  %v5406_v29 = vld [vmem:[#allocation27_spill] sm:$0xff] }
 0x3f4   :  { %3899 = vrcp.f32 %v2091_v19  ;;  %v1807_v9 = vmul.f32 %v4892_v47, %v5404_v31  ;;  %v5405_v19 = vld [vmem:[#allocation29_spill] sm:$0xff]  ;;  %v5409_v31 = vld [vmem:[#allocation31_spill] sm:$0xff] }
 0x3f5   :  { %v1743_v30 = vpop.f32.mrb[52].mxu0  ;;  %v2196_v16 = vpack.c.bf16 %v2181_v4, %v2180_v51  ;;  %v2005_v63 = vsub.f32 0.0, %v1973_v10  ;;  %v1975_v42 = vadd.f32 %v1943_v32, %v1911_v49  ;;  %v3890_v38 = vpop.eup %3889  ;;  %v1881_v59 = vmul.f32 %v4895_v21, %v5405_v19  ;;  %v5407_v32 = vld [vmem:[#allocation28_spill] sm:$0xff] }
 0x3f6   :  { %v1745_v17 = vpop.f32.mrb[53].mxu0  ;;  %v3892_v11 = vpop.eup %3891  ;;  %v1836_v60 = vadd.f32 %v5403_v53, %v1743_v30  ;;  %v1883_v51 = vmul.f32 %v4895_v21, %v5407_v32  ;;  %v2095_v4 = vadd.f32 1.0, %v3890_v38  ;;  %v1945_v30 = vld [vmem:[%s5398_s14 + $0xa8] sm:$0xff] }
 0x3f7   :  { %v1747_v58 = vpop.f32.mrb[54].mxu0  ;;  %3557 = vmatprep.mubr.bf16.mxu1 %v2196_v16  ;;  %v2054_v7 = vmul.f32 1.442695, %v2005_v63  ;;  %v2007_v27 = vsub.f32 0.0, %v1975_v42  ;;  %v1837_v40 = vadd.f32 %v1805_v44, %v1745_v17  ;;  %v5408_v63 = vld [vmem:[#allocation30_spill] sm:$0xff]  ;;  %v2093_v42 = vadd.f32 1.0, %v3892_v11 }
 0x3f8   :  { %v1749_v24 = vpop.f32.mrb[55].mxu0  ;;  %v1838_v33 = vadd.f32 %v5406_v29, %v1747_v58  ;;  %v5000_v49 = vadd.f32 %v5408_v63, %v1836_v60  ;;  %v1947_v44 = vld [vmem:[%s5398_s14 + $0xb8] sm:$0xff]  ;;  %v5410_v11 = vld [vmem:[#allocation33_spill] sm:$0xff] }
 0x3f9   :  { %v2058_v10 = vmul.f32 1.442695, %v2007_v27  ;;  %v1839_v16 = vadd.f32 %v1807_v9, %v1749_v24  ;;  %3901 = vpow2.f32 %v2054_v7  ;;  %v1913_v53 = vadd.f32 %v1881_v59, %v1837_v40 }
 0x3fa   :  { %v5004_v17 = vadd.f32 %v5409_v31, %v1838_v33  ;;  %v1809_v7 = vmul.f32 %v4892_v47, %v5410_v11  ;;  %v5411_v33 = vld [vmem:[#allocation34_spill] sm:$0xff] }
 0x3fb   :  { %v3894_v19 = vpop.eup %3893  ;;  %v1915_v15 = vadd.f32 %v1883_v51, %v1839_v16  ;;  %3903 = vpow2.f32 %v2058_v10  ;;  %v1977_v29 = vadd.f32 %v1945_v30, %v1913_v53  ;;  %v5412_v30 = vld [vmem:[#allocation32_spill] sm:$0xff] }
 0x3fc   :  { %v3896_v58 = vpop.eup %3895  ;;  %3905 = vrcp.f32 %v2095_v4  ;;  %v2097_v27 = vadd.f32 1.0, %v3894_v19  ;;  %v1811_v16 = vmul.f32 %v4892_v47, %v5412_v30 }
 0x3fd   :  { %v1753_v32 = vpop.f32.mrb[56].mxu0  ;;  %v3898_v38 = vpop.eup %3897  ;;  %v1979_v60 = vadd.f32 %v1947_v44, %v1915_v15  ;;  %3907 = vrcp.f32 %v2093_v42  ;;  %v2009_v24 = vsub.f32 0.0, %v1977_v29  ;;  %v5413_v15 = vld [vmem:[#allocation37_spill] sm:$0xff]  ;;  %v2182_v53 = vmul.f32 %v3896_v58, %v4817_v20  ;;  %v5414_v29 = vld [vmem:[#allocation38_spill] sm:$0xff] }
 0x3fe   :  { %v1755_v63 = vpop.f32.mrb[57].mxu0  ;;  %v3900_v9 = vpop.eup %3899  ;;  %v2099_v40 = vadd.f32 1.0, %v3898_v38  ;;  %v1840_v51 = vadd.f32 %v5411_v33, %v1753_v32  ;;  %v1885_v42 = vmul.f32 %v4895_v21, %v5413_v15  ;;  %3909 = vrcp.f32 %v2097_v27  ;;  %v1949_v38 = vld [vmem:[%s5398_s14 + $0xc8] sm:$0xff]  ;;  %v5417_v15 = vld [vmem:[#allocation36_spill] sm:$0xff] }
 0x3ff   :  { %v1757_v31 = vpop.f32.mrb[58].mxu0  ;;  %v2011_v59 = vsub.f32 0.0, %v1979_v60  ;;  %v2062_v4 = vmul.f32 1.442695, %v2009_v24  ;;  %v1841_v19 = vadd.f32 %v1809_v7, %v1755_v63  ;;  %v5415_v60 = vld [vmem:[#allocation35_spill] sm:$0xff]  ;;  %v2183_v30 = vmul.f32 %v3900_v9, %v4820_v28  ;;  %v5418_v28 = vld [vmem:[#allocation42_spill] sm:$0xff] }
 0x400   :  { %v1759_v10 = vpop.f32.mrb[59].mxu0  ;;  %v5016_v11 = vadd.f32 %v5414_v29, %v1840_v51  ;;  %v1842_v32 = vadd.f32 %v5415_v60, %v1757_v31  ;;  %v5416_v63 = vld [vmem:[#allocation39_spill] sm:$0xff]  ;;  %v1887_v20 = vmul.f32 %v4895_v21, %v5417_v15  ;;  %v1951_v31 = vld [vmem:[%s5398_s14 + $0xd8] sm:$0xff]  ;;  %v5419_v60 = vld [vmem:[#allocation41_spill] sm:$0xff] }
 0x401   :  { %v2066_v44 = vmul.f32 1.442695, %v2011_v59  ;;  %3911 = vpow2.f32 %v2062_v4  ;;  %v1917_v33 = vadd.f32 %v1885_v42, %v1841_v19  ;;  %v1843_v24 = vadd.f32 %v1811_v16, %v1759_v10 }
 0x402   :  { %3913 = vrcp.f32 %v2099_v40  ;;  %v5022_v7 = vadd.f32 %v5416_v63, %v1842_v32  ;;  %v2197_v59 = vpack.c.bf16 %v2183_v30, %v2182_v53  ;;  %v5421_v63 = vld [vmem:[#allocation40_spill] sm:$0xff] }
 0x403   :  { %v3902_v58 = vpop.eup %3901  ;;  %3915 = vpow2.f32 %v2066_v44  ;;  %v1981_v27 = vadd.f32 %v1949_v38, %v1917_v33  ;;  %v1919_v22 = vadd.f32 %v1887_v20, %v1843_v24  ;;  %v1813_v44 = vmul.f32 %v4892_v47, %v5419_v60  ;;  %v5420_v33 = vld [vmem:[#allocation47_spill] sm:$0xff] }
 0x404   :  { %v2101_v29 = vadd.f32 1.0, %v3902_v58  ;;  %3558 = vmatmul.mubr.bf16.vlgmr.msra.gmra.mrb[32].mxu1 %v2197_v59  ;;  %v1815_v20 = vmul.f32 %v4892_v47, %v5421_v63  ;;  %v5422_v58 = vld [vmem:[#allocation45_spill] sm:$0xff]  ;;  %v5425_v63 = vld [vmem:[#allocation44_spill] sm:$0xff] }
 0x405   :  { %v1763_v51 = vpop.f32.mrb[60].mxu0  ;;  %v3904_v19 = vpop.eup %3903  ;;  %v2013_v42 = vsub.f32 0.0, %v1981_v27  ;;  %3574 = vmatpush3.bf16.msra.mxu1 %v4887_v2  ;;  %v1983_v32 = vadd.f32 %v1951_v31, %v1919_v22  ;;  %v1889_v27 = vmul.f32 %v4895_v21, %v5422_v58  ;;  %v5424_v31 = vld [vmem:[#allocation46_spill] sm:$0xff] }
 0x406   :  { %v1765_v4 = vpop.f32.mrb[61].mxu0  ;;  %v1844_v9 = vadd.f32 %v5418_v28, %v1763_v51  ;;  %v3906_v10 = vpop.eup %3905  ;;  %3917 = vrcp.f32 %v2101_v29  ;;  %v2103_v16 = vadd.f32 1.0, %v3904_v19  ;;  %v5423_v51 = vld [vmem:[#allocation43_spill] sm:$0xff]  ;;  %v1953_v28 = vld [vmem:[%s5398_s14 + $0xe8] sm:$0xff] }
 0x407   :  { %v1767_v40 = vpop.f32.mrb[62].mxu0  ;;  %v3908_v30 = vpop.eup %3907  ;;  %v2070_v53 = vmul.f32 1.442695, %v2013_v42  ;;  %v1845_v59 = vadd.f32 %v1813_v44, %v1765_v4  ;;  %v2015_v19 = vsub.f32 0.0, %v1983_v32  ;;  %v2185_v2 = vmul.f32 %v3906_v10, %v4829_v1 }
 0x408   :  { %v1769_v38 = vpop.f32.mrb[63].mxu0  ;;  %v5032_v24 = vadd.f32 %v5420_v33, %v1844_v9  ;;  %3919 = vrcp.f32 %v2103_v16  ;;  %v1846_v29 = vadd.f32 %v5423_v51, %v1767_v40  ;;  %v3910_v42 = vpop.eup %3909  ;;  %v2184_v33 = vmul.f32 %v3908_v30, %v4826_v39  ;;  %v1955_v51 = vld [vmem:[%s5398_s14 + $0xf8] sm:$0xff] }
 0x409   :  { %v1921_v22 = vadd.f32 %v1889_v27, %v1845_v59  ;;  %v1847_v47 = vadd.f32 %v1815_v20, %v1769_v38  ;;  %v1891_v16 = vmul.f32 %v4895_v21, %v5425_v63  ;;  %3921 = vpow2.f32 %v2070_v53 }
 0x40a   :  { %v5042_v9 = vadd.f32 %v5424_v31, %v1846_v29  ;;  %v2198_v32 = vpack.c.bf16 %v2185_v2, %v2184_v33  ;;  %v2074_v1 = vmul.f32 1.442695, %v2015_v19  ;;  %v2186_v39 = vmul.f32 %v3910_v42, %v4835_v8  ;;  %v5426_v33 = vld [vmem:[#allocation48_spill] sm:$0xff] }
 0x40b   :  { %v3912_v15 = vpop.eup %3911  ;;  %v1985_v44 = vadd.f32 %v1953_v28, %v1921_v22  ;;  %v1923_v10 = vadd.f32 %v1891_v16, %v1847_v47  ;;  %v5427_v16 = vld [vmem:[#allocation49_spill] sm:$0xff] }
 0x40c   :  { %v3914_v4 = vpop.eup %3913  ;;  %v2105_v40 = vadd.f32 1.0, %v3912_v15  ;;  %3561 = vmatprep.mubr.bf16.mxu1 %v2198_v32 }
 0x40d   :  { %v3916_v58 = vpop.eup %3915  ;;  %v2017_v59 = vsub.f32 0.0, %v1985_v44  ;;  %v1987_v29 = vadd.f32 %v1955_v51, %v1923_v10  ;;  %v2187_v38 = vmul.f32 %v3914_v4, %v4838_v12 }
 0x40e   :  { %3923 = vrcp.f32 %v2105_v40  ;;  %v2107_v27 = vadd.f32 1.0, %v3916_v58 }
 0x40f   :  { %v2078_v21 = vmul.f32 1.442695, %v2017_v59  ;;  %v2019_v15 = vsub.f32 0.0, %v1987_v29  ;;  %v2199_v53 = vpack.c.bf16 %v2187_v38, %v2186_v39  ;;  %v5429_v29 = vld [vmem:[#allocation51_spill] sm:$0xff] }
 0x410   :  { %v3918_v30 = vpop.eup %3917  ;;  %3925 = vrcp.f32 %v2107_v27  ;;  %v5428_v27 = vld [vmem:[#allocation50_spill] sm:$0xff] }
 0x411   :  { %3927 = vpow2.f32 %v2074_v1  ;;  %v2082_v28 = vmul.f32 1.442695, %v2019_v15  ;;  %3562 = vmatmul.mubr.bf16.gmra.mrb[36].mxu1 %v2199_v53  ;;  %v2188_v19 = vmul.f32 %v3918_v30, %v4844_v62  ;;  %v5430_v15 = vld [vmem:[#allocation52_spill] sm:$0xff] }
 0x412   :  { %v3920_v20 = vpop.eup %3919  ;;  %3929 = vpow2.f32 %v2078_v21 }
 0x413   :  { %v2189_v58 = vmul.f32 %v3920_v20, %v4847_v61  ;;  %v3922_v2 = vpop.eup %3921  ;;  %3931 = vpow2.f32 %v2082_v28  ;;  %v5431_v20 = vld [vmem:[#allocation53_spill] sm:$0xff] }
 0x414   :  { %v2109_v12 = vadd.f32 1.0, %v3922_v2  ;;  %v3863_v2 = vld [vmem:[%s5397_s8 + $0x10] sm:$0xff]  }
 0x415   :  { %v2200_v22 = vpack.c.bf16 %v2189_v58, %v2188_v19  ;;  %v3862_v58 = vld [vmem:[%s5397_s8 + $0x8] sm:$0xff]  }
 0x416   :  { %3933 = vrcp.f32 %v2109_v12  ;;  %3575 = vmatprep.subr.bf16.mxu1 %v3862_v58  ;;  %v3866_v12 = vld [vmem:[%s5397_s8 + $0x28] sm:$0xff]  }
 0x417   :  { %3565 = vmatprep.mubr.bf16.mxu1 %v2200_v22  ;;  %3576 = vmatpush3.bf16.msra.mxu1 %v3862_v58  ;;  %v3864_v22 = vld [vmem:[%s5397_s8 + $0x18] sm:$0xff]  }
 0x418   :  { %v3924_v8 = vpop.eup %3923  ;;  %3577 = vmatprep.subr.bf16.mxu1 %v3863_v2 }
 0x419   :  { %v2190_v47 = vmul.f32 %v3924_v8, %v5426_v33  ;;  %v3865_v8 = vld [vmem:[%s5397_s8 + $0x20] sm:$0xff]  }
 0x41a   :  { %v3926_v42 = vpop.eup %3925  ;;  %v5066_v33 = vld [vmem:[%s4250_s27] sm:$0xff]  }
 0x41b   :  { %v3928_v31 = vpop.eup %3927  ;;  %v2191_v4 = vmul.f32 %v3926_v42, %v5427_v16  ;;  %3578 = vmatpush3.bf16.msra.mxu1 %v3863_v2  ;;  %v3867_v42 = vld [vmem:[%s5397_s8 + $0x30] sm:$0xff]  }
 0x41c   :  { %v2111_v40 = vadd.f32 1.0, %v3928_v31  ;;  %v3930_v44 = vpop.eup %3929  ;;  %3579 = vmatprep.subr.bf16.mxu1 %v3864_v22  ;;  %v3868_v31 = vld [vmem:[%s5397_s8 + $0x38] sm:$0xff]   ;;  %v1926_v16 = vld [vmem:[%s5398_s14 + $0x10] sm:$0xff] }
 0x41d   :  { %v2201_v32 = vpack.c.bf16 %v2191_v4, %v2190_v47  ;;  %v2113_v62 = vadd.f32 1.0, %v3930_v44  ;;  %v3932_v51 = vpop.eup %3931  ;;  %v1924_v47 = vld [vmem:[%s5398_s14] sm:$0xff]  ;;  %v1930_v44 = vld [vmem:[%s5398_s14 + $0x30] sm:$0xff] }
 0x41e   :  { %3935 = vrcp.f32 %v2111_v40  ;;  %v2115_v61 = vadd.f32 1.0, %v3932_v51  ;;  %v1956_v4 = vadd.f32 %v1924_v47, %v4905_v6  ;;  %v1928_v40 = vld [vmem:[%s5398_s14 + $0x20] sm:$0xff] }
 0x41f   :  { %3566 = vmatmul.mubr.bf16.gmra.mrb[40].mxu1 %v2201_v32  ;;  %3937 = vrcp.f32 %v2113_v62  ;;  %v1958_v32 = vadd.f32 %v1926_v16, %v4912_v34  ;;  %v1960_v62 = vadd.f32 %v1928_v40, %v4923_v18  ;;  %v1932_v51 = vld [vmem:[%s5398_s14 + $0x40] sm:$0xff] }
 0x420   :  { %3939 = vrcp.f32 %v2115_v61  ;;  %v3934_v1 = vpop.eup %3933  ;;  %3580 = vmatpush3.bf16.msra.mxu1 %v3864_v22  ;;  %v1988_v61 = vsub.f32 0.0, %v1956_v4  ;;  %v1936_v34 = vld [vmem:[%s5398_s14 + $0x60] sm:$0xff]  ;;  %v1946_v4 = vld [vmem:[%s5398_s14 + $0xb0] sm:$0xff] }
 0x421   :  { %v2192_v59 = vmul.f32 %v3934_v1, %v5428_v27  ;;  %3581 = vmatprep.subr.bf16.mxu1 %v3865_v8  ;;  %v1962_v1 = vadd.f32 %v1930_v44, %v4930_v5  ;;  %v1964_v27 = vadd.f32 %v1932_v51, %v4941_v52  ;;  %v1968_v52 = vadd.f32 %v1936_v34, %v4960_v26 }
 0x423   :  { %v2000_v22 = vsub.f32 0.0, %v1968_v52 }
 0x424   :  { %3582 = vmatpush3.bf16.msra.mxu1 %v3865_v8 }
 0x425   :  { %3583 = vmatprep.subr.bf16.mxu1 %v3866_v12  ;;  %v2044_v16 = vmul.f32 1.442695, %v2000_v22  ;;  %v5437_v22 = vld [vmem:[#allocation19_spill] sm:$0xff] }
 0x428   :  { %v3936_v10 = vpop.eup %3935  ;;  %3584 = vmatpush3.bf16.msra.mxu1 %v3866_v12 }
 0x429   :  { %v2193_v39 = vmul.f32 %v3936_v10, %v5429_v29  ;;  %v3938_v38 = vpop.eup %3937  ;;  %3585 = vmatprep.subr.bf16.mxu1 %v3867_v42  ;;  %v1990_v10 = vsub.f32 0.0, %v1958_v32  ;;  %v2020_v29 = vmul.f32 1.442695, %v1988_v61 }
 0x42a   :  { %v3940_v21 = vpop.eup %3939  ;;  %v2194_v53 = vmul.f32 %v3938_v38, %v5430_v15  ;;  %v1996_v38 = vsub.f32 0.0, %v1964_v27  ;;  %v1938_v15 = vld [vmem:[%s5398_s14 + $0x70] sm:$0xff] }
 0x42b   :  { %v2202_v30 = vpack.c.bf16 %v2193_v39, %v2192_v59  ;;  %v2195_v28 = vmul.f32 %v3940_v21, %v5431_v20  ;;  %v1992_v59 = vsub.f32 0.0, %v1960_v62  ;;  %v1994_v39 = vsub.f32 0.0, %v1962_v1  ;;  %v1940_v20 = vld [vmem:[%s5398_s14 + $0x80] sm:$0xff] }
 0x42c   :  { %3586 = vmatpush3.bf16.msra.mxu1 %v3867_v42  ;;  %v2024_v6 = vmul.f32 1.442695, %v1990_v10  ;;  %3941 = vpow2.f32 %v2020_v29  ;;  %v2036_v5 = vmul.f32 1.442695, %v1996_v38  ;;  %v1972_v58 = vadd.f32 %v1940_v20, %v4977_v50  ;;  %v5094_v10 = vld [vmem:[%s5432_s21] ss:$0 sm:$0xff] }
 0x42d   :  { %3569 = vmatprep.mubr.bf16.mxu1 %v2202_v30  ;;  %v2203_v19 = vpack.c.bf16 %v2195_v28, %v2194_v53  ;;  %3587 = vmatprep.subr.bf16.mxu1 %v3868_v31  ;;  %v1934_v30 = vld [vmem:[%s5398_s14 + $0x50] sm:$0xff]  ;;  %v2028_v21 = vmul.f32 1.442695, %v1992_v59  ;;  %v2032_v18 = vmul.f32 1.442695, %v1994_v39  ;;  %v1970_v28 = vadd.f32 %v1938_v15, %v4966_v43  ;;  %v5435_v38 = vld [vmem:[#allocation18_spill] sm:$0xff] }
 0x42e   :  { %v1966_v53 = vadd.f32 %v1934_v30, %v4948_v23  ;;  %3943 = vpow2.f32 %v2024_v6  ;;  %v2004_v12 = vsub.f32 0.0, %v1972_v58  ;;  %v5097_v59 = vld [vmem:[%s5433_s25] ss:$0 sm:$0xff]  ;;  %v2533_v30 = vmul.f32 %v5094_v10, %v5435_v38 }
 0x42f   :  { %3570 = vmatmul.mubr.bf16.gmra.mrb[44].mxu1 %v2203_v19  ;;  %3945 = vpow2.f32 %v2028_v21  ;;  %v1942_v19 = vld [vmem:[%s5398_s14 + $0x90] sm:$0xff]  ;;  %v2002_v23 = vsub.f32 0.0, %v1970_v28  ;;  %v1952_v38 = vld [vmem:[%s5398_s14 + $0xe0] sm:$0xff] }
 0x430   :  { %3588 = vmatpush3.bf16.msra.mxu1 %v3868_v31  ;;  %3947 = vpow2.f32 %v2032_v18  ;;  %v1998_v2 = vsub.f32 0.0, %v1966_v53  ;;  %v1974_v8 = vadd.f32 %v1942_v19, %v4984_v48  ;;  %v1944_v31 = vld [vmem:[%s5398_s14 + $0xa0] sm:$0xff]  ;;  %v2052_v44 = vmul.f32 1.442695, %v2004_v12  ;;  %v2606_v19 = vld [vmem:[%s5434_s19 + $0x10] sm:$0xff] }
 0x431   :  { %3605 = vmatprep.subr.bf16.mxu1 %v5066_v33  ;;  %3949 = vpow2.f32 %v2036_v5  ;;  %v2048_v43 = vmul.f32 1.442695, %v2002_v23  ;;  %v1976_v50 = vadd.f32 %v1944_v31, %v5000_v49  ;;  %v1978_v48 = vadd.f32 %v1946_v4, %v5004_v17  ;;  %v5436_v18 = vld [vmem:[#allocation17_spill] sm:$0xff] }
 0x432   :  { %v2040_v42 = vmul.f32 1.442695, %v1998_v2  ;;  %v2006_v26 = vsub.f32 0.0, %v1974_v8  ;;  %v2535_v17 = vmul.f32 %v5094_v10, %v4421_v36  ;;  %v2572_v15 = vmul.f32 %v5097_v59, %v5436_v18 }
 0x433   :  { %v2008_v39 = vsub.f32 0.0, %v1976_v50  ;;  %v2010_v6 = vsub.f32 0.0, %v1978_v48  ;;  %v2536_v53 = vmul.f32 %v5094_v10, %v4419_v35  ;;  %v2574_v36 = vmul.f32 %v5097_v59, %v4438_v46  ;;  %v2604_v35 = vld [vmem:[%s5434_s19] sm:$0xff] }
 0x434   :  { %3951 = vpow2.f32 %v2040_v42  ;;  %v2056_v61 = vmul.f32 1.442695, %v2006_v26  ;;  %v2534_v8 = vmul.f32 %v5094_v10, %v5437_v22  ;;  %v2575_v42 = vmul.f32 %v5097_v59, %v4436_v45  ;;  %v1948_v46 = vld [vmem:[%s5398_s14 + $0xc0] sm:$0xff]  ;;  %v2607_v26 = vld [vmem:[%s5434_s19 + $0x18] sm:$0xff] }
 0x435   :  { %3953 = vpow2.f32 %v2044_v16  ;;  %v2060_v20 = vmul.f32 1.442695, %v2008_v39  ;;  %v2064_v28 = vmul.f32 1.442695, %v2010_v6  ;;  %v1950_v39 = vld [vmem:[%s5398_s14 + $0xd0] sm:$0xff] }
 0x436   :  { %v3942_v47 = vpop.eup %3941  ;;  %3955 = vpow2.f32 %v2048_v43  ;;  %v2573_v43 = vmul.f32 %v5097_v59, %v4399_v25 }
 0x437   :  { %v2084_v62 = vadd.f32 1.0, %v3942_v47  ;;  %3957 = vpow2.f32 %v2052_v44 }
 0x438   :  { %v3944_v40 = vpop.eup %3943 }
 0x439   :  { %v3946_v32 = vpop.eup %3945  ;;  %v2086_v1 = vadd.f32 1.0, %v3944_v40  ;;  %3959 = vrcp.f32 %v2084_v62 }
 0x43a   :  { %v3948_v51 = vpop.eup %3947  ;;  %v2088_v29 = vadd.f32 1.0, %v3946_v32  ;;  %3961 = vpow2.f32 %v2056_v61  ;;  %v2605_v32 = vld [vmem:[%s5434_s19 + $0x8] sm:$0xff] }
 0x43b   :  { %v3950_v27 = vpop.eup %3949  ;;  %v2090_v49 = vadd.f32 1.0, %v3948_v51  ;;  %3963 = vrcp.f32 %v2086_v1  ;;  %v1980_v1 = vadd.f32 %v1948_v46, %v5016_v11 }
 0x43c   :  { %v2092_v21 = vadd.f32 1.0, %v3950_v27  ;;  %3965 = vrcp.f32 %v2088_v29 }
 0x43d   :  { %3967 = vrcp.f32 %v2090_v49 }
 0x43e   :  { %v3952_v47 = vpop.eup %3951  ;;  %3969 = vrcp.f32 %v2092_v21  ;;  %v2537_v21 = vmul.f32 %v5094_v10, %v4454_v55  ;;  %v2539_v55 = vmul.f32 %v5094_v10, %v4489_v14 }
 0x43f   :  { %v3954_v40 = vpop.eup %3953  ;;  %3971 = vpow2.f32 %v2060_v20  ;;  %v2094_v61 = vadd.f32 1.0, %v3952_v47 }
 0x440   :  { %v3956_v62 = vpop.eup %3955  ;;  %3973 = vpow2.f32 %v2064_v28  ;;  %v2096_v25 = vadd.f32 1.0, %v3954_v40  ;;  %v5142_v28 = vadd.f32 %v1952_v38, %v5032_v24  ;;  %v2578_v24 = vmul.f32 %v5097_v59, %v4509_v41 }
 0x441   :  { %v3958_v51 = vpop.eup %3957 }
 0x442   :  { %v2100_v18 = vadd.f32 1.0, %v3958_v51  ;;  %v2611_v51 = vld [vmem:[%s5434_s19 + $0x38] sm:$0xff] }
 0x443   :  { %v5121_v29 = vpop.eup %3959 }
 0x444   :  { %v3962_v6 = vpop.eup %3961 }
 0x445   :  { %v5130_v11 = vpop.eup %3963 }
 0x446   :  { %v3966_v20 = vpop.eup %3965 }
 0x4d7   :  { %v3559_v34 = vpop.f32.mrb[32].mxu1 }
 0x4d8   :  { %v2551_v5 = vadd.f32 %v3559_v34, %v2535_v17  ;;  %v2463_v52 = vpop.f32.mrb[33].mxu1  ;;  %v2098_v17 = vadd.f32 1.0, %v3956_v62  ;;  %v2538_v34 = vmul.f32 %v5094_v10, %v4452_v54  ;;  %v3968_v54 = vpop.eup %3967 }
 0x4d9   :  { %v2549_v58 = vadd.f32 %v2533_v30, %v2463_v52  ;;  %v3560_v2 = vpop.f32.mrb[34].mxu1  ;;  %v1954_v30 = vld [vmem:[%s5398_s14 + $0xf0] sm:$0xff]  ;;  %v2102_v52 = vadd.f32 1.0, %v3962_v6 }
 0x4da   :  { %v2590_v23 = vadd.f32 %v2574_v36, %v2551_v5  ;;  %v2552_v12 = vadd.f32 %v3560_v2, %v2536_v53  ;;  %v2466_v31 = vpop.f32.mrb[35].mxu1  ;;  %v2577_v53 = vmul.f32 %v5097_v59, %v4470_v0  ;;  %v2012_v5 = vsub.f32 0.0, %v1980_v1  ;;  %v4041_v1 = vld [vmem:[%s5389_s29 + $0x10] sm:$0xff] }
 0x4db   :  { %v2588_v16 = vadd.f32 %v2572_v15, %v2549_v58  ;;  %v2550_v4 = vadd.f32 %v2534_v8, %v2466_v31  ;;  %v2576_v15 = vmul.f32 %v5097_v59, %v4472_v3  ;;  %v5137_v36 = vadd.f32 %v1950_v39, %v5022_v7  ;;  %v5151_v58 = vpop.eup %3969 }
 0x4dc   :  { %v2622_v44 = vadd.f32 %v2606_v19, %v2590_v23  ;;  %v2591_v50 = vadd.f32 %v2575_v42, %v2552_v12  ;;  %v5145_v3 = vadd.f32 %v1954_v30, %v5042_v9  ;;  %v2540_v0 = vmul.f32 %v5094_v10, %v4487_v13  ;;  %v3972_v22 = vpop.eup %3971  ;;  %v4042_v30 = vld [vmem:[%s5389_s29 + $0x18] sm:$0xff] }
 0x4dd   :  { %v2620_v45 = vadd.f32 %v2604_v35, %v2588_v16  ;;  %v2589_v48 = vadd.f32 %v2573_v43, %v2550_v4  ;;  %v2652_v19 = vsub.f32 1.0, %v5121_v29  ;;  %v2653_v7 = vsub.f32 1.0, %v5130_v11  ;;  %v3974_v42 = vpop.eup %3973  ;;  %v2608_v4 = vld [vmem:[%s5434_s19 + $0x20] sm:$0xff] }
 0x4de   :  { %3975 = vtanh.f32 %v2622_v44  ;;  %v2623_v27 = vadd.f32 %v2607_v26, %v2591_v50  ;;  %v2579_v9 = vmul.f32 %v5097_v59, %v4507_v37  ;;  %v2654_v2 = vsub.f32 1.0, %v3966_v20  ;;  %v2610_v37 = vld [vmem:[%s5434_s19 + $0x30] sm:$0xff]  ;;  %v4039_v44 = vld [vmem:[%s5389_s29] sm:$0xff] }
 0x4df   :  { %3977 = vtanh.f32 %v2620_v45  ;;  %v2621_v49 = vadd.f32 %v2605_v32, %v2589_v48  ;;  %v5157_v8 = vmul.f32 1.442695, %v2012_v5  ;;  %v2014_v13 = vsub.f32 0.0, %v5137_v36  ;;  %v4040_v32 = vld [vmem:[%s5389_s29 + $0x8] sm:$0xff]  ;;  %v2614_v36 = vld [vmem:[%s5434_s19 + $0x50] sm:$0xff] }
 0x4e0   :  { %3979 = vtanh.f32 %v2623_v27  ;;  %v2655_v12 = vsub.f32 1.0, %v3968_v54  ;;  %v2016_v31 = vsub.f32 0.0, %v5142_v28  ;;  %v2018_v41 = vsub.f32 0.0, %v5145_v3 }
 0x4e1   :  { %3981 = vtanh.f32 %v2621_v49  ;;  %v2668_v50 = vmul.f32 %v4039_v44, %v2652_v19  ;;  %v2669_v62 = vmul.f32 %v4040_v32, %v2653_v7  ;;  %v2670_v27 = vmul.f32 %v4041_v1, %v2654_v2 }
 0x4e2   :  { %3983 = vrcp.f32 %v2094_v61  ;;  %v2104_v19 = vadd.f32 1.0, %v3972_v22  ;;  %v2542_v22 = vmul.f32 %v5094_v10, %v4524_v56  ;;  %v5440_v56 = vld [vmem:[#allocation24_spill] sm:$0xff] }
 0x4e3   :  { %3985 = vrcp.f32 %v2096_v25 }
 0x4e4   :  { %3987 = vrcp.f32 %v2098_v17  ;;  %v3563_v14 = vpop.f32.mrb[36].mxu1  ;;  %v2609_v17 = vld [vmem:[%s5434_s19 + $0x28] sm:$0xff] }
 0x4e5   :  { %3989 = vrcp.f32 %v2100_v18  ;;  %v2555_v23 = vadd.f32 %v3563_v14, %v2539_v55  ;;  %v2479_v35 = vpop.f32.mrb[37].mxu1 }
 0x4e6   :  { %3991 = vrcp.f32 %v2102_v52  ;;  %v2553_v47 = vadd.f32 %v2537_v21, %v2479_v35  ;;  %v3564_v46 = vpop.f32.mrb[38].mxu1  ;;  %v2671_v21 = vmul.f32 %v4042_v30, %v2655_v12  ;;  %v5438_v12 = vld [vmem:[#allocation25_spill] sm:$0xff] }
 0x4e7   :  { %v2594_v26 = vadd.f32 %v2578_v24, %v2555_v23  ;;  %v2556_v43 = vadd.f32 %v3564_v46, %v2540_v0  ;;  %v2482_v40 = vpop.f32.mrb[39].mxu1  ;;  %v2106_v24 = vadd.f32 1.0, %v3974_v42  ;;  %v2080_v23 = vmul.f32 1.442695, %v2018_v41  ;;  %v3870_v41 = vld [vmem:[%s4250_s27 + $0x8] sm:$0xff]  }
 0x4e8   :  { %v3976_v16 = vpop.eup %3975  ;;  %v2592_v48 = vadd.f32 %v2576_v15, %v2553_v47  ;;  %v2554_v61 = vadd.f32 %v2538_v34, %v2482_v40  ;;  %v2543_v42 = vmul.f32 %v5094_v10, %v5438_v12  ;;  %v5439_v47 = vld [vmem:[#allocation22_spill] sm:$0xff]  ;;  %v2656_v40 = vsub.f32 1.0, %v5151_v58 }
 0x4e9   :  { %v3978_v45 = vpop.eup %3977  ;;  %v2686_v25 = vmul.f32 %v3976_v16, %v3966_v20  ;;  %v2626_v49 = vadd.f32 %v2610_v37, %v2594_v26  ;;  %v2595_v6 = vadd.f32 %v2579_v9, %v2556_v43  ;;  %v2580_v46 = vmul.f32 %v5097_v59, %v5439_v47  ;;  %v5441_v26 = vld [vmem:[#allocation29_spill] sm:$0xff] }
 0x4ea   :  { %v3980_v39 = vpop.eup %3979  ;;  %v2684_v38 = vmul.f32 %v3978_v45, %v5121_v29  ;;  %v2624_v5 = vadd.f32 %v2608_v4, %v2592_v48  ;;  %v2593_v55 = vadd.f32 %v2577_v53, %v2554_v61  ;;  %v2582_v4 = vmul.f32 %v5097_v59, %v5441_v26  ;;  %v2612_v48 = vld [vmem:[%s5434_s19 + $0x40] sm:$0xff] }
 0x4eb   :  { %v3982_v18 = vpop.eup %3981  ;;  %v2687_v52 = vmul.f32 %v3980_v39, %v3968_v54  ;;  %v2702_v28 = vadd.f32 %v2686_v25, %v2670_v27  ;;  %3993 = vtanh.f32 %v2626_v49  ;;  %v2627_v34 = vadd.f32 %v2611_v51, %v2595_v6  ;;  %v2615_v25 = vld [vmem:[%s5434_s19 + $0x58] sm:$0xff]  ;;  %v5443_v49 = vld [vmem:[#allocation21_spill] sm:$0xff] }
 0x4ec   :  { %v5171_v3 = vpop.eup %3983  ;;  %v2685_v15 = vmul.f32 %v3982_v18, %v5130_v11  ;;  %v2700_v20 = vadd.f32 %v2684_v38, %v2668_v50  ;;  %3995 = vtanh.f32 %v2624_v5  ;;  %v2625_v7 = vadd.f32 %v2609_v17, %v2593_v55  ;;  %v5442_v50 = vld [vmem:[#allocation28_spill] sm:$0xff]  ;;  %v3871_v17 = vld [vmem:[%s4250_s27 + $0x10] sm:$0xff]   ;;  %v2613_v18 = vld [vmem:[%s5434_s19 + $0x48] sm:$0xff] }
 0x4ed   :  { %v5174_v0 = vpop.eup %3985  ;;  %v2703_v29 = vadd.f32 %v2687_v52, %v2671_v21  ;;  %2718 = vst [vmem:[#allocation2 + $0x10] sm:$0xff] %v2702_v28  ;;  %3997 = vtanh.f32 %v2627_v34  ;;  %v2541_v54 = vmul.f32 %v5094_v10, %v4526_v57  ;;  %v2076_v11 = vmul.f32 1.442695, %v2016_v31  ;;  %v4043_v55 = vld [vmem:[%s5389_s29 + $0x20] sm:$0xff] }
 0x4ee   :  { %v5176_v14 = vpop.eup %3987  ;;  %v2701_v53 = vadd.f32 %v2685_v15, %v2669_v62  ;;  %2716 = vst [vmem:[#allocation2] sm:$0xff] %v2700_v20  ;;  %3999 = vtanh.f32 %v2625_v7  ;;  %v2072_v31 = vmul.f32 1.442695, %v2014_v13  ;;  %v2583_v32 = vmul.f32 %v5097_v59, %v5442_v50  ;;  %v4044_v15 = vld [vmem:[%s5389_s29 + $0x30] sm:$0xff] }
 0x4ef   :  { %v5180_v9 = vpop.eup %3989  ;;  %2719 = vst [vmem:[#allocation2 + $0x18] sm:$0xff] %v2703_v29  ;;  %v2733_v2 = vpack.c.bf16 %v2703_v29, %v2702_v28  ;;  %4001 = vpow2.f32 %v5157_v8  ;;  %v2544_v8 = vmul.f32 %v5094_v10, %v5440_v56  ;;  %v2658_v62 = vsub.f32 1.0, %v5174_v0 }
 0x4f0   :  { %2717 = vst [vmem:[#allocation2 + $0x8] sm:$0xff] %v2701_v53  ;;  %v2732_v35 = vpack.c.bf16 %v2701_v53, %v2700_v20  ;;  %v5187_v57 = vpop.eup %3991  ;;  %4003 = vrcp.f32 %v2104_v19  ;;  %v2659_v1 = vsub.f32 1.0, %v5176_v14  ;;  %v2581_v6 = vmul.f32 %v5097_v59, %v5443_v49  ;;  %v4045_v53 = vld [vmem:[%s5389_s29 + $0x38] sm:$0xff] }
 0x4f1   :  { %4005 = vrcp.f32 %v2106_v24  ;;  %v2657_v5 = vsub.f32 1.0, %v5171_v3  ;;  %v2672_v52 = vmul.f32 %v4043_v55, %v2656_v40  ;;  %v2674_v20 = vmul.f32 %v4044_v15, %v2658_v62  ;;  %v4047_v55 = vld [vmem:[%s5389_s29 + $0x40] sm:$0xff] }
 0x4f2   :  { %v3567_v37 = vpop.f32.mrb[40].mxu1  ;;  %3589 = vmatprep.mubr.bf16.mxu1 %v2732_v35  ;;  %4007 = vpow2.f32 %v2076_v11  ;;  %v3872_v35 = vld [vmem:[%s4250_s27 + $0x18] sm:$0xff]  }
 0x4f3   :  { %v2559_v16 = vadd.f32 %v3567_v37, %v2543_v42  ;;  %v2495_v43 = vpop.f32.mrb[41].mxu1  ;;  %3590 = vmatmul.mubr.bf16.vlgmr.msra.gmra.mrb[48].mxu1 %v2733_v2  ;;  %4009 = vpow2.f32 %v2080_v23 }
 0x4f4   :  { %v2557_v13 = vadd.f32 %v2541_v54, %v2495_v43  ;;  %v3568_v44 = vpop.f32.mrb[42].mxu1  ;;  %3606 = vmatpush3.bf16.msra.mxu1 %v5066_v33  ;;  %4011 = vpow2.f32 %v2072_v31  ;;  %v2675_v54 = vmul.f32 %v4045_v53, %v2659_v1  ;;  %v2547_v1 = vmul.f32 %v5094_v10, %v5419_v60  ;;  %v2618_v53 = vld [vmem:[%s5434_s19 + $0x70] sm:$0xff] }
 0x4f5   :  { %v2598_v45 = vadd.f32 %v2582_v4, %v2559_v16  ;;  %v2560_v51 = vadd.f32 %v3568_v44, %v2544_v8  ;;  %v2498_v61 = vpop.f32.mrb[43].mxu1  ;;  %3607 = vmatprep.subr.bf16.mxu1 %v3870_v41  ;;  %v3994_v38 = vpop.eup %3993 }
 0x4f6   :  { %v2596_v27 = vadd.f32 %v2580_v46, %v2557_v13  ;;  %v2558_v39 = vadd.f32 %v2542_v22, %v2498_v61  ;;  %v3996_v33 = vpop.eup %3995  ;;  %v2690_v19 = vmul.f32 %v3994_v38, %v5174_v0  ;;  %v4046_v0 = vld [vmem:[%s5389_s29 + $0x28] sm:$0xff]  ;;  %v2661_v13 = vsub.f32 1.0, %v5187_v57 }
 0x4f7   :  { %v2630_v30 = vadd.f32 %v2614_v36, %v2598_v45  ;;  %v2599_v21 = vadd.f32 %v2583_v32, %v2560_v51  ;;  %v3998_v7 = vpop.eup %3997  ;;  %v2688_v24 = vmul.f32 %v3996_v33, %v5151_v58  ;;  %v2673_v42 = vmul.f32 %v4046_v0, %v2657_v5  ;;  %v5445_v32 = vld [vmem:[#allocation37_spill] sm:$0xff]  ;;  %v5446_v45 = vld [vmem:[#allocation32_spill] sm:$0xff] }
 0x4f8   :  { %v2628_v28 = vadd.f32 %v2612_v48, %v2596_v27  ;;  %v2597_v34 = vadd.f32 %v2581_v6, %v2558_v39  ;;  %3608 = vmatpush3.bf16.msra.mxu1 %v3870_v41  ;;  %v4000_v11 = vpop.eup %3999  ;;  %v2691_v22 = vmul.f32 %v3998_v7, %v5176_v14  ;;  %v2706_v23 = vadd.f32 %v2690_v19, %v2674_v20  ;;  %v3873_v41 = vld [vmem:[%s4250_s27 + $0x20] sm:$0xff]   ;;  %v5447_v27 = vld [vmem:[#allocation40_spill] sm:$0xff]  ;;  %v3874_v6 = vld [vmem:[%s4250_s27 + $0x28] sm:$0xff]  }
 0x4f9   :  { %4013 = vtanh.f32 %v2630_v30  ;;  %v2631_v29 = vadd.f32 %v2615_v25, %v2599_v21  ;;  %3609 = vmatprep.subr.bf16.mxu1 %v3871_v17  ;;  %v4002_v12 = vpop.eup %4001  ;;  %v2689_v31 = vmul.f32 %v4000_v11, %v5171_v3  ;;  %v2704_v37 = vadd.f32 %v2688_v24, %v2672_v52  ;;  %v5444_v3 = vld [vmem:[#allocation33_spill] sm:$0xff]  ;;  %v5448_v39 = vld [vmem:[#allocation36_spill] sm:$0xff] }
 0x4fa   :  { %4015 = vtanh.f32 %v2628_v28  ;;  %v2629_v2 = vadd.f32 %v2613_v18, %v2597_v34  ;;  %v4004_v58 = vpop.eup %4003  ;;  %v2707_v47 = vadd.f32 %v2691_v22, %v2675_v54  ;;  %2722 = vst [vmem:[#allocation2 + $0x30] sm:$0xff] %v2706_v23  ;;  %v2108_v26 = vadd.f32 1.0, %v4002_v12  ;;  %v5449_v30 = vld [vmem:[#allocation45_spill] sm:$0xff]  ;;  %v4049_v28 = vld [vmem:[%s5389_s29 + $0x50] sm:$0xff]  ;;  %v4050_v7 = vld [vmem:[%s5389_s29 + $0x58] sm:$0xff] }
 0x4fb   :  { %4017 = vtanh.f32 %v2631_v29  ;;  %v4006_v46 = vpop.eup %4005  ;;  %v2705_v56 = vadd.f32 %v2689_v31, %v2673_v42  ;;  %2720 = vst [vmem:[#allocation2 + $0x20] sm:$0xff] %v2704_v37  ;;  %v2545_v40 = vmul.f32 %v5094_v10, %v5444_v3  ;;  %v2660_v36 = vsub.f32 1.0, %v5180_v9 }
 0x4fc   :  { %4019 = vtanh.f32 %v2629_v2  ;;  %3610 = vmatpush3.bf16.msra.mxu1 %v3871_v17  ;;  %v4008_v14 = vpop.eup %4007  ;;  %2723 = vst [vmem:[#allocation2 + $0x38] sm:$0xff] %v2707_v47  ;;  %v2735_v8 = vpack.c.bf16 %v2707_v47, %v2706_v23  ;;  %v2662_v44 = vsub.f32 1.0, %v4004_v58  ;;  %v2584_v62 = vmul.f32 %v5097_v59, %v5445_v32 }
 0x4fd   :  { %3611 = vmatprep.subr.bf16.mxu1 %v3872_v35  ;;  %v4010_v16 = vpop.eup %4009  ;;  %2721 = vst [vmem:[#allocation2 + $0x28] sm:$0xff] %v2705_v56  ;;  %v2734_v4 = vpack.c.bf16 %v2705_v56, %v2704_v37  ;;  %v2112_v50 = vadd.f32 1.0, %v4008_v14  ;;  %v2546_v48 = vmul.f32 %v5094_v10, %v5446_v45  ;;  %v2663_v51 = vsub.f32 1.0, %v4006_v46  ;;  %v2619_v37 = vld [vmem:[%s5434_s19 + $0x78] sm:$0xff] }
 0x4fe   :  { %v4012_v43 = vpop.eup %4011  ;;  %v2114_v61 = vadd.f32 1.0, %v4010_v16  ;;  %v2548_v25 = vmul.f32 %v5094_v10, %v5447_v27  ;;  %v2585_v49 = vmul.f32 %v5097_v59, %v5448_v39  ;;  %v2587_v38 = vmul.f32 %v5097_v59, %v5425_v63  ;;  %v4048_v10 = vld [vmem:[%s5389_s29 + $0x48] sm:$0xff] }
 0x4ff   :  { %3593 = vmatprep.mubr.bf16.mxu1 %v2734_v4  ;;  %v2586_v21 = vmul.f32 %v5097_v59, %v5449_v30  ;;  %4021 = vrcp.f32 %v2108_v26  ;;  %v2110_v18 = vadd.f32 1.0, %v4012_v43  ;;  %v2676_v52 = vmul.f32 %v4047_v55, %v2660_v36 }
 0x500   :  { %3612 = vmatpush3.bf16.msra.mxu1 %v3872_v35  ;;  %v2677_v33 = vmul.f32 %v4048_v10, %v2661_v13  ;;  %v2678_v34 = vmul.f32 %v4049_v28, %v2662_v44  ;;  %4023 = vrcp.f32 %v2112_v50  ;;  %v2679_v29 = vmul.f32 %v4050_v7, %v2663_v51  ;;  %v2616_v35 = vld [vmem:[%s5434_s19 + $0x60] sm:$0xff]  ;;  %v4051_v51 = vld [vmem:[%s5389_s29 + $0x70] sm:$0xff] }
 0x501   :  { %3594 = vmatmul.mubr.bf16.gmra.mrb[52].mxu1 %v2735_v8  ;;  %3613 = vmatprep.subr.bf16.mxu1 %v3873_v41  ;;  %4025 = vrcp.f32 %v2114_v61  ;;  %v2617_v8 = vld [vmem:[%s5434_s19 + $0x68] sm:$0xff] }
 0x502   :  { %v3571_v5 = vpop.f32.mrb[44].mxu1  ;;  %4027 = vrcp.f32 %v2110_v18  ;;  %v4054_v18 = vld [vmem:[%s5389_s29 + $0x68] sm:$0xff] }
 0x503   :  { %v4014_v17 = vpop.eup %4013  ;;  %v2563_v63 = vadd.f32 %v3571_v5, %v2547_v1  ;;  %v2511_v19 = vpop.f32.mrb[45].mxu1 }
 0x504   :  { %v4016_v60 = vpop.eup %4015  ;;  %v2694_v15 = vmul.f32 %v4014_v17, %v4004_v58  ;;  %3614 = vmatpush3.bf16.msra.mxu1 %v3873_v41  ;;  %v2561_v54 = vadd.f32 %v2545_v40, %v2511_v19  ;;  %v3572_v11 = vpop.f32.mrb[46].mxu1  ;;  %v4053_v17 = vld [vmem:[%s5389_s29 + $0x78] sm:$0xff] }
 0x505   :  { %v4018_v20 = vpop.eup %4017  ;;  %v2692_v59 = vmul.f32 %v4016_v60, %v5180_v9  ;;  %3615 = vmatprep.subr.bf16.mxu1 %v3874_v6  ;;  %v2602_v23 = vadd.f32 %v2586_v21, %v2563_v63  ;;  %v2564_v12 = vadd.f32 %v3572_v11, %v2548_v25  ;;  %v2514_v0 = vpop.f32.mrb[47].mxu1  ;;  %v4052_v25 = vld [vmem:[%s5389_s29 + $0x60] sm:$0xff] }
 0x506   :  { %v4020_v24 = vpop.eup %4019  ;;  %v2695_v2 = vmul.f32 %v4018_v20, %v4006_v46  ;;  %v2710_v22 = vadd.f32 %v2694_v15, %v2678_v34  ;;  %v2600_v31 = vadd.f32 %v2584_v62, %v2561_v54  ;;  %v2562_v58 = vadd.f32 %v2546_v48, %v2514_v0  ;;  %v3875_v34 = vld [vmem:[%s4250_s27 + $0x30] sm:$0xff]   ;;  %v3876_v15 = vld [vmem:[%s4250_s27 + $0x38] sm:$0xff]   ;;  %v3283_v20 = vld [vmem:[%s5450_s24] ss:$0 sm:$0xff]  ;;  %s4055_s27 = scalar_lea.vmem %s3123_s12, 2048 }
 0x507   :  { %v2693_v42 = vmul.f32 %v4020_v24, %v5187_v57  ;;  %v2708_v9 = vadd.f32 %v2692_v59, %v2676_v52  ;;  %v2634_v56 = vadd.f32 %v2618_v53, %v2602_v23  ;;  %v2603_v14 = vadd.f32 %v2587_v38, %v2564_v12  ;;  %p4056_p0 = scmp.ne.s32.totalorder %s3123_s12, %s4055_s27  ;;  %p4061_p2 = scmp.lt.s32.totalorder %s4055_s27, %s4055_s27 }
 0x508   :  { %v2711_v47 = vadd.f32 %v2695_v2, %v2679_v29  ;;  %2726 = vst [vmem:[#allocation2 + $0x50] sm:$0xff] %v2710_v22  ;;  %3616 = vmatpush3.bf16.msra.mxu1 %v3874_v6  ;;  %v2632_v41 = vadd.f32 %v2616_v35, %v2600_v31  ;;  %v2601_v16 = vadd.f32 %v2585_v49, %v2562_v58 }
 0x509   :  { %v2709_v46 = vadd.f32 %v2693_v42, %v2677_v33  ;;  %2724 = vst [vmem:[#allocation2 + $0x40] sm:$0xff] %v2708_v9  ;;  %4029 = vtanh.f32 %v2634_v56  ;;  %v2635_v4 = vadd.f32 %v2619_v37, %v2603_v14  ;;  %v4022_v3 = vpop.eup %4021  ;;  %3617 = vmatprep.subr.bf16.mxu1 %v3875_v34  ;;  %p4062_p3 = por %p4061_p2, %p4060_p1 }
 0x50a   :  { %2727 = vst [vmem:[#allocation2 + $0x58] sm:$0xff] %v2711_v47  ;;  %v2737_v26 = vpack.c.bf16 %v2711_v47, %v2710_v22  ;;  %4031 = vtanh.f32 %v2632_v41  ;;  %v2633_v43 = vadd.f32 %v2617_v8, %v2601_v16  ;;  %v4024_v40 = vpop.eup %4023  ;;  %v2664_v50 = vsub.f32 1.0, %v4022_v3 }
 0x50b   :  { %2725 = vst [vmem:[#allocation2 + $0x48] sm:$0xff] %v2709_v46  ;;  %v2736_v57 = vpack.c.bf16 %v2709_v46, %v2708_v9  ;;  %4033 = vtanh.f32 %v2635_v4  ;;  %v4026_v36 = vpop.eup %4025  ;;  %v2666_v44 = vsub.f32 1.0, %v4024_v40  ;;  %p4063_p4 = pnand %p4062_p3, %p4056_p0 }
 0x50c   :  { %4035 = vtanh.f32 %v2633_v43  ;;  %v4028_v13 = vpop.eup %4027  ;;  %v2667_v32 = vsub.f32 1.0, %v4026_v36  ;;  %v2680_v39 = vmul.f32 %v4052_v25, %v2664_v50  ;;  %3618 = vmatpush3.bf16.msra.mxu1 %v3875_v34 }
 0x50d   :  { %3597 = vmatprep.mubr.bf16.mxu1 %v2736_v57  ;;  %v2665_v45 = vsub.f32 1.0, %v4028_v13  ;;  %v2682_v61 = vmul.f32 %v4051_v51, %v2666_v44  ;;  %3619 = vmatprep.subr.bf16.mxu1 %v3876_v15 }
 0x50e   :  { %3598 = vmatmul.mubr.bf16.gmra.mrb[56].mxu1 %v2737_v26  ;;  %v2683_v38 = vmul.f32 %v4053_v17, %v2667_v32 }
 0x50f   :  { %v2681_v60 = vmul.f32 %v4054_v18, %v2665_v45 }
 0x510   :  { %3620 = vmatpush3.bf16.msra.mxu1 %v3876_v15 }
 0x513   :  { %v4030_v62 = vpop.eup %4029 }
 0x514   :  { %v4032_v48 = vpop.eup %4031  ;;  %v2698_v1 = vmul.f32 %v4030_v62, %v4024_v40 }
 0x515   :  { %v4034_v27 = vpop.eup %4033  ;;  %v2696_v49 = vmul.f32 %v4032_v48, %v4022_v3 }
 0x516   :  { %v4036_v6 = vpop.eup %4035  ;;  %v2699_v30 = vmul.f32 %v4034_v27, %v4026_v36  ;;  %v2714_v21 = vadd.f32 %v2698_v1, %v2682_v61 }
 0x517   :  { %v2697_v5 = vmul.f32 %v4036_v6, %v4028_v13  ;;  %v2712_v55 = vadd.f32 %v2696_v49, %v2680_v39 }
 0x518   :  { %v2715_v52 = vadd.f32 %v2699_v30, %v2683_v38  ;;  %2730 = vst [vmem:[#allocation2 + $0x70] sm:$0xff] %v2714_v21 }
 0x519   :  { %v2713_v10 = vadd.f32 %v2697_v5, %v2681_v60  ;;  %2728 = vst [vmem:[#allocation2 + $0x60] sm:$0xff] %v2712_v55 }
 0x51a   :  { %2731 = vst [vmem:[#allocation2 + $0x78] sm:$0xff] %v2715_v52  ;;  %v2739_v33 = vpack.c.bf16 %v2715_v52, %v2714_v21 }
 0x51b   :  { %2729 = vst [vmem:[#allocation2 + $0x68] sm:$0xff] %v2713_v10  ;;  %v2738_v28 = vpack.c.bf16 %v2713_v10, %v2712_v55 }
 0x51d   :  { %3601 = vmatprep.mubr.bf16.mxu1 %v2738_v28 }
 0x51e   :  { %3602 = vmatmul.mubr.bf16.gmra.mrb[60].mxu1 %v2739_v33 }
 0x5c6   :  { %v3591_v63 = vpop.f32.mrb[48].mxu1 }
 0x5c7   :  { %v2854_v19 = vadd.f32 %v3591_v63, %v3283_v20  ;;  %v2845_v59 = vpop.f32.mrb[49].mxu1 }
 0x5c8   :  { %v2846_v7 = vadd.f32 %v3283_v20, %v2845_v59  ;;  %v3592_v29 = vpop.f32.mrb[50].mxu1 }
 0x5c9   :  { %v2857_v24 = vadd.f32 %v3592_v29, %v3283_v20  ;;  %v2848_v53 = vpop.f32.mrb[51].mxu1  ;;  %v2910_v11 = vmax.f32 %v2854_v19, 0.0 }
 0x5ca   :  { %v2849_v54 = vadd.f32 %v3283_v20, %v2848_v53  ;;  %v2908_v22 = vmax.f32 %v2846_v7, 0.0 }
 0x5cb   :  { %v2911_v2 = vmax.f32 %v2857_v24, 0.0 }
 0x5cc   :  { %v2909_v23 = vmax.f32 %v2849_v54, 0.0 }
 0x5cd   :  { %v2925_v35 = vpack.c.bf16 %v2911_v2, %v2910_v11 }
 0x5ce   :  { %v2924_v12 = vpack.c.bf16 %v2909_v23, %v2908_v22 }
 0x5d0   :  { %3621 = vmatprep.mubr.bf16.mxu1 %v2924_v12 }
 0x5d1   :  { %3622 = vmatmul.mubr.bf16.vlgmr.msra.gmra.mrb[64].mxu1 %v2925_v35 }
 0x5d4   :  { %v3595_v0 = vpop.f32.mrb[52].mxu1 }
 0x5d5   :  { %v2870_v42 = vadd.f32 %v3595_v0, %v3283_v20  ;;  %v2861_v9 = vpop.f32.mrb[53].mxu1 }
 0x5d6   :  { %v2862_v31 = vadd.f32 %v3283_v20, %v2861_v9  ;;  %v3596_v37 = vpop.f32.mrb[54].mxu1 }
 0x5d7   :  { %v2873_v58 = vadd.f32 %v3596_v37, %v3283_v20  ;;  %v2864_v47 = vpop.f32.mrb[55].mxu1  ;;  %v2914_v14 = vmax.f32 %v2870_v42, 0.0 }
 0x5d8   :  { %v2865_v56 = vadd.f32 %v3283_v20, %v2864_v47  ;;  %v2912_v46 = vmax.f32 %v2862_v31, 0.0 }
 0x5d9   :  { %v2915_v8 = vmax.f32 %v2873_v58, 0.0 }
 0x5da   :  { %v2913_v41 = vmax.f32 %v2865_v56, 0.0 }
 0x5db   :  { %v2927_v16 = vpack.c.bf16 %v2915_v8, %v2914_v14 }
 0x5dc   :  { %v2926_v26 = vpack.c.bf16 %v2913_v41, %v2912_v46 }
 0x5de   :  { %3625 = vmatprep.mubr.bf16.mxu1 %v2926_v26 }
 0x5df   :  { %3626 = vmatmul.mubr.bf16.gmra.mrb[68].mxu1 %v2927_v16 }
 0x5e1   :  { %v3599_v4 = vpop.f32.mrb[56].mxu1 }
 0x5e2   :  { %v2886_v57 = vadd.f32 %v3599_v4, %v3283_v20  ;;  %v2877_v43 = vpop.f32.mrb[57].mxu1 }
 0x5e3   :  { %v2878_v3 = vadd.f32 %v3283_v20, %v2877_v43  ;;  %v3600_v40 = vpop.f32.mrb[58].mxu1 }
 0x5e4   :  { %v2889_v36 = vadd.f32 %v3600_v40, %v3283_v20  ;;  %v2880_v13 = vpop.f32.mrb[59].mxu1  ;;  %v2918_v50 = vmax.f32 %v2886_v57, 0.0 }
 0x5e5   :  { %v2881_v44 = vadd.f32 %v3283_v20, %v2880_v13  ;;  %v2916_v62 = vmax.f32 %v2878_v3, 0.0 }
 0x5e6   :  { %v2919_v32 = vmax.f32 %v2889_v36, 0.0 }
 0x5e7   :  { %v2917_v45 = vmax.f32 %v2881_v44, 0.0 }
 0x5e8   :  { %v2929_v48 = vpack.c.bf16 %v2919_v32, %v2918_v50 }
 0x5e9   :  { %v2928_v51 = vpack.c.bf16 %v2917_v45, %v2916_v62 }
 0x5eb   :  { %3629 = vmatprep.mubr.bf16.mxu1 %v2928_v51 }
 0x5ec   :  { %3630 = vmatmul.mubr.bf16.gmra.mrb[72].mxu1 %v2929_v48 }
 0x5f1   :  { %v3603_v61 = vpop.f32.mrb[60].mxu1 }
 0x5f2   :  { %v2902_v1 = vadd.f32 %v3603_v61, %v3283_v20  ;;  %v2893_v27 = vpop.f32.mrb[61].mxu1 }
 0x5f3   :  { %v2894_v25 = vadd.f32 %v3283_v20, %v2893_v27  ;;  %v3604_v39 = vpop.f32.mrb[62].mxu1 }
 0x5f4   :  { %v2905_v49 = vadd.f32 %v3604_v39, %v3283_v20  ;;  %v2896_v6 = vpop.f32.mrb[63].mxu1  ;;  %v2922_v38 = vmax.f32 %v2902_v1, 0.0 }
 0x5f5   :  { %v2897_v17 = vadd.f32 %v3283_v20, %v2896_v6  ;;  %v2920_v21 = vmax.f32 %v2894_v25, 0.0 }
 0x5f6   :  { %v2923_v30 = vmax.f32 %v2905_v49, 0.0 }
 0x5f7   :  { %v2921_v18 = vmax.f32 %v2897_v17, 0.0 }
 0x5f8   :  { %v2931_v60 = vpack.c.bf16 %v2923_v30, %v2922_v38 }
 0x5f9   :  { %v2930_v5 = vpack.c.bf16 %v2921_v18, %v2920_v21 }
 0x5fb   :  { %3633 = vmatprep.mubr.bf16.mxu1 %v2930_v5 }
 0x5fc   :  { %3634 = vmatmul.mubr.bf16.gmra.mrb[76].mxu1 %v2931_v60 }
 0x5fd   :  { %4066 = shalt.err (!%p4063_p4)
}
 0x5fe   :  { %s4067_s4 = scalar_lea.hbm %s4260_s17, 2048 }
 0x5ff   :  { %p4068_p5 = scmp.ne.s32.totalorder %s4260_s17, %s4067_s4  ;;  %p4071_p6 = scmp.lt.u32.totalorder %s4067_s4, %s4260_s17 }
 0x601   :  { %p4073_p7 = pnand %p4071_p6, %p4068_p5 }
 0x603   :  { %4076 = shalt.err (!%p4073_p7)
}
 0x604   :  { %s4110_s7 = smov 128   ;;  %s4111_s10 = smov 8   ;;  %v3292_v55 = vld [vmem:[%s4255_s30] ss:$0 sm:$0xff]  ;;  %vm3100_vm2 = vcmask 15360  }
 0x605   :  { %3128 = dma.vmem_to_hbm [thread:$0]  %s3123_s12, 2048, %s4260_s17, [#allocation3], %s4110_s7, %s4110_s7, %s4111_s10  }
 0x6a4   :  { %v3623_v52 = vpop.f32.mrb[64].mxu1 }
 0x6a5   :  { %v3046_v10 = vadd.f32 %v3623_v52, %v3292_v55  ;;  %v3037_v33 = vpop.f32.mrb[65].mxu1 }
 0x6a6   :  { %v3038_v28 = vadd.f32 %v3292_v55, %v3037_v33  ;;  %v3624_v34 = vpop.f32.mrb[66].mxu1 }
 0x6a7   :  { %3103 = vst.msk [vmem:[%s4265_s20 + $0x10] sm:$0xff] %vm3100_vm2, %v3046_v10  ;;  %v3049_v15 = vadd.f32 %v3624_v34, %v3292_v55  ;;  %v3040_v20 = vpop.f32.mrb[67].mxu1 }
 0x6a8   :  { %3101 = vst.msk [vmem:[%s4265_s20] sm:$0xff] %vm3100_vm2, %v3038_v28  ;;  %v3041_v63 = vadd.f32 %v3292_v55, %v3040_v20 }
 0x6a9   :  { %3104 = vst.msk [vmem:[%s4265_s20 + $0x18] sm:$0xff] %vm3100_vm2, %v3049_v15 }
 0x6aa   :  { %3102 = vst.msk [vmem:[%s4265_s20 + $0x8] sm:$0xff] %vm3100_vm2, %v3041_v63 }
 0x6b2   :  { %v3627_v19 = vpop.f32.mrb[68].mxu1 }
 0x6b3   :  { %v3062_v59 = vadd.f32 %v3627_v19, %v3292_v55  ;;  %v3053_v7 = vpop.f32.mrb[69].mxu1 }
 0x6b4   :  { %v3054_v29 = vadd.f32 %v3292_v55, %v3053_v7  ;;  %v3628_v24 = vpop.f32.mrb[70].mxu1 }
 0x6b5   :  { %3107 = vst.msk [vmem:[%s4265_s20 + $0x30] sm:$0xff] %vm3100_vm2, %v3062_v59  ;;  %v3065_v53 = vadd.f32 %v3628_v24, %v3292_v55  ;;  %v3056_v54 = vpop.f32.mrb[71].mxu1 }
 0x6b6   :  { %3105 = vst.msk [vmem:[%s4265_s20 + $0x20] sm:$0xff] %vm3100_vm2, %v3054_v29  ;;  %v3057_v11 = vadd.f32 %v3292_v55, %v3056_v54 }
 0x6b7   :  { %3108 = vst.msk [vmem:[%s4265_s20 + $0x38] sm:$0xff] %vm3100_vm2, %v3065_v53 }
 0x6b8   :  { %3106 = vst.msk [vmem:[%s4265_s20 + $0x28] sm:$0xff] %vm3100_vm2, %v3057_v11 }
 0x6bf   :  { %v3631_v2 = vpop.f32.mrb[72].mxu1 }
 0x6c0   :  { %v3078_v22 = vadd.f32 %v3631_v2, %v3292_v55  ;;  %v3069_v23 = vpop.f32.mrb[73].mxu1 }
 0x6c1   :  { %v3070_v35 = vadd.f32 %v3292_v55, %v3069_v23  ;;  %v3632_v12 = vpop.f32.mrb[74].mxu1 }
 0x6c2   :  { %3111 = vst.msk [vmem:[%s4265_s20 + $0x50] sm:$0xff] %vm3100_vm2, %v3078_v22  ;;  %v3081_v0 = vadd.f32 %v3632_v12, %v3292_v55  ;;  %v3072_v42 = vpop.f32.mrb[75].mxu1 }
 0x6c3   :  { %3109 = vst.msk [vmem:[%s4265_s20 + $0x40] sm:$0xff] %vm3100_vm2, %v3070_v35  ;;  %v3073_v9 = vadd.f32 %v3292_v55, %v3072_v42 }
 0x6c4   :  { %3112 = vst.msk [vmem:[%s4265_s20 + $0x58] sm:$0xff] %vm3100_vm2, %v3081_v0 }
 0x6c5   :  { %3110 = vst.msk [vmem:[%s4265_s20 + $0x48] sm:$0xff] %vm3100_vm2, %v3073_v9 }
 0x6cf   :  { %v3635_v31 = vpop.f32.mrb[76].mxu1 }
 0x6d0   :  { %v3094_v37 = vadd.f32 %v3635_v31, %v3292_v55  ;;  %v3085_v58 = vpop.f32.mrb[77].mxu1 }
 0x6d1   :  { %v3086_v47 = vadd.f32 %v3292_v55, %v3085_v58  ;;  %v3636_v56 = vpop.f32.mrb[78].mxu1 }
 0x6d2   :  { %3115 = vst.msk [vmem:[%s4265_s20 + $0x70] sm:$0xff] %vm3100_vm2, %v3094_v37  ;;  %v3097_v14 = vadd.f32 %v3636_v56, %v3292_v55  ;;  %v3088_v8 = vpop.f32.mrb[79].mxu1 }
 0x6d3   :  { %3113 = vst.msk [vmem:[%s4265_s20 + $0x60] sm:$0xff] %vm3100_vm2, %v3086_v47  ;;  %v3089_v46 = vadd.f32 %v3292_v55, %v3088_v8 }
 0x6d4   :  { %3116 = vst.msk [vmem:[%s4265_s20 + $0x78] sm:$0xff] %vm3100_vm2, %v3097_v14 }
 0x6d5   :  { %3114 = vst.msk [vmem:[%s4265_s20 + $0x68] sm:$0xff] %vm3100_vm2, %v3089_v46 }
 0x6d6   :  { %4077 = dma.done.wait [#allocation3], 2048  }
 0x6d7   :  { %4078 = vsyncadd [#allocation3], 4294965248 }
 0x6d8   :  { %3136 = vsyncpa [#allocation3], 1 }

</bundles_post_ra>
